<compile_context>
chip_gen: v5e
topology: v5e:2x2
jax: 0.10.0
libtpu: 0.0.40
codegen_flags: <defaults>
</compile_context>

<pallas_src>
import math
import numpy as np
import jax
import jax.numpy as jnp
from jax import lax
from jax.experimental import pallas as pl
from jax.experimental.pallas import tpu as pltpu

# ---- model / problem sizes (small, consistent with the module) --------------
D_MODEL = 32
N_LAYERS = 2
HEADS = 4
D_K = D_MODEL // HEADS
D_FF = 128
LATENT = 64          # Transformer uses Regressor(d_model, latent=64)
SEQ = 8
BATCH = 2
S1 = SEQ + 1         # sequence length after prepending the special token

# Static block-diagonal head mask: zeros outside each head's (D_K x D_K) block.
HEAD_MASK = np.kron(np.eye(HEADS, dtype=np.float32),
                    np.ones((D_K, D_K), dtype=np.float32))      # (D, D)


# ---- single fused kernel: glue + encoder + regressor + L1 loss ---------------
def fused_kernel(src_ref, xt_ref, tok_ref, wlat_ref, hmask_ref,
                 ln1a_ref, ln1b_ref,
                 wq_ref, bq_ref, wk_ref, bk_ref, wv_ref, bv_ref,
                 wo_ref, bo_ref,
                 ln2a_ref, ln2b_ref,
                 w1_ref, b1_ref, w2_ref, b2_ref,
                 lnfa_ref, lnfb_ref,
                 rw1_ref, rb1_ref, g1_ref, be1_ref,
                 rw2_ref, rb2_ref, g2_ref, be2_ref,
                 rw3_ref, rb3_ref, g3_ref, be3_ref,
                 rw4t_ref, rb4_ref,
                 loss_ref):
    inv_sqrt_dk = 1.0 / math.sqrt(D_K)
    hmask = hmask_ref[...]          # (D, D) block-diagonal mask
    wlat = wlat_ref[...]            # (2, D) to_latent weight
    tok = tok_ref[...]              # (1, D) special token (ones)

    def layer_norm(x, alpha, bias, eps=1e-6):
        # torch Norm: alpha * (x - mean) / (std + eps) + bias, std UNBIASED (n-1)
        d = x.shape[-1]
        mean = jnp.mean(x, axis=-1, keepdims=True)
        var = jnp.sum((x - mean) ** 2, axis=-1, keepdims=True) / (d - 1)
        inv = pl.reciprocal(jnp.sqrt(var) + eps, approx=False)   # EUP, not VALU
        return alpha * (x - mean) * inv + bias

    tok_rows = []
    for b in range(BATCH):                              # static unroll (B=2)
        s = src_ref[b]                                  # (S, 2)
        # to_latent: K=2 projection as two VPU FMAs (MXU would be wasted here)
        x_lat = s[:, 0:1] * wlat[0:1, :] + s[:, 1:2] * wlat[1:2, :]   # (S, D)
        x = jnp.concatenate([tok, x_lat], axis=0)       # (S1, D)

        for l in range(N_LAYERS):                       # static unroll over layers
            # --- self-attention sub-layer (mask=None => NO softmax) ---
            x2 = layer_norm(x, ln1a_ref[l], ln1b_ref[l])
            q = jnp.dot(x2, wq_ref[l], preferred_element_type=jnp.float32) + bq_ref[l]
            k = jnp.dot(x2, wk_ref[l], preferred_element_type=jnp.float32) + bk_ref[l]
            v = jnp.dot(x2, wv_ref[l], preferred_element_type=jnp.float32) + bv_ref[l]
            # (q_h k_h^T) v_h == q_h (k_h^T v_h): one K=S1 matmul + block-diag mask
            ktv = lax.dot_general(k, v, (((0,), (0,)), ((), ())),
                                  preferred_element_type=jnp.float32)   # (D, D)
            concat = jnp.dot(q, ktv * hmask,
                             preferred_element_type=jnp.float32) * inv_sqrt_dk
            attn_out = jnp.dot(concat, wo_ref[l],
                               preferred_element_type=jnp.float32) + bo_ref[l]
            x = x + attn_out
            # --- feed-forward sub-layer ---
            x2 = layer_norm(x, ln2a_ref[l], ln2b_ref[l])
            hff = jnp.maximum(
                jnp.dot(x2, w1_ref[l], preferred_element_type=jnp.float32) + b1_ref[l],
                0.0)
            x = x + jnp.dot(hff, w2_ref[l],
                            preferred_element_type=jnp.float32) + b2_ref[l]

        x = layer_norm(x, lnfa_ref[...], lnfb_ref[...])
        tok_rows.append(x[0:1, :])                      # special-token row only

    t = jnp.concatenate(tok_rows, axis=0)               # (B, D)

    # --- regressor: Linear -> BatchNorm1d(training stats) -> leaky_relu (x3),
    #     then Linear -> 1, then L1 loss (mean) ---
    def bn(h, g, be, eps=1e-5):
        mu = jnp.mean(h, axis=0, keepdims=True)
        var = jnp.mean((h - mu) ** 2, axis=0, keepdims=True)   # biased batch stats
        return g * (h - mu) * lax.rsqrt(var + eps) + be

    def lrelu(h):
        return jnp.where(h >= 0, h, 0.01 * h)

    h = jnp.dot(t, rw1_ref[...], preferred_element_type=jnp.float32) + rb1_ref[...]
    h = lrelu(bn(h, g1_ref[...], be1_ref[...]))
    h = jnp.dot(h, rw2_ref[...], preferred_element_type=jnp.float32) + rb2_ref[...]
    h = lrelu(bn(h, g2_ref[...], be2_ref[...]))
    h = jnp.dot(h, rw3_ref[...], preferred_element_type=jnp.float32) + rb3_ref[...]
    h = lrelu(bn(h, g3_ref[...], be3_ref[...]))
    # fc4: LATENT -> 1 as elementwise-mul + lane reduction
    out = jnp.sum(h * rw4t_ref[...], axis=-1, keepdims=True) + rb4_ref[...]   # (B,1)
    diff = jnp.abs(out - xt_ref[...])
    loss_ref[...] = jnp.sum(diff, axis=0, keepdims=True) / diff.size          # (1,1)


# ---- parameter initialization (deterministic, torch-like shapes) --------------
def init_params(key):
    keys = iter(jax.random.split(key, 64))

    def lin(fan_in, fan_out, bias=True):
        bound = 1.0 / math.sqrt(fan_in)
        w = jax.random.uniform(next(keys), (fan_in, fan_out), jnp.float32,
                               -bound, bound)            # stored transposed: x @ w
        if not bias:
            return w
        b = jax.random.uniform(next(keys), (1, fan_out), jnp.float32, -bound, bound)
        return w, b

    def stack_lin(fan_in, fan_out):
        ws, bs = [], []
        for _ in range(N_LAYERS):
            w, b = lin(fan_in, fan_out)
            ws.append(w); bs.append(b)
        return jnp.stack(ws), jnp.stack(bs)              # (N, fi, fo), (N, 1, fo)

    P = {}
    P["special_token"] = jnp.ones((1, D_MODEL), jnp.float32)
    P["w_to_latent"] = lin(2, D_MODEL, bias=False)       # (2, D)

    P["ln1_a"] = jnp.ones((N_LAYERS, 1, D_MODEL), jnp.float32)
    P["ln1_b"] = jnp.zeros((N_LAYERS, 1, D_MODEL), jnp.float32)
    P["wq"], P["bq"] = stack_lin(D_MODEL, D_MODEL)
    P["wk"], P["bk"] = stack_lin(D_MODEL, D_MODEL)
    P["wv"], P["bv"] = stack_lin(D_MODEL, D_MODEL)
    P["wo"], P["bo"] = stack_lin(D_MODEL, D_MODEL)
    P["ln2_a"] = jnp.ones((N_LAYERS, 1, D_MODEL), jnp.float32)
    P["ln2_b"] = jnp.zeros((N_LAYERS, 1, D_MODEL), jnp.float32)
    P["w1"], P["b1"] = stack_lin(D_MODEL, D_FF)
    P["w2"], P["b2"] = stack_lin(D_FF, D_MODEL)
    P["lnf_a"] = jnp.ones((1, D_MODEL), jnp.float32)
    P["lnf_b"] = jnp.zeros((1, D_MODEL), jnp.float32)

    P["rw1"], P["rb1"] = lin(D_MODEL, LATENT)
    P["g1"], P["be1"] = jnp.ones((1, LATENT), jnp.float32), jnp.zeros((1, LATENT), jnp.float32)
    P["rw2"], P["rb2"] = lin(LATENT, LATENT)
    P["g2"], P["be2"] = jnp.ones((1, LATENT), jnp.float32), jnp.zeros((1, LATENT), jnp.float32)
    P["rw3"], P["rb3"] = lin(LATENT, LATENT)
    P["g3"], P["be3"] = jnp.ones((1, LATENT), jnp.float32), jnp.zeros((1, LATENT), jnp.float32)
    w4, b4 = lin(LATENT, 1)
    P["rw4t"] = w4.T                                     # (1, LATENT)
    P["rb4"] = b4                                        # (1, 1)
    return P


ENC_PARAM_ORDER = ["ln1_a", "ln1_b", "wq", "bq", "wk", "bk", "wv", "bv",
                   "wo", "bo", "ln2_a", "ln2_b", "w1", "b1", "w2", "b2",
                   "lnf_a", "lnf_b"]
REG_PARAM_ORDER = ["rw1", "rb1", "g1", "be1", "rw2", "rb2", "g2", "be2",
                   "rw3", "rb3", "g3", "be3", "rw4t", "rb4"]


# ---- full forward: ONE pallas_call --------------------------------------------
def transformer_forward(src, x_target, P):
    inputs = ([src, x_target, P["special_token"], P["w_to_latent"],
               jnp.asarray(HEAD_MASK)]
              + [P[n] for n in ENC_PARAM_ORDER]
              + [P[n] for n in REG_PARAM_ORDER])
    vmem = pl.BlockSpec(memory_space=pltpu.MemorySpace.VMEM)
    loss = pl.pallas_call(
        fused_kernel,
        out_shape=jax.ShapeDtypeStruct((1, 1), jnp.float32),
        in_specs=[vmem] * len(inputs),
        out_specs=vmem,
    )(*inputs)
    return loss[0, 0]


# ---- pure-JAX reference (mirrors the PyTorch module exactly) -------------------
def reference_forward(src, x_target, P):
    B = src.shape[0]

    def layer_norm(x, alpha, bias, eps=1e-6):
        d = x.shape[-1]
        mean = jnp.mean(x, axis=-1, keepdims=True)
        var = jnp.sum((x - mean) ** 2, axis=-1, keepdims=True) / (d - 1)
        return alpha * (x - mean) / (jnp.sqrt(var) + eps) + bias

    src_lat = jnp.einsum("bsk,kd->bsd", src, P["w_to_latent"])
    tok = jnp.broadcast_to(P["special_token"][None], (B, 1, D_MODEL))
    x = jnp.concatenate([tok, src_lat], axis=1)
    for l in range(N_LAYERS):
        x2 = layer_norm(x, P["ln1_a"][l], P["ln1_b"][l])
        q = x2 @ P["wq"][l] + P["bq"][l]
        k = x2 @ P["wk"][l] + P["bk"][l]
        v = x2 @ P["wv"][l] + P["bv"][l]
        S = q.shape[1]
        qh = q.reshape(B, S, HEADS, D_K).transpose(0, 2, 1, 3)
        kh = k.reshape(B, S, HEADS, D_K).transpose(0, 2, 1, 3)
        vh = v.reshape(B, S, HEADS, D_K).transpose(0, 2, 1, 3)
        scores = jnp.einsum("bhqd,bhkd->bhqk", qh, kh) / math.sqrt(D_K)  # no softmax
        oh = jnp.einsum("bhqk,bhkd->bhqd", scores, vh)
        concat = oh.transpose(0, 2, 1, 3).reshape(B, S, D_MODEL)
        x = x + concat @ P["wo"][l] + P["bo"][l]
        x2 = layer_norm(x, P["ln2_a"][l], P["ln2_b"][l])
        hff = jnp.maximum(x2 @ P["w1"][l] + P["b1"][l], 0.0)
        x = x + hff @ P["w2"][l] + P["b2"][l]
    x = layer_norm(x, P["lnf_a"], P["lnf_b"])
    t = x[:, 0, :]

    def bn(h, g, be, eps=1e-5):
        mu = h.mean(axis=0, keepdims=True)
        var = ((h - mu) ** 2).mean(axis=0, keepdims=True)
        return g * (h - mu) / jnp.sqrt(var + eps) + be

    def lrelu(h):
        return jnp.where(h >= 0, h, 0.01 * h)

    h = lrelu(bn(t @ P["rw1"] + P["rb1"], P["g1"], P["be1"]))
    h = lrelu(bn(h @ P["rw2"] + P["rb2"], P["g2"], P["be2"]))
    h = lrelu(bn(h @ P["rw3"] + P["rb3"], P["g3"], P["be3"]))
    out = jnp.sum(h * P["rw4t"], axis=-1, keepdims=True) + P["rb4"]
    return jnp.mean(jnp.abs(out - x_target))


if __name__ == "__main__":
    key = jax.random.PRNGKey(0)
    k_par, k_src, k_x = jax.random.split(key, 3)
    params = init_params(k_par)

    src = jax.random.normal(k_src, (BATCH, SEQ, 2), jnp.float32)     # (B, S, 2)
    x_target = jax.random.normal(k_x, (BATCH, 1), jnp.float32)       # regressor target

    loss = transformer_forward(src, x_target, params)
    loss = jax.block_until_ready(loss)

    ref = reference_forward(src, x_target, params)
    assert jnp.allclose(loss, ref, rtol=1e-3, atol=1e-3), (float(loss), float(ref))

    print("KERNEL_OK")
</pallas_src>

<mosaic_0001>
module attributes {stable_mosaic.version = 11 : i64} {
  func.func @fused_kernel(%arg0: memref<2x8x2xf32, #tpu.memory_space<vmem>>, %arg1: memref<2x1xf32, #tpu.memory_space<vmem>>, %arg2: memref<1x32xf32, #tpu.memory_space<vmem>>, %arg3: memref<2x32xf32, #tpu.memory_space<vmem>>, %arg4: memref<32x32xf32, #tpu.memory_space<vmem>>, %arg5: memref<2x1x32xf32, #tpu.memory_space<vmem>>, %arg6: memref<2x1x32xf32, #tpu.memory_space<vmem>>, %arg7: memref<2x32x32xf32, #tpu.memory_space<vmem>>, %arg8: memref<2x1x32xf32, #tpu.memory_space<vmem>>, %arg9: memref<2x32x32xf32, #tpu.memory_space<vmem>>, %arg10: memref<2x1x32xf32, #tpu.memory_space<vmem>>, %arg11: memref<2x32x32xf32, #tpu.memory_space<vmem>>, %arg12: memref<2x1x32xf32, #tpu.memory_space<vmem>>, %arg13: memref<2x32x32xf32, #tpu.memory_space<vmem>>, %arg14: memref<2x1x32xf32, #tpu.memory_space<vmem>>, %arg15: memref<2x1x32xf32, #tpu.memory_space<vmem>>, %arg16: memref<2x1x32xf32, #tpu.memory_space<vmem>>, %arg17: memref<2x32x128xf32, #tpu.memory_space<vmem>>, %arg18: memref<2x1x128xf32, #tpu.memory_space<vmem>>, %arg19: memref<2x128x32xf32, #tpu.memory_space<vmem>>, %arg20: memref<2x1x32xf32, #tpu.memory_space<vmem>>, %arg21: memref<1x32xf32, #tpu.memory_space<vmem>>, %arg22: memref<1x32xf32, #tpu.memory_space<vmem>>, %arg23: memref<32x64xf32, #tpu.memory_space<vmem>>, %arg24: memref<1x64xf32, #tpu.memory_space<vmem>>, %arg25: memref<1x64xf32, #tpu.memory_space<vmem>>, %arg26: memref<1x64xf32, #tpu.memory_space<vmem>>, %arg27: memref<64x64xf32, #tpu.memory_space<vmem>>, %arg28: memref<1x64xf32, #tpu.memory_space<vmem>>, %arg29: memref<1x64xf32, #tpu.memory_space<vmem>>, %arg30: memref<1x64xf32, #tpu.memory_space<vmem>>, %arg31: memref<64x64xf32, #tpu.memory_space<vmem>>, %arg32: memref<1x64xf32, #tpu.memory_space<vmem>>, %arg33: memref<1x64xf32, #tpu.memory_space<vmem>>, %arg34: memref<1x64xf32, #tpu.memory_space<vmem>>, %arg35: memref<1x64xf32, #tpu.memory_space<vmem>>, %arg36: memref<1x1xf32, #tpu.memory_space<vmem>>, %arg37: memref<1x1xf32, #tpu.memory_space<vmem>>) attributes {dimension_semantics = [], scalar_prefetch = 0 : i64, scratch_operands = 0 : i64, tpu.core_type = #tpu.core_type<tc>} {
    %c0 = arith.constant 0 : index
    %c0_0 = arith.constant 0 : index
    %0 = vector.load %arg4[%c0, %c0_0] : memref<32x32xf32, #tpu.memory_space<vmem>>, vector<32x32xf32>
    %c0_1 = arith.constant 0 : index
    %c0_2 = arith.constant 0 : index
    %1 = vector.load %arg3[%c0_1, %c0_2] : memref<2x32xf32, #tpu.memory_space<vmem>>, vector<2x32xf32>
    %c0_3 = arith.constant 0 : index
    %c0_4 = arith.constant 0 : index
    %2 = vector.load %arg2[%c0_3, %c0_4] : memref<1x32xf32, #tpu.memory_space<vmem>>, vector<1x32xf32>
    %c0_5 = arith.constant 0 : index
    %c0_6 = arith.constant 0 : index
    %c0_7 = arith.constant 0 : index
    %3 = vector.load %arg0[%c0_5, %c0_6, %c0_7] : memref<2x8x2xf32, #tpu.memory_space<vmem>>, vector<1x8x2xf32>
    %4 = vector.shape_cast %3 : vector<1x8x2xf32> to vector<8x2xf32>
    %5 = vector.extract_strided_slice %4 {offsets = [0, 0], sizes = [8, 1], strides = [1, 1]} : vector<8x2xf32> to vector<8x1xf32>
    %6 = vector.extract_strided_slice %1 {offsets = [0, 0], sizes = [1, 32], strides = [1, 1]} : vector<2x32xf32> to vector<1x32xf32>
    %7 = vector.broadcast %5 : vector<8x1xf32> to vector<8x32xf32>
    %8 = vector.broadcast %6 : vector<1x32xf32> to vector<8x32xf32>
    %9 = arith.mulf %7, %8 : vector<8x32xf32>
    %10 = vector.extract_strided_slice %4 {offsets = [0, 1], sizes = [8, 1], strides = [1, 1]} : vector<8x2xf32> to vector<8x1xf32>
    %11 = vector.extract_strided_slice %1 {offsets = [1, 0], sizes = [1, 32], strides = [1, 1]} : vector<2x32xf32> to vector<1x32xf32>
    %12 = vector.broadcast %10 : vector<8x1xf32> to vector<8x32xf32>
    %13 = vector.broadcast %11 : vector<1x32xf32> to vector<8x32xf32>
    %14 = arith.mulf %12, %13 : vector<8x32xf32>
    %15 = arith.addf %9, %14 : vector<8x32xf32>
    %16 = tpu.concatenate %2, %15 in 0 : vector<1x32xf32>, vector<8x32xf32> -> vector<9x32xf32>
    %c0_8 = arith.constant 0 : index
    %c0_9 = arith.constant 0 : index
    %c0_10 = arith.constant 0 : index
    %17 = vector.load %arg5[%c0_8, %c0_9, %c0_10] : memref<2x1x32xf32, #tpu.memory_space<vmem>>, vector<1x1x32xf32>
    %18 = vector.shape_cast %17 : vector<1x1x32xf32> to vector<1x32xf32>
    %c0_11 = arith.constant 0 : index
    %c0_12 = arith.constant 0 : index
    %c0_13 = arith.constant 0 : index
    %19 = vector.load %arg6[%c0_11, %c0_12, %c0_13] : memref<2x1x32xf32, #tpu.memory_space<vmem>>, vector<1x1x32xf32>
    %20 = vector.shape_cast %19 : vector<1x1x32xf32> to vector<1x32xf32>
    %cst = arith.constant dense<0.000000e+00> : vector<9xf32>
    %21 = vector.multi_reduction <add>, %16, %cst [1] : vector<9x32xf32> to vector<9xf32>
    %22 = vector.shape_cast %21 : vector<9xf32> to vector<9x1xf32>
    %cst_14 = arith.constant 3.200000e+01 : f32
    %23 = vector.broadcast %cst_14 : f32 to vector<9x1xf32>
    %24 = arith.divf %22, %23 : vector<9x1xf32>
    %25 = vector.broadcast %24 : vector<9x1xf32> to vector<9x32xf32>
    %26 = arith.subf %16, %25 : vector<9x32xf32>
    %27 = arith.mulf %26, %26 : vector<9x32xf32>
    %cst_15 = arith.constant dense<0.000000e+00> : vector<9xf32>
    %28 = vector.multi_reduction <add>, %27, %cst_15 [1] : vector<9x32xf32> to vector<9xf32>
    %29 = vector.shape_cast %28 : vector<9xf32> to vector<9x1xf32>
    %cst_16 = arith.constant 3.100000e+01 : f32
    %30 = vector.broadcast %cst_16 : f32 to vector<9x1xf32>
    %31 = arith.divf %29, %30 : vector<9x1xf32>
    %32 = math.sqrt %31 : vector<9x1xf32>
    %cst_17 = arith.constant 9.99999997E-7 : f32
    %33 = vector.broadcast %cst_17 : f32 to vector<9x1xf32>
    %34 = arith.addf %32, %33 : vector<9x1xf32>
    %35 = tpu.reciprocal %34 : vector<9x1xf32> -> vector<9x1xf32>
    %36 = vector.broadcast %24 : vector<9x1xf32> to vector<9x32xf32>
    %37 = arith.subf %16, %36 : vector<9x32xf32>
    %38 = vector.broadcast %18 : vector<1x32xf32> to vector<9x32xf32>
    %39 = arith.mulf %38, %37 : vector<9x32xf32>
    %40 = vector.broadcast %35 : vector<9x1xf32> to vector<9x32xf32>
    %41 = arith.mulf %39, %40 : vector<9x32xf32>
    %42 = vector.broadcast %20 : vector<1x32xf32> to vector<9x32xf32>
    %43 = arith.addf %41, %42 : vector<9x32xf32>
    %c0_18 = arith.constant 0 : index
    %c0_19 = arith.constant 0 : index
    %c0_20 = arith.constant 0 : index
    %44 = vector.load %arg7[%c0_18, %c0_19, %c0_20] : memref<2x32x32xf32, #tpu.memory_space<vmem>>, vector<1x32x32xf32>
    %45 = vector.shape_cast %44 : vector<1x32x32xf32> to vector<32x32xf32>
    %cst_21 = arith.constant dense<0.000000e+00> : vector<9x32xf32>
    %46 = tpu.matmul %43, %45, %cst_21 {dimension_numbers = #tpu.dot_dimension_numbers<[1], [0], [0], [1], [0, 0, 1, 1], [], []>} : vector<9x32xf32>, vector<32x32xf32>, vector<9x32xf32> -> vector<9x32xf32>
    %c0_22 = arith.constant 0 : index
    %c0_23 = arith.constant 0 : index
    %c0_24 = arith.constant 0 : index
    %47 = vector.load %arg8[%c0_22, %c0_23, %c0_24] : memref<2x1x32xf32, #tpu.memory_space<vmem>>, vector<1x1x32xf32>
    %48 = vector.shape_cast %47 : vector<1x1x32xf32> to vector<1x32xf32>
    %49 = vector.broadcast %48 : vector<1x32xf32> to vector<9x32xf32>
    %50 = arith.addf %46, %49 : vector<9x32xf32>
    %c0_25 = arith.constant 0 : index
    %c0_26 = arith.constant 0 : index
    %c0_27 = arith.constant 0 : index
    %51 = vector.load %arg9[%c0_25, %c0_26, %c0_27] : memref<2x32x32xf32, #tpu.memory_space<vmem>>, vector<1x32x32xf32>
    %52 = vector.shape_cast %51 : vector<1x32x32xf32> to vector<32x32xf32>
    %cst_28 = arith.constant dense<0.000000e+00> : vector<9x32xf32>
    %53 = tpu.matmul %43, %52, %cst_28 {dimension_numbers = #tpu.dot_dimension_numbers<[1], [0], [0], [1], [0, 0, 1, 1], [], []>} : vector<9x32xf32>, vector<32x32xf32>, vector<9x32xf32> -> vector<9x32xf32>
    %c0_29 = arith.constant 0 : index
    %c0_30 = arith.constant 0 : index
    %c0_31 = arith.constant 0 : index
    %54 = vector.load %arg10[%c0_29, %c0_30, %c0_31] : memref<2x1x32xf32, #tpu.memory_space<vmem>>, vector<1x1x32xf32>
    %55 = vector.shape_cast %54 : vector<1x1x32xf32> to vector<1x32xf32>
    %56 = vector.broadcast %55 : vector<1x32xf32> to vector<9x32xf32>
    %57 = arith.addf %53, %56 : vector<9x32xf32>
    %c0_32 = arith.constant 0 : index
    %c0_33 = arith.constant 0 : index
    %c0_34 = arith.constant 0 : index
    %58 = vector.load %arg11[%c0_32, %c0_33, %c0_34] : memref<2x32x32xf32, #tpu.memory_space<vmem>>, vector<1x32x32xf32>
    %59 = vector.shape_cast %58 : vector<1x32x32xf32> to vector<32x32xf32>
    %cst_35 = arith.constant dense<0.000000e+00> : vector<9x32xf32>
    %60 = tpu.matmul %43, %59, %cst_35 {dimension_numbers = #tpu.dot_dimension_numbers<[1], [0], [0], [1], [0, 0, 1, 1], [], []>} : vector<9x32xf32>, vector<32x32xf32>, vector<9x32xf32> -> vector<9x32xf32>
    %c0_36 = arith.constant 0 : index
    %c0_37 = arith.constant 0 : index
    %c0_38 = arith.constant 0 : index
    %61 = vector.load %arg12[%c0_36, %c0_37, %c0_38] : memref<2x1x32xf32, #tpu.memory_space<vmem>>, vector<1x1x32xf32>
    %62 = vector.shape_cast %61 : vector<1x1x32xf32> to vector<1x32xf32>
    %63 = vector.broadcast %62 : vector<1x32xf32> to vector<9x32xf32>
    %64 = arith.addf %60, %63 : vector<9x32xf32>
    %cst_39 = arith.constant dense<0.000000e+00> : vector<32x32xf32>
    %65 = tpu.matmul %57, %64, %cst_39 {dimension_numbers = #tpu.dot_dimension_numbers<[0], [0], [1], [1], [0, 1, 1, 1], [], []>} : vector<9x32xf32>, vector<9x32xf32>, vector<32x32xf32> -> vector<32x32xf32>
    %66 = arith.mulf %65, %0 : vector<32x32xf32>
    %cst_40 = arith.constant dense<0.000000e+00> : vector<9x32xf32>
    %67 = tpu.matmul %50, %66, %cst_40 {dimension_numbers = #tpu.dot_dimension_numbers<[1], [0], [0], [1], [0, 0, 1, 1], [], []>} : vector<9x32xf32>, vector<32x32xf32>, vector<9x32xf32> -> vector<9x32xf32>
    %cst_41 = arith.constant 0.353553385 : f32
    %68 = vector.broadcast %cst_41 : f32 to vector<9x32xf32>
    %69 = arith.mulf %67, %68 : vector<9x32xf32>
    %c0_42 = arith.constant 0 : index
    %c0_43 = arith.constant 0 : index
    %c0_44 = arith.constant 0 : index
    %70 = vector.load %arg13[%c0_42, %c0_43, %c0_44] : memref<2x32x32xf32, #tpu.memory_space<vmem>>, vector<1x32x32xf32>
    %71 = vector.shape_cast %70 : vector<1x32x32xf32> to vector<32x32xf32>
    %cst_45 = arith.constant dense<0.000000e+00> : vector<9x32xf32>
    %72 = tpu.matmul %69, %71, %cst_45 {dimension_numbers = #tpu.dot_dimension_numbers<[1], [0], [0], [1], [0, 0, 1, 1], [], []>} : vector<9x32xf32>, vector<32x32xf32>, vector<9x32xf32> -> vector<9x32xf32>
    %c0_46 = arith.constant 0 : index
    %c0_47 = arith.constant 0 : index
    %c0_48 = arith.constant 0 : index
    %73 = vector.load %arg14[%c0_46, %c0_47, %c0_48] : memref<2x1x32xf32, #tpu.memory_space<vmem>>, vector<1x1x32xf32>
    %74 = vector.shape_cast %73 : vector<1x1x32xf32> to vector<1x32xf32>
    %75 = vector.broadcast %74 : vector<1x32xf32> to vector<9x32xf32>
    %76 = arith.addf %72, %75 : vector<9x32xf32>
    %77 = arith.addf %16, %76 : vector<9x32xf32>
    %c0_49 = arith.constant 0 : index
    %c0_50 = arith.constant 0 : index
    %c0_51 = arith.constant 0 : index
    %78 = vector.load %arg15[%c0_49, %c0_50, %c0_51] : memref<2x1x32xf32, #tpu.memory_space<vmem>>, vector<1x1x32xf32>
    %79 = vector.shape_cast %78 : vector<1x1x32xf32> to vector<1x32xf32>
    %c0_52 = arith.constant 0 : index
    %c0_53 = arith.constant 0 : index
    %c0_54 = arith.constant 0 : index
    %80 = vector.load %arg16[%c0_52, %c0_53, %c0_54] : memref<2x1x32xf32, #tpu.memory_space<vmem>>, vector<1x1x32xf32>
    %81 = vector.shape_cast %80 : vector<1x1x32xf32> to vector<1x32xf32>
    %cst_55 = arith.constant dense<0.000000e+00> : vector<9xf32>
    %82 = vector.multi_reduction <add>, %77, %cst_55 [1] : vector<9x32xf32> to vector<9xf32>
    %83 = vector.shape_cast %82 : vector<9xf32> to vector<9x1xf32>
    %cst_56 = arith.constant 3.200000e+01 : f32
    %84 = vector.broadcast %cst_56 : f32 to vector<9x1xf32>
    %85 = arith.divf %83, %84 : vector<9x1xf32>
    %86 = vector.broadcast %85 : vector<9x1xf32> to vector<9x32xf32>
    %87 = arith.subf %77, %86 : vector<9x32xf32>
    %88 = arith.mulf %87, %87 : vector<9x32xf32>
    %cst_57 = arith.constant dense<0.000000e+00> : vector<9xf32>
    %89 = vector.multi_reduction <add>, %88, %cst_57 [1] : vector<9x32xf32> to vector<9xf32>
    %90 = vector.shape_cast %89 : vector<9xf32> to vector<9x1xf32>
    %cst_58 = arith.constant 3.100000e+01 : f32
    %91 = vector.broadcast %cst_58 : f32 to vector<9x1xf32>
    %92 = arith.divf %90, %91 : vector<9x1xf32>
    %93 = math.sqrt %92 : vector<9x1xf32>
    %cst_59 = arith.constant 9.99999997E-7 : f32
    %94 = vector.broadcast %cst_59 : f32 to vector<9x1xf32>
    %95 = arith.addf %93, %94 : vector<9x1xf32>
    %96 = tpu.reciprocal %95 : vector<9x1xf32> -> vector<9x1xf32>
    %97 = vector.broadcast %85 : vector<9x1xf32> to vector<9x32xf32>
    %98 = arith.subf %77, %97 : vector<9x32xf32>
    %99 = vector.broadcast %79 : vector<1x32xf32> to vector<9x32xf32>
    %100 = arith.mulf %99, %98 : vector<9x32xf32>
    %101 = vector.broadcast %96 : vector<9x1xf32> to vector<9x32xf32>
    %102 = arith.mulf %100, %101 : vector<9x32xf32>
    %103 = vector.broadcast %81 : vector<1x32xf32> to vector<9x32xf32>
    %104 = arith.addf %102, %103 : vector<9x32xf32>
    %c0_60 = arith.constant 0 : index
    %c0_61 = arith.constant 0 : index
    %c0_62 = arith.constant 0 : index
    %105 = vector.load %arg17[%c0_60, %c0_61, %c0_62] : memref<2x32x128xf32, #tpu.memory_space<vmem>>, vector<1x32x128xf32>
    %106 = vector.shape_cast %105 : vector<1x32x128xf32> to vector<32x128xf32>
    %cst_63 = arith.constant dense<0.000000e+00> : vector<9x128xf32>
    %107 = tpu.matmul %104, %106, %cst_63 {dimension_numbers = #tpu.dot_dimension_numbers<[1], [0], [0], [1], [0, 0, 1, 1], [], []>} : vector<9x32xf32>, vector<32x128xf32>, vector<9x128xf32> -> vector<9x128xf32>
    %c0_64 = arith.constant 0 : index
    %c0_65 = arith.constant 0 : index
    %c0_66 = arith.constant 0 : index
    %108 = vector.load %arg18[%c0_64, %c0_65, %c0_66] : memref<2x1x128xf32, #tpu.memory_space<vmem>>, vector<1x1x128xf32>
    %109 = vector.shape_cast %108 : vector<1x1x128xf32> to vector<1x128xf32>
    %110 = vector.broadcast %109 : vector<1x128xf32> to vector<9x128xf32>
    %111 = arith.addf %107, %110 : vector<9x128xf32>
    %cst_67 = arith.constant 0.000000e+00 : f32
    %112 = vector.broadcast %cst_67 : f32 to vector<9x128xf32>
    %113 = arith.maximumf %111, %112 : vector<9x128xf32>
    %c0_68 = arith.constant 0 : index
    %c0_69 = arith.constant 0 : index
    %c0_70 = arith.constant 0 : index
    %114 = vector.load %arg19[%c0_68, %c0_69, %c0_70] : memref<2x128x32xf32, #tpu.memory_space<vmem>>, vector<1x128x32xf32>
    %115 = vector.shape_cast %114 : vector<1x128x32xf32> to vector<128x32xf32>
    %cst_71 = arith.constant dense<0.000000e+00> : vector<9x32xf32>
    %116 = tpu.matmul %113, %115, %cst_71 {dimension_numbers = #tpu.dot_dimension_numbers<[1], [0], [0], [1], [0, 0, 1, 1], [], []>} : vector<9x128xf32>, vector<128x32xf32>, vector<9x32xf32> -> vector<9x32xf32>
    %117 = arith.addf %77, %116 : vector<9x32xf32>
    %c0_72 = arith.constant 0 : index
    %c0_73 = arith.constant 0 : index
    %c0_74 = arith.constant 0 : index
    %118 = vector.load %arg20[%c0_72, %c0_73, %c0_74] : memref<2x1x32xf32, #tpu.memory_space<vmem>>, vector<1x1x32xf32>
    %119 = vector.shape_cast %118 : vector<1x1x32xf32> to vector<1x32xf32>
    %120 = vector.broadcast %119 : vector<1x32xf32> to vector<9x32xf32>
    %121 = arith.addf %117, %120 : vector<9x32xf32>
    %c1 = arith.constant 1 : index
    %c0_75 = arith.constant 0 : index
    %c0_76 = arith.constant 0 : index
    %122 = vector.load %arg5[%c1, %c0_75, %c0_76] : memref<2x1x32xf32, #tpu.memory_space<vmem>>, vector<1x1x32xf32>
    %123 = vector.shape_cast %122 : vector<1x1x32xf32> to vector<1x32xf32>
    %c1_77 = arith.constant 1 : index
    %c0_78 = arith.constant 0 : index
    %c0_79 = arith.constant 0 : index
    %124 = vector.load %arg6[%c1_77, %c0_78, %c0_79] : memref<2x1x32xf32, #tpu.memory_space<vmem>>, vector<1x1x32xf32>
    %125 = vector.shape_cast %124 : vector<1x1x32xf32> to vector<1x32xf32>
    %cst_80 = arith.constant dense<0.000000e+00> : vector<9xf32>
    %126 = vector.multi_reduction <add>, %121, %cst_80 [1] : vector<9x32xf32> to vector<9xf32>
    %127 = vector.shape_cast %126 : vector<9xf32> to vector<9x1xf32>
    %cst_81 = arith.constant 3.200000e+01 : f32
    %128 = vector.broadcast %cst_81 : f32 to vector<9x1xf32>
    %129 = arith.divf %127, %128 : vector<9x1xf32>
    %130 = vector.broadcast %129 : vector<9x1xf32> to vector<9x32xf32>
    %131 = arith.subf %121, %130 : vector<9x32xf32>
    %132 = arith.mulf %131, %131 : vector<9x32xf32>
    %cst_82 = arith.constant dense<0.000000e+00> : vector<9xf32>
    %133 = vector.multi_reduction <add>, %132, %cst_82 [1] : vector<9x32xf32> to vector<9xf32>
    %134 = vector.shape_cast %133 : vector<9xf32> to vector<9x1xf32>
    %cst_83 = arith.constant 3.100000e+01 : f32
    %135 = vector.broadcast %cst_83 : f32 to vector<9x1xf32>
    %136 = arith.divf %134, %135 : vector<9x1xf32>
    %137 = math.sqrt %136 : vector<9x1xf32>
    %cst_84 = arith.constant 9.99999997E-7 : f32
    %138 = vector.broadcast %cst_84 : f32 to vector<9x1xf32>
    %139 = arith.addf %137, %138 : vector<9x1xf32>
    %140 = tpu.reciprocal %139 : vector<9x1xf32> -> vector<9x1xf32>
    %141 = vector.broadcast %129 : vector<9x1xf32> to vector<9x32xf32>
    %142 = arith.subf %121, %141 : vector<9x32xf32>
    %143 = vector.broadcast %123 : vector<1x32xf32> to vector<9x32xf32>
    %144 = arith.mulf %143, %142 : vector<9x32xf32>
    %145 = vector.broadcast %140 : vector<9x1xf32> to vector<9x32xf32>
    %146 = arith.mulf %144, %145 : vector<9x32xf32>
    %147 = vector.broadcast %125 : vector<1x32xf32> to vector<9x32xf32>
    %148 = arith.addf %146, %147 : vector<9x32xf32>
    %c1_85 = arith.constant 1 : index
    %c0_86 = arith.constant 0 : index
    %c0_87 = arith.constant 0 : index
    %149 = vector.load %arg7[%c1_85, %c0_86, %c0_87] : memref<2x32x32xf32, #tpu.memory_space<vmem>>, vector<1x32x32xf32>
    %150 = vector.shape_cast %149 : vector<1x32x32xf32> to vector<32x32xf32>
    %cst_88 = arith.constant dense<0.000000e+00> : vector<9x32xf32>
    %151 = tpu.matmul %148, %150, %cst_88 {dimension_numbers = #tpu.dot_dimension_numbers<[1], [0], [0], [1], [0, 0, 1, 1], [], []>} : vector<9x32xf32>, vector<32x32xf32>, vector<9x32xf32> -> vector<9x32xf32>
    %c1_89 = arith.constant 1 : index
    %c0_90 = arith.constant 0 : index
    %c0_91 = arith.constant 0 : index
    %152 = vector.load %arg8[%c1_89, %c0_90, %c0_91] : memref<2x1x32xf32, #tpu.memory_space<vmem>>, vector<1x1x32xf32>
    %153 = vector.shape_cast %152 : vector<1x1x32xf32> to vector<1x32xf32>
    %154 = vector.broadcast %153 : vector<1x32xf32> to vector<9x32xf32>
    %155 = arith.addf %151, %154 : vector<9x32xf32>
    %c1_92 = arith.constant 1 : index
    %c0_93 = arith.constant 0 : index
    %c0_94 = arith.constant 0 : index
    %156 = vector.load %arg9[%c1_92, %c0_93, %c0_94] : memref<2x32x32xf32, #tpu.memory_space<vmem>>, vector<1x32x32xf32>
    %157 = vector.shape_cast %156 : vector<1x32x32xf32> to vector<32x32xf32>
    %cst_95 = arith.constant dense<0.000000e+00> : vector<9x32xf32>
    %158 = tpu.matmul %148, %157, %cst_95 {dimension_numbers = #tpu.dot_dimension_numbers<[1], [0], [0], [1], [0, 0, 1, 1], [], []>} : vector<9x32xf32>, vector<32x32xf32>, vector<9x32xf32> -> vector<9x32xf32>
    %c1_96 = arith.constant 1 : index
    %c0_97 = arith.constant 0 : index
    %c0_98 = arith.constant 0 : index
    %159 = vector.load %arg10[%c1_96, %c0_97, %c0_98] : memref<2x1x32xf32, #tpu.memory_space<vmem>>, vector<1x1x32xf32>
    %160 = vector.shape_cast %159 : vector<1x1x32xf32> to vector<1x32xf32>
    %161 = vector.broadcast %160 : vector<1x32xf32> to vector<9x32xf32>
    %162 = arith.addf %158, %161 : vector<9x32xf32>
    %c1_99 = arith.constant 1 : index
    %c0_100 = arith.constant 0 : index
    %c0_101 = arith.constant 0 : index
    %163 = vector.load %arg11[%c1_99, %c0_100, %c0_101] : memref<2x32x32xf32, #tpu.memory_space<vmem>>, vector<1x32x32xf32>
    %164 = vector.shape_cast %163 : vector<1x32x32xf32> to vector<32x32xf32>
    %cst_102 = arith.constant dense<0.000000e+00> : vector<9x32xf32>
    %165 = tpu.matmul %148, %164, %cst_102 {dimension_numbers = #tpu.dot_dimension_numbers<[1], [0], [0], [1], [0, 0, 1, 1], [], []>} : vector<9x32xf32>, vector<32x32xf32>, vector<9x32xf32> -> vector<9x32xf32>
    %c1_103 = arith.constant 1 : index
    %c0_104 = arith.constant 0 : index
    %c0_105 = arith.constant 0 : index
    %166 = vector.load %arg12[%c1_103, %c0_104, %c0_105] : memref<2x1x32xf32, #tpu.memory_space<vmem>>, vector<1x1x32xf32>
    %167 = vector.shape_cast %166 : vector<1x1x32xf32> to vector<1x32xf32>
    %168 = vector.broadcast %167 : vector<1x32xf32> to vector<9x32xf32>
    %169 = arith.addf %165, %168 : vector<9x32xf32>
    %cst_106 = arith.constant dense<0.000000e+00> : vector<32x32xf32>
    %170 = tpu.matmul %162, %169, %cst_106 {dimension_numbers = #tpu.dot_dimension_numbers<[0], [0], [1], [1], [0, 1, 1, 1], [], []>} : vector<9x32xf32>, vector<9x32xf32>, vector<32x32xf32> -> vector<32x32xf32>
    %171 = arith.mulf %170, %0 : vector<32x32xf32>
    %cst_107 = arith.constant dense<0.000000e+00> : vector<9x32xf32>
    %172 = tpu.matmul %155, %171, %cst_107 {dimension_numbers = #tpu.dot_dimension_numbers<[1], [0], [0], [1], [0, 0, 1, 1], [], []>} : vector<9x32xf32>, vector<32x32xf32>, vector<9x32xf32> -> vector<9x32xf32>
    %cst_108 = arith.constant 0.353553385 : f32
    %173 = vector.broadcast %cst_108 : f32 to vector<9x32xf32>
    %174 = arith.mulf %172, %173 : vector<9x32xf32>
    %c1_109 = arith.constant 1 : index
    %c0_110 = arith.constant 0 : index
    %c0_111 = arith.constant 0 : index
    %175 = vector.load %arg13[%c1_109, %c0_110, %c0_111] : memref<2x32x32xf32, #tpu.memory_space<vmem>>, vector<1x32x32xf32>
    %176 = vector.shape_cast %175 : vector<1x32x32xf32> to vector<32x32xf32>
    %cst_112 = arith.constant dense<0.000000e+00> : vector<9x32xf32>
    %177 = tpu.matmul %174, %176, %cst_112 {dimension_numbers = #tpu.dot_dimension_numbers<[1], [0], [0], [1], [0, 0, 1, 1], [], []>} : vector<9x32xf32>, vector<32x32xf32>, vector<9x32xf32> -> vector<9x32xf32>
    %c1_113 = arith.constant 1 : index
    %c0_114 = arith.constant 0 : index
    %c0_115 = arith.constant 0 : index
    %178 = vector.load %arg14[%c1_113, %c0_114, %c0_115] : memref<2x1x32xf32, #tpu.memory_space<vmem>>, vector<1x1x32xf32>
    %179 = vector.shape_cast %178 : vector<1x1x32xf32> to vector<1x32xf32>
    %180 = vector.broadcast %179 : vector<1x32xf32> to vector<9x32xf32>
    %181 = arith.addf %177, %180 : vector<9x32xf32>
    %182 = arith.addf %121, %181 : vector<9x32xf32>
    %c1_116 = arith.constant 1 : index
    %c0_117 = arith.constant 0 : index
    %c0_118 = arith.constant 0 : index
    %183 = vector.load %arg15[%c1_116, %c0_117, %c0_118] : memref<2x1x32xf32, #tpu.memory_space<vmem>>, vector<1x1x32xf32>
    %184 = vector.shape_cast %183 : vector<1x1x32xf32> to vector<1x32xf32>
    %c1_119 = arith.constant 1 : index
    %c0_120 = arith.constant 0 : index
    %c0_121 = arith.constant 0 : index
    %185 = vector.load %arg16[%c1_119, %c0_120, %c0_121] : memref<2x1x32xf32, #tpu.memory_space<vmem>>, vector<1x1x32xf32>
    %186 = vector.shape_cast %185 : vector<1x1x32xf32> to vector<1x32xf32>
    %cst_122 = arith.constant dense<0.000000e+00> : vector<9xf32>
    %187 = vector.multi_reduction <add>, %182, %cst_122 [1] : vector<9x32xf32> to vector<9xf32>
    %188 = vector.shape_cast %187 : vector<9xf32> to vector<9x1xf32>
    %cst_123 = arith.constant 3.200000e+01 : f32
    %189 = vector.broadcast %cst_123 : f32 to vector<9x1xf32>
    %190 = arith.divf %188, %189 : vector<9x1xf32>
    %191 = vector.broadcast %190 : vector<9x1xf32> to vector<9x32xf32>
    %192 = arith.subf %182, %191 : vector<9x32xf32>
    %193 = arith.mulf %192, %192 : vector<9x32xf32>
    %cst_124 = arith.constant dense<0.000000e+00> : vector<9xf32>
    %194 = vector.multi_reduction <add>, %193, %cst_124 [1] : vector<9x32xf32> to vector<9xf32>
    %195 = vector.shape_cast %194 : vector<9xf32> to vector<9x1xf32>
    %cst_125 = arith.constant 3.100000e+01 : f32
    %196 = vector.broadcast %cst_125 : f32 to vector<9x1xf32>
    %197 = arith.divf %195, %196 : vector<9x1xf32>
    %198 = math.sqrt %197 : vector<9x1xf32>
    %cst_126 = arith.constant 9.99999997E-7 : f32
    %199 = vector.broadcast %cst_126 : f32 to vector<9x1xf32>
    %200 = arith.addf %198, %199 : vector<9x1xf32>
    %201 = tpu.reciprocal %200 : vector<9x1xf32> -> vector<9x1xf32>
    %202 = vector.broadcast %190 : vector<9x1xf32> to vector<9x32xf32>
    %203 = arith.subf %182, %202 : vector<9x32xf32>
    %204 = vector.broadcast %184 : vector<1x32xf32> to vector<9x32xf32>
    %205 = arith.mulf %204, %203 : vector<9x32xf32>
    %206 = vector.broadcast %201 : vector<9x1xf32> to vector<9x32xf32>
    %207 = arith.mulf %205, %206 : vector<9x32xf32>
    %208 = vector.broadcast %186 : vector<1x32xf32> to vector<9x32xf32>
    %209 = arith.addf %207, %208 : vector<9x32xf32>
    %c1_127 = arith.constant 1 : index
    %c0_128 = arith.constant 0 : index
    %c0_129 = arith.constant 0 : index
    %210 = vector.load %arg17[%c1_127, %c0_128, %c0_129] : memref<2x32x128xf32, #tpu.memory_space<vmem>>, vector<1x32x128xf32>
    %211 = vector.shape_cast %210 : vector<1x32x128xf32> to vector<32x128xf32>
    %cst_130 = arith.constant dense<0.000000e+00> : vector<9x128xf32>
    %212 = tpu.matmul %209, %211, %cst_130 {dimension_numbers = #tpu.dot_dimension_numbers<[1], [0], [0], [1], [0, 0, 1, 1], [], []>} : vector<9x32xf32>, vector<32x128xf32>, vector<9x128xf32> -> vector<9x128xf32>
    %c1_131 = arith.constant 1 : index
    %c0_132 = arith.constant 0 : index
    %c0_133 = arith.constant 0 : index
    %213 = vector.load %arg18[%c1_131, %c0_132, %c0_133] : memref<2x1x128xf32, #tpu.memory_space<vmem>>, vector<1x1x128xf32>
    %214 = vector.shape_cast %213 : vector<1x1x128xf32> to vector<1x128xf32>
    %215 = vector.broadcast %214 : vector<1x128xf32> to vector<9x128xf32>
    %216 = arith.addf %212, %215 : vector<9x128xf32>
    %cst_134 = arith.constant 0.000000e+00 : f32
    %217 = vector.broadcast %cst_134 : f32 to vector<9x128xf32>
    %218 = arith.maximumf %216, %217 : vector<9x128xf32>
    %c1_135 = arith.constant 1 : index
    %c0_136 = arith.constant 0 : index
    %c0_137 = arith.constant 0 : index
    %219 = vector.load %arg19[%c1_135, %c0_136, %c0_137] : memref<2x128x32xf32, #tpu.memory_space<vmem>>, vector<1x128x32xf32>
    %220 = vector.shape_cast %219 : vector<1x128x32xf32> to vector<128x32xf32>
    %cst_138 = arith.constant dense<0.000000e+00> : vector<9x32xf32>
    %221 = tpu.matmul %218, %220, %cst_138 {dimension_numbers = #tpu.dot_dimension_numbers<[1], [0], [0], [1], [0, 0, 1, 1], [], []>} : vector<9x128xf32>, vector<128x32xf32>, vector<9x32xf32> -> vector<9x32xf32>
    %222 = arith.addf %182, %221 : vector<9x32xf32>
    %c1_139 = arith.constant 1 : index
    %c0_140 = arith.constant 0 : index
    %c0_141 = arith.constant 0 : index
    %223 = vector.load %arg20[%c1_139, %c0_140, %c0_141] : memref<2x1x32xf32, #tpu.memory_space<vmem>>, vector<1x1x32xf32>
    %224 = vector.shape_cast %223 : vector<1x1x32xf32> to vector<1x32xf32>
    %225 = vector.broadcast %224 : vector<1x32xf32> to vector<9x32xf32>
    %226 = arith.addf %222, %225 : vector<9x32xf32>
    %c0_142 = arith.constant 0 : index
    %c0_143 = arith.constant 0 : index
    %227 = vector.load %arg21[%c0_142, %c0_143] : memref<1x32xf32, #tpu.memory_space<vmem>>, vector<1x32xf32>
    %c0_144 = arith.constant 0 : index
    %c0_145 = arith.constant 0 : index
    %228 = vector.load %arg22[%c0_144, %c0_145] : memref<1x32xf32, #tpu.memory_space<vmem>>, vector<1x32xf32>
    %cst_146 = arith.constant dense<0.000000e+00> : vector<9xf32>
    %229 = vector.multi_reduction <add>, %226, %cst_146 [1] : vector<9x32xf32> to vector<9xf32>
    %230 = vector.shape_cast %229 : vector<9xf32> to vector<9x1xf32>
    %cst_147 = arith.constant 3.200000e+01 : f32
    %231 = vector.broadcast %cst_147 : f32 to vector<9x1xf32>
    %232 = arith.divf %230, %231 : vector<9x1xf32>
    %233 = vector.broadcast %232 : vector<9x1xf32> to vector<9x32xf32>
    %234 = arith.subf %226, %233 : vector<9x32xf32>
    %235 = arith.mulf %234, %234 : vector<9x32xf32>
    %cst_148 = arith.constant dense<0.000000e+00> : vector<9xf32>
    %236 = vector.multi_reduction <add>, %235, %cst_148 [1] : vector<9x32xf32> to vector<9xf32>
    %237 = vector.shape_cast %236 : vector<9xf32> to vector<9x1xf32>
    %cst_149 = arith.constant 3.100000e+01 : f32
    %238 = vector.broadcast %cst_149 : f32 to vector<9x1xf32>
    %239 = arith.divf %237, %238 : vector<9x1xf32>
    %240 = math.sqrt %239 : vector<9x1xf32>
    %cst_150 = arith.constant 9.99999997E-7 : f32
    %241 = vector.broadcast %cst_150 : f32 to vector<9x1xf32>
    %242 = arith.addf %240, %241 : vector<9x1xf32>
    %243 = tpu.reciprocal %242 : vector<9x1xf32> -> vector<9x1xf32>
    %244 = vector.broadcast %232 : vector<9x1xf32> to vector<9x32xf32>
    %245 = arith.subf %226, %244 : vector<9x32xf32>
    %246 = vector.broadcast %227 : vector<1x32xf32> to vector<9x32xf32>
    %247 = arith.mulf %246, %245 : vector<9x32xf32>
    %248 = vector.broadcast %243 : vector<9x1xf32> to vector<9x32xf32>
    %249 = arith.mulf %247, %248 : vector<9x32xf32>
    %250 = vector.broadcast %228 : vector<1x32xf32> to vector<9x32xf32>
    %251 = arith.addf %249, %250 : vector<9x32xf32>
    %252 = vector.extract_strided_slice %251 {offsets = [0, 0], sizes = [1, 32], strides = [1, 1]} : vector<9x32xf32> to vector<1x32xf32>
    %c1_151 = arith.constant 1 : index
    %c0_152 = arith.constant 0 : index
    %c0_153 = arith.constant 0 : index
    %253 = vector.load %arg0[%c1_151, %c0_152, %c0_153] : memref<2x8x2xf32, #tpu.memory_space<vmem>>, vector<1x8x2xf32>
    %254 = vector.shape_cast %253 : vector<1x8x2xf32> to vector<8x2xf32>
    %255 = vector.extract_strided_slice %254 {offsets = [0, 0], sizes = [8, 1], strides = [1, 1]} : vector<8x2xf32> to vector<8x1xf32>
    %256 = vector.extract_strided_slice %1 {offsets = [0, 0], sizes = [1, 32], strides = [1, 1]} : vector<2x32xf32> to vector<1x32xf32>
    %257 = vector.broadcast %255 : vector<8x1xf32> to vector<8x32xf32>
    %258 = vector.broadcast %256 : vector<1x32xf32> to vector<8x32xf32>
    %259 = arith.mulf %257, %258 : vector<8x32xf32>
    %260 = vector.extract_strided_slice %254 {offsets = [0, 1], sizes = [8, 1], strides = [1, 1]} : vector<8x2xf32> to vector<8x1xf32>
    %261 = vector.extract_strided_slice %1 {offsets = [1, 0], sizes = [1, 32], strides = [1, 1]} : vector<2x32xf32> to vector<1x32xf32>
    %262 = vector.broadcast %260 : vector<8x1xf32> to vector<8x32xf32>
    %263 = vector.broadcast %261 : vector<1x32xf32> to vector<8x32xf32>
    %264 = arith.mulf %262, %263 : vector<8x32xf32>
    %265 = arith.addf %259, %264 : vector<8x32xf32>
    %266 = tpu.concatenate %2, %265 in 0 : vector<1x32xf32>, vector<8x32xf32> -> vector<9x32xf32>
    %c0_154 = arith.constant 0 : index
    %c0_155 = arith.constant 0 : index
    %c0_156 = arith.constant 0 : index
    %267 = vector.load %arg5[%c0_154, %c0_155, %c0_156] : memref<2x1x32xf32, #tpu.memory_space<vmem>>, vector<1x1x32xf32>
    %268 = vector.shape_cast %267 : vector<1x1x32xf32> to vector<1x32xf32>
    %c0_157 = arith.constant 0 : index
    %c0_158 = arith.constant 0 : index
    %c0_159 = arith.constant 0 : index
    %269 = vector.load %arg6[%c0_157, %c0_158, %c0_159] : memref<2x1x32xf32, #tpu.memory_space<vmem>>, vector<1x1x32xf32>
    %270 = vector.shape_cast %269 : vector<1x1x32xf32> to vector<1x32xf32>
    %cst_160 = arith.constant dense<0.000000e+00> : vector<9xf32>
    %271 = vector.multi_reduction <add>, %266, %cst_160 [1] : vector<9x32xf32> to vector<9xf32>
    %272 = vector.shape_cast %271 : vector<9xf32> to vector<9x1xf32>
    %cst_161 = arith.constant 3.200000e+01 : f32
    %273 = vector.broadcast %cst_161 : f32 to vector<9x1xf32>
    %274 = arith.divf %272, %273 : vector<9x1xf32>
    %275 = vector.broadcast %274 : vector<9x1xf32> to vector<9x32xf32>
    %276 = arith.subf %266, %275 : vector<9x32xf32>
    %277 = arith.mulf %276, %276 : vector<9x32xf32>
    %cst_162 = arith.constant dense<0.000000e+00> : vector<9xf32>
    %278 = vector.multi_reduction <add>, %277, %cst_162 [1] : vector<9x32xf32> to vector<9xf32>
    %279 = vector.shape_cast %278 : vector<9xf32> to vector<9x1xf32>
    %cst_163 = arith.constant 3.100000e+01 : f32
    %280 = vector.broadcast %cst_163 : f32 to vector<9x1xf32>
    %281 = arith.divf %279, %280 : vector<9x1xf32>
    %282 = math.sqrt %281 : vector<9x1xf32>
    %cst_164 = arith.constant 9.99999997E-7 : f32
    %283 = vector.broadcast %cst_164 : f32 to vector<9x1xf32>
    %284 = arith.addf %282, %283 : vector<9x1xf32>
    %285 = tpu.reciprocal %284 : vector<9x1xf32> -> vector<9x1xf32>
    %286 = vector.broadcast %274 : vector<9x1xf32> to vector<9x32xf32>
    %287 = arith.subf %266, %286 : vector<9x32xf32>
    %288 = vector.broadcast %268 : vector<1x32xf32> to vector<9x32xf32>
    %289 = arith.mulf %288, %287 : vector<9x32xf32>
    %290 = vector.broadcast %285 : vector<9x1xf32> to vector<9x32xf32>
    %291 = arith.mulf %289, %290 : vector<9x32xf32>
    %292 = vector.broadcast %270 : vector<1x32xf32> to vector<9x32xf32>
    %293 = arith.addf %291, %292 : vector<9x32xf32>
    %c0_165 = arith.constant 0 : index
    %c0_166 = arith.constant 0 : index
    %c0_167 = arith.constant 0 : index
    %294 = vector.load %arg7[%c0_165, %c0_166, %c0_167] : memref<2x32x32xf32, #tpu.memory_space<vmem>>, vector<1x32x32xf32>
    %295 = vector.shape_cast %294 : vector<1x32x32xf32> to vector<32x32xf32>
    %cst_168 = arith.constant dense<0.000000e+00> : vector<9x32xf32>
    %296 = tpu.matmul %293, %295, %cst_168 {dimension_numbers = #tpu.dot_dimension_numbers<[1], [0], [0], [1], [0, 0, 1, 1], [], []>} : vector<9x32xf32>, vector<32x32xf32>, vector<9x32xf32> -> vector<9x32xf32>
    %c0_169 = arith.constant 0 : index
    %c0_170 = arith.constant 0 : index
    %c0_171 = arith.constant 0 : index
    %297 = vector.load %arg8[%c0_169, %c0_170, %c0_171] : memref<2x1x32xf32, #tpu.memory_space<vmem>>, vector<1x1x32xf32>
    %298 = vector.shape_cast %297 : vector<1x1x32xf32> to vector<1x32xf32>
    %299 = vector.broadcast %298 : vector<1x32xf32> to vector<9x32xf32>
    %300 = arith.addf %296, %299 : vector<9x32xf32>
    %c0_172 = arith.constant 0 : index
    %c0_173 = arith.constant 0 : index
    %c0_174 = arith.constant 0 : index
    %301 = vector.load %arg9[%c0_172, %c0_173, %c0_174] : memref<2x32x32xf32, #tpu.memory_space<vmem>>, vector<1x32x32xf32>
    %302 = vector.shape_cast %301 : vector<1x32x32xf32> to vector<32x32xf32>
    %cst_175 = arith.constant dense<0.000000e+00> : vector<9x32xf32>
    %303 = tpu.matmul %293, %302, %cst_175 {dimension_numbers = #tpu.dot_dimension_numbers<[1], [0], [0], [1], [0, 0, 1, 1], [], []>} : vector<9x32xf32>, vector<32x32xf32>, vector<9x32xf32> -> vector<9x32xf32>
    %c0_176 = arith.constant 0 : index
    %c0_177 = arith.constant 0 : index
    %c0_178 = arith.constant 0 : index
    %304 = vector.load %arg10[%c0_176, %c0_177, %c0_178] : memref<2x1x32xf32, #tpu.memory_space<vmem>>, vector<1x1x32xf32>
    %305 = vector.shape_cast %304 : vector<1x1x32xf32> to vector<1x32xf32>
    %306 = vector.broadcast %305 : vector<1x32xf32> to vector<9x32xf32>
    %307 = arith.addf %303, %306 : vector<9x32xf32>
    %c0_179 = arith.constant 0 : index
    %c0_180 = arith.constant 0 : index
    %c0_181 = arith.constant 0 : index
    %308 = vector.load %arg11[%c0_179, %c0_180, %c0_181] : memref<2x32x32xf32, #tpu.memory_space<vmem>>, vector<1x32x32xf32>
    %309 = vector.shape_cast %308 : vector<1x32x32xf32> to vector<32x32xf32>
    %cst_182 = arith.constant dense<0.000000e+00> : vector<9x32xf32>
    %310 = tpu.matmul %293, %309, %cst_182 {dimension_numbers = #tpu.dot_dimension_numbers<[1], [0], [0], [1], [0, 0, 1, 1], [], []>} : vector<9x32xf32>, vector<32x32xf32>, vector<9x32xf32> -> vector<9x32xf32>
    %c0_183 = arith.constant 0 : index
    %c0_184 = arith.constant 0 : index
    %c0_185 = arith.constant 0 : index
    %311 = vector.load %arg12[%c0_183, %c0_184, %c0_185] : memref<2x1x32xf32, #tpu.memory_space<vmem>>, vector<1x1x32xf32>
    %312 = vector.shape_cast %311 : vector<1x1x32xf32> to vector<1x32xf32>
    %313 = vector.broadcast %312 : vector<1x32xf32> to vector<9x32xf32>
    %314 = arith.addf %310, %313 : vector<9x32xf32>
    %cst_186 = arith.constant dense<0.000000e+00> : vector<32x32xf32>
    %315 = tpu.matmul %307, %314, %cst_186 {dimension_numbers = #tpu.dot_dimension_numbers<[0], [0], [1], [1], [0, 1, 1, 1], [], []>} : vector<9x32xf32>, vector<9x32xf32>, vector<32x32xf32> -> vector<32x32xf32>
    %316 = arith.mulf %315, %0 : vector<32x32xf32>
    %cst_187 = arith.constant dense<0.000000e+00> : vector<9x32xf32>
    %317 = tpu.matmul %300, %316, %cst_187 {dimension_numbers = #tpu.dot_dimension_numbers<[1], [0], [0], [1], [0, 0, 1, 1], [], []>} : vector<9x32xf32>, vector<32x32xf32>, vector<9x32xf32> -> vector<9x32xf32>
    %cst_188 = arith.constant 0.353553385 : f32
    %318 = vector.broadcast %cst_188 : f32 to vector<9x32xf32>
    %319 = arith.mulf %317, %318 : vector<9x32xf32>
    %c0_189 = arith.constant 0 : index
    %c0_190 = arith.constant 0 : index
    %c0_191 = arith.constant 0 : index
    %320 = vector.load %arg13[%c0_189, %c0_190, %c0_191] : memref<2x32x32xf32, #tpu.memory_space<vmem>>, vector<1x32x32xf32>
    %321 = vector.shape_cast %320 : vector<1x32x32xf32> to vector<32x32xf32>
    %cst_192 = arith.constant dense<0.000000e+00> : vector<9x32xf32>
    %322 = tpu.matmul %319, %321, %cst_192 {dimension_numbers = #tpu.dot_dimension_numbers<[1], [0], [0], [1], [0, 0, 1, 1], [], []>} : vector<9x32xf32>, vector<32x32xf32>, vector<9x32xf32> -> vector<9x32xf32>
    %c0_193 = arith.constant 0 : index
    %c0_194 = arith.constant 0 : index
    %c0_195 = arith.constant 0 : index
    %323 = vector.load %arg14[%c0_193, %c0_194, %c0_195] : memref<2x1x32xf32, #tpu.memory_space<vmem>>, vector<1x1x32xf32>
    %324 = vector.shape_cast %323 : vector<1x1x32xf32> to vector<1x32xf32>
    %325 = vector.broadcast %324 : vector<1x32xf32> to vector<9x32xf32>
    %326 = arith.addf %322, %325 : vector<9x32xf32>
    %327 = arith.addf %266, %326 : vector<9x32xf32>
    %c0_196 = arith.constant 0 : index
    %c0_197 = arith.constant 0 : index
    %c0_198 = arith.constant 0 : index
    %328 = vector.load %arg15[%c0_196, %c0_197, %c0_198] : memref<2x1x32xf32, #tpu.memory_space<vmem>>, vector<1x1x32xf32>
    %329 = vector.shape_cast %328 : vector<1x1x32xf32> to vector<1x32xf32>
    %c0_199 = arith.constant 0 : index
    %c0_200 = arith.constant 0 : index
    %c0_201 = arith.constant 0 : index
    %330 = vector.load %arg16[%c0_199, %c0_200, %c0_201] : memref<2x1x32xf32, #tpu.memory_space<vmem>>, vector<1x1x32xf32>
    %331 = vector.shape_cast %330 : vector<1x1x32xf32> to vector<1x32xf32>
    %cst_202 = arith.constant dense<0.000000e+00> : vector<9xf32>
    %332 = vector.multi_reduction <add>, %327, %cst_202 [1] : vector<9x32xf32> to vector<9xf32>
    %333 = vector.shape_cast %332 : vector<9xf32> to vector<9x1xf32>
    %cst_203 = arith.constant 3.200000e+01 : f32
    %334 = vector.broadcast %cst_203 : f32 to vector<9x1xf32>
    %335 = arith.divf %333, %334 : vector<9x1xf32>
    %336 = vector.broadcast %335 : vector<9x1xf32> to vector<9x32xf32>
    %337 = arith.subf %327, %336 : vector<9x32xf32>
    %338 = arith.mulf %337, %337 : vector<9x32xf32>
    %cst_204 = arith.constant dense<0.000000e+00> : vector<9xf32>
    %339 = vector.multi_reduction <add>, %338, %cst_204 [1] : vector<9x32xf32> to vector<9xf32>
    %340 = vector.shape_cast %339 : vector<9xf32> to vector<9x1xf32>
    %cst_205 = arith.constant 3.100000e+01 : f32
    %341 = vector.broadcast %cst_205 : f32 to vector<9x1xf32>
    %342 = arith.divf %340, %341 : vector<9x1xf32>
    %343 = math.sqrt %342 : vector<9x1xf32>
    %cst_206 = arith.constant 9.99999997E-7 : f32
    %344 = vector.broadcast %cst_206 : f32 to vector<9x1xf32>
    %345 = arith.addf %343, %344 : vector<9x1xf32>
    %346 = tpu.reciprocal %345 : vector<9x1xf32> -> vector<9x1xf32>
    %347 = vector.broadcast %335 : vector<9x1xf32> to vector<9x32xf32>
    %348 = arith.subf %327, %347 : vector<9x32xf32>
    %349 = vector.broadcast %329 : vector<1x32xf32> to vector<9x32xf32>
    %350 = arith.mulf %349, %348 : vector<9x32xf32>
    %351 = vector.broadcast %346 : vector<9x1xf32> to vector<9x32xf32>
    %352 = arith.mulf %350, %351 : vector<9x32xf32>
    %353 = vector.broadcast %331 : vector<1x32xf32> to vector<9x32xf32>
    %354 = arith.addf %352, %353 : vector<9x32xf32>
    %c0_207 = arith.constant 0 : index
    %c0_208 = arith.constant 0 : index
    %c0_209 = arith.constant 0 : index
    %355 = vector.load %arg17[%c0_207, %c0_208, %c0_209] : memref<2x32x128xf32, #tpu.memory_space<vmem>>, vector<1x32x128xf32>
    %356 = vector.shape_cast %355 : vector<1x32x128xf32> to vector<32x128xf32>
    %cst_210 = arith.constant dense<0.000000e+00> : vector<9x128xf32>
    %357 = tpu.matmul %354, %356, %cst_210 {dimension_numbers = #tpu.dot_dimension_numbers<[1], [0], [0], [1], [0, 0, 1, 1], [], []>} : vector<9x32xf32>, vector<32x128xf32>, vector<9x128xf32> -> vector<9x128xf32>
    %c0_211 = arith.constant 0 : index
    %c0_212 = arith.constant 0 : index
    %c0_213 = arith.constant 0 : index
    %358 = vector.load %arg18[%c0_211, %c0_212, %c0_213] : memref<2x1x128xf32, #tpu.memory_space<vmem>>, vector<1x1x128xf32>
    %359 = vector.shape_cast %358 : vector<1x1x128xf32> to vector<1x128xf32>
    %360 = vector.broadcast %359 : vector<1x128xf32> to vector<9x128xf32>
    %361 = arith.addf %357, %360 : vector<9x128xf32>
    %cst_214 = arith.constant 0.000000e+00 : f32
    %362 = vector.broadcast %cst_214 : f32 to vector<9x128xf32>
    %363 = arith.maximumf %361, %362 : vector<9x128xf32>
    %c0_215 = arith.constant 0 : index
    %c0_216 = arith.constant 0 : index
    %c0_217 = arith.constant 0 : index
    %364 = vector.load %arg19[%c0_215, %c0_216, %c0_217] : memref<2x128x32xf32, #tpu.memory_space<vmem>>, vector<1x128x32xf32>
    %365 = vector.shape_cast %364 : vector<1x128x32xf32> to vector<128x32xf32>
    %cst_218 = arith.constant dense<0.000000e+00> : vector<9x32xf32>
    %366 = tpu.matmul %363, %365, %cst_218 {dimension_numbers = #tpu.dot_dimension_numbers<[1], [0], [0], [1], [0, 0, 1, 1], [], []>} : vector<9x128xf32>, vector<128x32xf32>, vector<9x32xf32> -> vector<9x32xf32>
    %367 = arith.addf %327, %366 : vector<9x32xf32>
    %c0_219 = arith.constant 0 : index
    %c0_220 = arith.constant 0 : index
    %c0_221 = arith.constant 0 : index
    %368 = vector.load %arg20[%c0_219, %c0_220, %c0_221] : memref<2x1x32xf32, #tpu.memory_space<vmem>>, vector<1x1x32xf32>
    %369 = vector.shape_cast %368 : vector<1x1x32xf32> to vector<1x32xf32>
    %370 = vector.broadcast %369 : vector<1x32xf32> to vector<9x32xf32>
    %371 = arith.addf %367, %370 : vector<9x32xf32>
    %c1_222 = arith.constant 1 : index
    %c0_223 = arith.constant 0 : index
    %c0_224 = arith.constant 0 : index
    %372 = vector.load %arg5[%c1_222, %c0_223, %c0_224] : memref<2x1x32xf32, #tpu.memory_space<vmem>>, vector<1x1x32xf32>
    %373 = vector.shape_cast %372 : vector<1x1x32xf32> to vector<1x32xf32>
    %c1_225 = arith.constant 1 : index
    %c0_226 = arith.constant 0 : index
    %c0_227 = arith.constant 0 : index
    %374 = vector.load %arg6[%c1_225, %c0_226, %c0_227] : memref<2x1x32xf32, #tpu.memory_space<vmem>>, vector<1x1x32xf32>
    %375 = vector.shape_cast %374 : vector<1x1x32xf32> to vector<1x32xf32>
    %cst_228 = arith.constant dense<0.000000e+00> : vector<9xf32>
    %376 = vector.multi_reduction <add>, %371, %cst_228 [1] : vector<9x32xf32> to vector<9xf32>
    %377 = vector.shape_cast %376 : vector<9xf32> to vector<9x1xf32>
    %cst_229 = arith.constant 3.200000e+01 : f32
    %378 = vector.broadcast %cst_229 : f32 to vector<9x1xf32>
    %379 = arith.divf %377, %378 : vector<9x1xf32>
    %380 = vector.broadcast %379 : vector<9x1xf32> to vector<9x32xf32>
    %381 = arith.subf %371, %380 : vector<9x32xf32>
    %382 = arith.mulf %381, %381 : vector<9x32xf32>
    %cst_230 = arith.constant dense<0.000000e+00> : vector<9xf32>
    %383 = vector.multi_reduction <add>, %382, %cst_230 [1] : vector<9x32xf32> to vector<9xf32>
    %384 = vector.shape_cast %383 : vector<9xf32> to vector<9x1xf32>
    %cst_231 = arith.constant 3.100000e+01 : f32
    %385 = vector.broadcast %cst_231 : f32 to vector<9x1xf32>
    %386 = arith.divf %384, %385 : vector<9x1xf32>
    %387 = math.sqrt %386 : vector<9x1xf32>
    %cst_232 = arith.constant 9.99999997E-7 : f32
    %388 = vector.broadcast %cst_232 : f32 to vector<9x1xf32>
    %389 = arith.addf %387, %388 : vector<9x1xf32>
    %390 = tpu.reciprocal %389 : vector<9x1xf32> -> vector<9x1xf32>
    %391 = vector.broadcast %379 : vector<9x1xf32> to vector<9x32xf32>
    %392 = arith.subf %371, %391 : vector<9x32xf32>
    %393 = vector.broadcast %373 : vector<1x32xf32> to vector<9x32xf32>
    %394 = arith.mulf %393, %392 : vector<9x32xf32>
    %395 = vector.broadcast %390 : vector<9x1xf32> to vector<9x32xf32>
    %396 = arith.mulf %394, %395 : vector<9x32xf32>
    %397 = vector.broadcast %375 : vector<1x32xf32> to vector<9x32xf32>
    %398 = arith.addf %396, %397 : vector<9x32xf32>
    %c1_233 = arith.constant 1 : index
    %c0_234 = arith.constant 0 : index
    %c0_235 = arith.constant 0 : index
    %399 = vector.load %arg7[%c1_233, %c0_234, %c0_235] : memref<2x32x32xf32, #tpu.memory_space<vmem>>, vector<1x32x32xf32>
    %400 = vector.shape_cast %399 : vector<1x32x32xf32> to vector<32x32xf32>
    %cst_236 = arith.constant dense<0.000000e+00> : vector<9x32xf32>
    %401 = tpu.matmul %398, %400, %cst_236 {dimension_numbers = #tpu.dot_dimension_numbers<[1], [0], [0], [1], [0, 0, 1, 1], [], []>} : vector<9x32xf32>, vector<32x32xf32>, vector<9x32xf32> -> vector<9x32xf32>
    %c1_237 = arith.constant 1 : index
    %c0_238 = arith.constant 0 : index
    %c0_239 = arith.constant 0 : index
    %402 = vector.load %arg8[%c1_237, %c0_238, %c0_239] : memref<2x1x32xf32, #tpu.memory_space<vmem>>, vector<1x1x32xf32>
    %403 = vector.shape_cast %402 : vector<1x1x32xf32> to vector<1x32xf32>
    %404 = vector.broadcast %403 : vector<1x32xf32> to vector<9x32xf32>
    %405 = arith.addf %401, %404 : vector<9x32xf32>
    %c1_240 = arith.constant 1 : index
    %c0_241 = arith.constant 0 : index
    %c0_242 = arith.constant 0 : index
    %406 = vector.load %arg9[%c1_240, %c0_241, %c0_242] : memref<2x32x32xf32, #tpu.memory_space<vmem>>, vector<1x32x32xf32>
    %407 = vector.shape_cast %406 : vector<1x32x32xf32> to vector<32x32xf32>
    %cst_243 = arith.constant dense<0.000000e+00> : vector<9x32xf32>
    %408 = tpu.matmul %398, %407, %cst_243 {dimension_numbers = #tpu.dot_dimension_numbers<[1], [0], [0], [1], [0, 0, 1, 1], [], []>} : vector<9x32xf32>, vector<32x32xf32>, vector<9x32xf32> -> vector<9x32xf32>
    %c1_244 = arith.constant 1 : index
    %c0_245 = arith.constant 0 : index
    %c0_246 = arith.constant 0 : index
    %409 = vector.load %arg10[%c1_244, %c0_245, %c0_246] : memref<2x1x32xf32, #tpu.memory_space<vmem>>, vector<1x1x32xf32>
    %410 = vector.shape_cast %409 : vector<1x1x32xf32> to vector<1x32xf32>
    %411 = vector.broadcast %410 : vector<1x32xf32> to vector<9x32xf32>
    %412 = arith.addf %408, %411 : vector<9x32xf32>
    %c1_247 = arith.constant 1 : index
    %c0_248 = arith.constant 0 : index
    %c0_249 = arith.constant 0 : index
    %413 = vector.load %arg11[%c1_247, %c0_248, %c0_249] : memref<2x32x32xf32, #tpu.memory_space<vmem>>, vector<1x32x32xf32>
    %414 = vector.shape_cast %413 : vector<1x32x32xf32> to vector<32x32xf32>
    %cst_250 = arith.constant dense<0.000000e+00> : vector<9x32xf32>
    %415 = tpu.matmul %398, %414, %cst_250 {dimension_numbers = #tpu.dot_dimension_numbers<[1], [0], [0], [1], [0, 0, 1, 1], [], []>} : vector<9x32xf32>, vector<32x32xf32>, vector<9x32xf32> -> vector<9x32xf32>
    %c1_251 = arith.constant 1 : index
    %c0_252 = arith.constant 0 : index
    %c0_253 = arith.constant 0 : index
    %416 = vector.load %arg12[%c1_251, %c0_252, %c0_253] : memref<2x1x32xf32, #tpu.memory_space<vmem>>, vector<1x1x32xf32>
    %417 = vector.shape_cast %416 : vector<1x1x32xf32> to vector<1x32xf32>
    %418 = vector.broadcast %417 : vector<1x32xf32> to vector<9x32xf32>
    %419 = arith.addf %415, %418 : vector<9x32xf32>
    %cst_254 = arith.constant dense<0.000000e+00> : vector<32x32xf32>
    %420 = tpu.matmul %412, %419, %cst_254 {dimension_numbers = #tpu.dot_dimension_numbers<[0], [0], [1], [1], [0, 1, 1, 1], [], []>} : vector<9x32xf32>, vector<9x32xf32>, vector<32x32xf32> -> vector<32x32xf32>
    %421 = arith.mulf %420, %0 : vector<32x32xf32>
    %cst_255 = arith.constant dense<0.000000e+00> : vector<9x32xf32>
    %422 = tpu.matmul %405, %421, %cst_255 {dimension_numbers = #tpu.dot_dimension_numbers<[1], [0], [0], [1], [0, 0, 1, 1], [], []>} : vector<9x32xf32>, vector<32x32xf32>, vector<9x32xf32> -> vector<9x32xf32>
    %cst_256 = arith.constant 0.353553385 : f32
    %423 = vector.broadcast %cst_256 : f32 to vector<9x32xf32>
    %424 = arith.mulf %422, %423 : vector<9x32xf32>
    %c1_257 = arith.constant 1 : index
    %c0_258 = arith.constant 0 : index
    %c0_259 = arith.constant 0 : index
    %425 = vector.load %arg13[%c1_257, %c0_258, %c0_259] : memref<2x32x32xf32, #tpu.memory_space<vmem>>, vector<1x32x32xf32>
    %426 = vector.shape_cast %425 : vector<1x32x32xf32> to vector<32x32xf32>
    %cst_260 = arith.constant dense<0.000000e+00> : vector<9x32xf32>
    %427 = tpu.matmul %424, %426, %cst_260 {dimension_numbers = #tpu.dot_dimension_numbers<[1], [0], [0], [1], [0, 0, 1, 1], [], []>} : vector<9x32xf32>, vector<32x32xf32>, vector<9x32xf32> -> vector<9x32xf32>
    %c1_261 = arith.constant 1 : index
    %c0_262 = arith.constant 0 : index
    %c0_263 = arith.constant 0 : index
    %428 = vector.load %arg14[%c1_261, %c0_262, %c0_263] : memref<2x1x32xf32, #tpu.memory_space<vmem>>, vector<1x1x32xf32>
    %429 = vector.shape_cast %428 : vector<1x1x32xf32> to vector<1x32xf32>
    %430 = vector.broadcast %429 : vector<1x32xf32> to vector<9x32xf32>
    %431 = arith.addf %427, %430 : vector<9x32xf32>
    %432 = arith.addf %371, %431 : vector<9x32xf32>
    %c1_264 = arith.constant 1 : index
    %c0_265 = arith.constant 0 : index
    %c0_266 = arith.constant 0 : index
    %433 = vector.load %arg15[%c1_264, %c0_265, %c0_266] : memref<2x1x32xf32, #tpu.memory_space<vmem>>, vector<1x1x32xf32>
    %434 = vector.shape_cast %433 : vector<1x1x32xf32> to vector<1x32xf32>
    %c1_267 = arith.constant 1 : index
    %c0_268 = arith.constant 0 : index
    %c0_269 = arith.constant 0 : index
    %435 = vector.load %arg16[%c1_267, %c0_268, %c0_269] : memref<2x1x32xf32, #tpu.memory_space<vmem>>, vector<1x1x32xf32>
    %436 = vector.shape_cast %435 : vector<1x1x32xf32> to vector<1x32xf32>
    %cst_270 = arith.constant dense<0.000000e+00> : vector<9xf32>
    %437 = vector.multi_reduction <add>, %432, %cst_270 [1] : vector<9x32xf32> to vector<9xf32>
    %438 = vector.shape_cast %437 : vector<9xf32> to vector<9x1xf32>
    %cst_271 = arith.constant 3.200000e+01 : f32
    %439 = vector.broadcast %cst_271 : f32 to vector<9x1xf32>
    %440 = arith.divf %438, %439 : vector<9x1xf32>
    %441 = vector.broadcast %440 : vector<9x1xf32> to vector<9x32xf32>
    %442 = arith.subf %432, %441 : vector<9x32xf32>
    %443 = arith.mulf %442, %442 : vector<9x32xf32>
    %cst_272 = arith.constant dense<0.000000e+00> : vector<9xf32>
    %444 = vector.multi_reduction <add>, %443, %cst_272 [1] : vector<9x32xf32> to vector<9xf32>
    %445 = vector.shape_cast %444 : vector<9xf32> to vector<9x1xf32>
    %cst_273 = arith.constant 3.100000e+01 : f32
    %446 = vector.broadcast %cst_273 : f32 to vector<9x1xf32>
    %447 = arith.divf %445, %446 : vector<9x1xf32>
    %448 = math.sqrt %447 : vector<9x1xf32>
    %cst_274 = arith.constant 9.99999997E-7 : f32
    %449 = vector.broadcast %cst_274 : f32 to vector<9x1xf32>
    %450 = arith.addf %448, %449 : vector<9x1xf32>
    %451 = tpu.reciprocal %450 : vector<9x1xf32> -> vector<9x1xf32>
    %452 = vector.broadcast %440 : vector<9x1xf32> to vector<9x32xf32>
    %453 = arith.subf %432, %452 : vector<9x32xf32>
    %454 = vector.broadcast %434 : vector<1x32xf32> to vector<9x32xf32>
    %455 = arith.mulf %454, %453 : vector<9x32xf32>
    %456 = vector.broadcast %451 : vector<9x1xf32> to vector<9x32xf32>
    %457 = arith.mulf %455, %456 : vector<9x32xf32>
    %458 = vector.broadcast %436 : vector<1x32xf32> to vector<9x32xf32>
    %459 = arith.addf %457, %458 : vector<9x32xf32>
    %c1_275 = arith.constant 1 : index
    %c0_276 = arith.constant 0 : index
    %c0_277 = arith.constant 0 : index
    %460 = vector.load %arg17[%c1_275, %c0_276, %c0_277] : memref<2x32x128xf32, #tpu.memory_space<vmem>>, vector<1x32x128xf32>
    %461 = vector.shape_cast %460 : vector<1x32x128xf32> to vector<32x128xf32>
    %cst_278 = arith.constant dense<0.000000e+00> : vector<9x128xf32>
    %462 = tpu.matmul %459, %461, %cst_278 {dimension_numbers = #tpu.dot_dimension_numbers<[1], [0], [0], [1], [0, 0, 1, 1], [], []>} : vector<9x32xf32>, vector<32x128xf32>, vector<9x128xf32> -> vector<9x128xf32>
    %c1_279 = arith.constant 1 : index
    %c0_280 = arith.constant 0 : index
    %c0_281 = arith.constant 0 : index
    %463 = vector.load %arg18[%c1_279, %c0_280, %c0_281] : memref<2x1x128xf32, #tpu.memory_space<vmem>>, vector<1x1x128xf32>
    %464 = vector.shape_cast %463 : vector<1x1x128xf32> to vector<1x128xf32>
    %465 = vector.broadcast %464 : vector<1x128xf32> to vector<9x128xf32>
    %466 = arith.addf %462, %465 : vector<9x128xf32>
    %cst_282 = arith.constant 0.000000e+00 : f32
    %467 = vector.broadcast %cst_282 : f32 to vector<9x128xf32>
    %468 = arith.maximumf %466, %467 : vector<9x128xf32>
    %c1_283 = arith.constant 1 : index
    %c0_284 = arith.constant 0 : index
    %c0_285 = arith.constant 0 : index
    %469 = vector.load %arg19[%c1_283, %c0_284, %c0_285] : memref<2x128x32xf32, #tpu.memory_space<vmem>>, vector<1x128x32xf32>
    %470 = vector.shape_cast %469 : vector<1x128x32xf32> to vector<128x32xf32>
    %cst_286 = arith.constant dense<0.000000e+00> : vector<9x32xf32>
    %471 = tpu.matmul %468, %470, %cst_286 {dimension_numbers = #tpu.dot_dimension_numbers<[1], [0], [0], [1], [0, 0, 1, 1], [], []>} : vector<9x128xf32>, vector<128x32xf32>, vector<9x32xf32> -> vector<9x32xf32>
    %472 = arith.addf %432, %471 : vector<9x32xf32>
    %c1_287 = arith.constant 1 : index
    %c0_288 = arith.constant 0 : index
    %c0_289 = arith.constant 0 : index
    %473 = vector.load %arg20[%c1_287, %c0_288, %c0_289] : memref<2x1x32xf32, #tpu.memory_space<vmem>>, vector<1x1x32xf32>
    %474 = vector.shape_cast %473 : vector<1x1x32xf32> to vector<1x32xf32>
    %475 = vector.broadcast %474 : vector<1x32xf32> to vector<9x32xf32>
    %476 = arith.addf %472, %475 : vector<9x32xf32>
    %c0_290 = arith.constant 0 : index
    %c0_291 = arith.constant 0 : index
    %477 = vector.load %arg21[%c0_290, %c0_291] : memref<1x32xf32, #tpu.memory_space<vmem>>, vector<1x32xf32>
    %c0_292 = arith.constant 0 : index
    %c0_293 = arith.constant 0 : index
    %478 = vector.load %arg22[%c0_292, %c0_293] : memref<1x32xf32, #tpu.memory_space<vmem>>, vector<1x32xf32>
    %cst_294 = arith.constant dense<0.000000e+00> : vector<9xf32>
    %479 = vector.multi_reduction <add>, %476, %cst_294 [1] : vector<9x32xf32> to vector<9xf32>
    %480 = vector.shape_cast %479 : vector<9xf32> to vector<9x1xf32>
    %cst_295 = arith.constant 3.200000e+01 : f32
    %481 = vector.broadcast %cst_295 : f32 to vector<9x1xf32>
    %482 = arith.divf %480, %481 : vector<9x1xf32>
    %483 = vector.broadcast %482 : vector<9x1xf32> to vector<9x32xf32>
    %484 = arith.subf %476, %483 : vector<9x32xf32>
    %485 = arith.mulf %484, %484 : vector<9x32xf32>
    %cst_296 = arith.constant dense<0.000000e+00> : vector<9xf32>
    %486 = vector.multi_reduction <add>, %485, %cst_296 [1] : vector<9x32xf32> to vector<9xf32>
    %487 = vector.shape_cast %486 : vector<9xf32> to vector<9x1xf32>
    %cst_297 = arith.constant 3.100000e+01 : f32
    %488 = vector.broadcast %cst_297 : f32 to vector<9x1xf32>
    %489 = arith.divf %487, %488 : vector<9x1xf32>
    %490 = math.sqrt %489 : vector<9x1xf32>
    %cst_298 = arith.constant 9.99999997E-7 : f32
    %491 = vector.broadcast %cst_298 : f32 to vector<9x1xf32>
    %492 = arith.addf %490, %491 : vector<9x1xf32>
    %493 = tpu.reciprocal %492 : vector<9x1xf32> -> vector<9x1xf32>
    %494 = vector.broadcast %482 : vector<9x1xf32> to vector<9x32xf32>
    %495 = arith.subf %476, %494 : vector<9x32xf32>
    %496 = vector.broadcast %477 : vector<1x32xf32> to vector<9x32xf32>
    %497 = arith.mulf %496, %495 : vector<9x32xf32>
    %498 = vector.broadcast %493 : vector<9x1xf32> to vector<9x32xf32>
    %499 = arith.mulf %497, %498 : vector<9x32xf32>
    %500 = vector.broadcast %478 : vector<1x32xf32> to vector<9x32xf32>
    %501 = arith.addf %499, %500 : vector<9x32xf32>
    %502 = vector.extract_strided_slice %501 {offsets = [0, 0], sizes = [1, 32], strides = [1, 1]} : vector<9x32xf32> to vector<1x32xf32>
    %503 = tpu.concatenate %252, %502 in 0 : vector<1x32xf32>, vector<1x32xf32> -> vector<2x32xf32>
    %c0_299 = arith.constant 0 : index
    %c0_300 = arith.constant 0 : index
    %504 = vector.load %arg23[%c0_299, %c0_300] : memref<32x64xf32, #tpu.memory_space<vmem>>, vector<32x64xf32>
    %cst_301 = arith.constant dense<0.000000e+00> : vector<2x64xf32>
    %505 = tpu.matmul %503, %504, %cst_301 {dimension_numbers = #tpu.dot_dimension_numbers<[1], [0], [0], [1], [0, 0, 1, 1], [], []>} : vector<2x32xf32>, vector<32x64xf32>, vector<2x64xf32> -> vector<2x64xf32>
    %c0_302 = arith.constant 0 : index
    %c0_303 = arith.constant 0 : index
    %506 = vector.load %arg24[%c0_302, %c0_303] : memref<1x64xf32, #tpu.memory_space<vmem>>, vector<1x64xf32>
    %507 = vector.broadcast %506 : vector<1x64xf32> to vector<2x64xf32>
    %508 = arith.addf %505, %507 : vector<2x64xf32>
    %c0_304 = arith.constant 0 : index
    %c0_305 = arith.constant 0 : index
    %509 = vector.load %arg25[%c0_304, %c0_305] : memref<1x64xf32, #tpu.memory_space<vmem>>, vector<1x64xf32>
    %c0_306 = arith.constant 0 : index
    %c0_307 = arith.constant 0 : index
    %510 = vector.load %arg26[%c0_306, %c0_307] : memref<1x64xf32, #tpu.memory_space<vmem>>, vector<1x64xf32>
    %cst_308 = arith.constant dense<0.000000e+00> : vector<64xf32>
    %511 = vector.multi_reduction <add>, %508, %cst_308 [0] : vector<2x64xf32> to vector<64xf32>
    %512 = vector.shape_cast %511 : vector<64xf32> to vector<1x64xf32>
    %cst_309 = arith.constant 2.000000e+00 : f32
    %513 = vector.broadcast %cst_309 : f32 to vector<1x64xf32>
    %514 = arith.divf %512, %513 : vector<1x64xf32>
    %515 = vector.broadcast %514 : vector<1x64xf32> to vector<2x64xf32>
    %516 = arith.subf %508, %515 : vector<2x64xf32>
    %517 = arith.mulf %516, %516 : vector<2x64xf32>
    %cst_310 = arith.constant dense<0.000000e+00> : vector<64xf32>
    %518 = vector.multi_reduction <add>, %517, %cst_310 [0] : vector<2x64xf32> to vector<64xf32>
    %519 = vector.shape_cast %518 : vector<64xf32> to vector<1x64xf32>
    %cst_311 = arith.constant 2.000000e+00 : f32
    %520 = vector.broadcast %cst_311 : f32 to vector<1x64xf32>
    %521 = arith.divf %519, %520 : vector<1x64xf32>
    %522 = vector.broadcast %514 : vector<1x64xf32> to vector<2x64xf32>
    %523 = arith.subf %508, %522 : vector<2x64xf32>
    %524 = vector.broadcast %509 : vector<1x64xf32> to vector<2x64xf32>
    %525 = arith.mulf %524, %523 : vector<2x64xf32>
    %cst_312 = arith.constant 9.99999974E-6 : f32
    %526 = vector.broadcast %cst_312 : f32 to vector<1x64xf32>
    %527 = arith.addf %521, %526 : vector<1x64xf32>
    %528 = math.rsqrt %527 : vector<1x64xf32>
    %529 = vector.broadcast %528 : vector<1x64xf32> to vector<2x64xf32>
    %530 = arith.mulf %525, %529 : vector<2x64xf32>
    %531 = vector.broadcast %510 : vector<1x64xf32> to vector<2x64xf32>
    %532 = arith.addf %530, %531 : vector<2x64xf32>
    %cst_313 = arith.constant 0.000000e+00 : f32
    %533 = vector.broadcast %cst_313 : f32 to vector<2x64xf32>
    %534 = arith.cmpf oge, %532, %533 : vector<2x64xf32>
    %cst_314 = arith.constant 0.00999999977 : f32
    %535 = vector.broadcast %cst_314 : f32 to vector<2x64xf32>
    %536 = arith.mulf %535, %532 : vector<2x64xf32>
    %537 = arith.select %534, %532, %536 : vector<2x64xi1>, vector<2x64xf32>
    %c0_315 = arith.constant 0 : index
    %c0_316 = arith.constant 0 : index
    %538 = vector.load %arg27[%c0_315, %c0_316] : memref<64x64xf32, #tpu.memory_space<vmem>>, vector<64x64xf32>
    %cst_317 = arith.constant dense<0.000000e+00> : vector<2x64xf32>
    %539 = tpu.matmul %537, %538, %cst_317 {dimension_numbers = #tpu.dot_dimension_numbers<[1], [0], [0], [1], [0, 0, 1, 1], [], []>} : vector<2x64xf32>, vector<64x64xf32>, vector<2x64xf32> -> vector<2x64xf32>
    %c0_318 = arith.constant 0 : index
    %c0_319 = arith.constant 0 : index
    %540 = vector.load %arg28[%c0_318, %c0_319] : memref<1x64xf32, #tpu.memory_space<vmem>>, vector<1x64xf32>
    %541 = vector.broadcast %540 : vector<1x64xf32> to vector<2x64xf32>
    %542 = arith.addf %539, %541 : vector<2x64xf32>
    %c0_320 = arith.constant 0 : index
    %c0_321 = arith.constant 0 : index
    %543 = vector.load %arg29[%c0_320, %c0_321] : memref<1x64xf32, #tpu.memory_space<vmem>>, vector<1x64xf32>
    %c0_322 = arith.constant 0 : index
    %c0_323 = arith.constant 0 : index
    %544 = vector.load %arg30[%c0_322, %c0_323] : memref<1x64xf32, #tpu.memory_space<vmem>>, vector<1x64xf32>
    %cst_324 = arith.constant dense<0.000000e+00> : vector<64xf32>
    %545 = vector.multi_reduction <add>, %542, %cst_324 [0] : vector<2x64xf32> to vector<64xf32>
    %546 = vector.shape_cast %545 : vector<64xf32> to vector<1x64xf32>
    %cst_325 = arith.constant 2.000000e+00 : f32
    %547 = vector.broadcast %cst_325 : f32 to vector<1x64xf32>
    %548 = arith.divf %546, %547 : vector<1x64xf32>
    %549 = vector.broadcast %548 : vector<1x64xf32> to vector<2x64xf32>
    %550 = arith.subf %542, %549 : vector<2x64xf32>
    %551 = arith.mulf %550, %550 : vector<2x64xf32>
    %cst_326 = arith.constant dense<0.000000e+00> : vector<64xf32>
    %552 = vector.multi_reduction <add>, %551, %cst_326 [0] : vector<2x64xf32> to vector<64xf32>
    %553 = vector.shape_cast %552 : vector<64xf32> to vector<1x64xf32>
    %cst_327 = arith.constant 2.000000e+00 : f32
    %554 = vector.broadcast %cst_327 : f32 to vector<1x64xf32>
    %555 = arith.divf %553, %554 : vector<1x64xf32>
    %556 = vector.broadcast %548 : vector<1x64xf32> to vector<2x64xf32>
    %557 = arith.subf %542, %556 : vector<2x64xf32>
    %558 = vector.broadcast %543 : vector<1x64xf32> to vector<2x64xf32>
    %559 = arith.mulf %558, %557 : vector<2x64xf32>
    %cst_328 = arith.constant 9.99999974E-6 : f32
    %560 = vector.broadcast %cst_328 : f32 to vector<1x64xf32>
    %561 = arith.addf %555, %560 : vector<1x64xf32>
    %562 = math.rsqrt %561 : vector<1x64xf32>
    %563 = vector.broadcast %562 : vector<1x64xf32> to vector<2x64xf32>
    %564 = arith.mulf %559, %563 : vector<2x64xf32>
    %565 = vector.broadcast %544 : vector<1x64xf32> to vector<2x64xf32>
    %566 = arith.addf %564, %565 : vector<2x64xf32>
    %cst_329 = arith.constant 0.000000e+00 : f32
    %567 = vector.broadcast %cst_329 : f32 to vector<2x64xf32>
    %568 = arith.cmpf oge, %566, %567 : vector<2x64xf32>
    %cst_330 = arith.constant 0.00999999977 : f32
    %569 = vector.broadcast %cst_330 : f32 to vector<2x64xf32>
    %570 = arith.mulf %569, %566 : vector<2x64xf32>
    %571 = arith.select %568, %566, %570 : vector<2x64xi1>, vector<2x64xf32>
    %c0_331 = arith.constant 0 : index
    %c0_332 = arith.constant 0 : index
    %572 = vector.load %arg31[%c0_331, %c0_332] : memref<64x64xf32, #tpu.memory_space<vmem>>, vector<64x64xf32>
    %cst_333 = arith.constant dense<0.000000e+00> : vector<2x64xf32>
    %573 = tpu.matmul %571, %572, %cst_333 {dimension_numbers = #tpu.dot_dimension_numbers<[1], [0], [0], [1], [0, 0, 1, 1], [], []>} : vector<2x64xf32>, vector<64x64xf32>, vector<2x64xf32> -> vector<2x64xf32>
    %c0_334 = arith.constant 0 : index
    %c0_335 = arith.constant 0 : index
    %574 = vector.load %arg32[%c0_334, %c0_335] : memref<1x64xf32, #tpu.memory_space<vmem>>, vector<1x64xf32>
    %575 = vector.broadcast %574 : vector<1x64xf32> to vector<2x64xf32>
    %576 = arith.addf %573, %575 : vector<2x64xf32>
    %c0_336 = arith.constant 0 : index
    %c0_337 = arith.constant 0 : index
    %577 = vector.load %arg33[%c0_336, %c0_337] : memref<1x64xf32, #tpu.memory_space<vmem>>, vector<1x64xf32>
    %c0_338 = arith.constant 0 : index
    %c0_339 = arith.constant 0 : index
    %578 = vector.load %arg34[%c0_338, %c0_339] : memref<1x64xf32, #tpu.memory_space<vmem>>, vector<1x64xf32>
    %cst_340 = arith.constant dense<0.000000e+00> : vector<64xf32>
    %579 = vector.multi_reduction <add>, %576, %cst_340 [0] : vector<2x64xf32> to vector<64xf32>
    %580 = vector.shape_cast %579 : vector<64xf32> to vector<1x64xf32>
    %cst_341 = arith.constant 2.000000e+00 : f32
    %581 = vector.broadcast %cst_341 : f32 to vector<1x64xf32>
    %582 = arith.divf %580, %581 : vector<1x64xf32>
    %583 = vector.broadcast %582 : vector<1x64xf32> to vector<2x64xf32>
    %584 = arith.subf %576, %583 : vector<2x64xf32>
    %585 = arith.mulf %584, %584 : vector<2x64xf32>
    %cst_342 = arith.constant dense<0.000000e+00> : vector<64xf32>
    %586 = vector.multi_reduction <add>, %585, %cst_342 [0] : vector<2x64xf32> to vector<64xf32>
    %587 = vector.shape_cast %586 : vector<64xf32> to vector<1x64xf32>
    %cst_343 = arith.constant 2.000000e+00 : f32
    %588 = vector.broadcast %cst_343 : f32 to vector<1x64xf32>
    %589 = arith.divf %587, %588 : vector<1x64xf32>
    %590 = vector.broadcast %582 : vector<1x64xf32> to vector<2x64xf32>
    %591 = arith.subf %576, %590 : vector<2x64xf32>
    %592 = vector.broadcast %577 : vector<1x64xf32> to vector<2x64xf32>
    %593 = arith.mulf %592, %591 : vector<2x64xf32>
    %cst_344 = arith.constant 9.99999974E-6 : f32
    %594 = vector.broadcast %cst_344 : f32 to vector<1x64xf32>
    %595 = arith.addf %589, %594 : vector<1x64xf32>
    %596 = math.rsqrt %595 : vector<1x64xf32>
    %597 = vector.broadcast %596 : vector<1x64xf32> to vector<2x64xf32>
    %598 = arith.mulf %593, %597 : vector<2x64xf32>
    %599 = vector.broadcast %578 : vector<1x64xf32> to vector<2x64xf32>
    %600 = arith.addf %598, %599 : vector<2x64xf32>
    %cst_345 = arith.constant 0.000000e+00 : f32
    %601 = vector.broadcast %cst_345 : f32 to vector<2x64xf32>
    %602 = arith.cmpf oge, %600, %601 : vector<2x64xf32>
    %cst_346 = arith.constant 0.00999999977 : f32
    %603 = vector.broadcast %cst_346 : f32 to vector<2x64xf32>
    %604 = arith.mulf %603, %600 : vector<2x64xf32>
    %605 = arith.select %602, %600, %604 : vector<2x64xi1>, vector<2x64xf32>
    %c0_347 = arith.constant 0 : index
    %c0_348 = arith.constant 0 : index
    %606 = vector.load %arg35[%c0_347, %c0_348] : memref<1x64xf32, #tpu.memory_space<vmem>>, vector<1x64xf32>
    %607 = vector.broadcast %606 : vector<1x64xf32> to vector<2x64xf32>
    %608 = arith.mulf %605, %607 : vector<2x64xf32>
    %cst_349 = arith.constant dense<0.000000e+00> : vector<2xf32>
    %609 = vector.multi_reduction <add>, %608, %cst_349 [1] : vector<2x64xf32> to vector<2xf32>
    %610 = vector.shape_cast %609 : vector<2xf32> to vector<2x1xf32>
    %c0_350 = arith.constant 0 : index
    %c0_351 = arith.constant 0 : index
    %611 = vector.load %arg36[%c0_350, %c0_351] : memref<1x1xf32, #tpu.memory_space<vmem>>, vector<1x1xf32>
    %612 = vector.broadcast %611 : vector<1x1xf32> to vector<2x1xf32>
    %613 = arith.addf %610, %612 : vector<2x1xf32>
    %c0_352 = arith.constant 0 : index
    %c0_353 = arith.constant 0 : index
    %614 = vector.load %arg1[%c0_352, %c0_353] : memref<2x1xf32, #tpu.memory_space<vmem>>, vector<2x1xf32>
    %615 = arith.subf %613, %614 : vector<2x1xf32>
    %616 = math.absf %615 : vector<2x1xf32>
    %cst_354 = arith.constant dense<0.000000e+00> : vector<1xf32>
    %617 = vector.multi_reduction <add>, %616, %cst_354 [0] : vector<2x1xf32> to vector<1xf32>
    %618 = vector.shape_cast %617 : vector<1xf32> to vector<1x1xf32>
    %cst_355 = arith.constant 2.000000e+00 : f32
    %619 = vector.broadcast %cst_355 : f32 to vector<1x1xf32>
    %620 = arith.divf %618, %619 : vector<1x1xf32>
    %c0_356 = arith.constant 0 : index
    %c0_357 = arith.constant 0 : index
    %621 = vector.load %arg37[%c0_356, %c0_357] : memref<1x1xf32, #tpu.memory_space<vmem>>, vector<1x1xf32>
    tpu.vector_store %arg37[%c0_356, %c0_357], %620 {strides = array<i32>} : memref<1x1xf32, #tpu.memory_space<vmem>>, vector<1x1xf32>,
    return
  }
}

</mosaic_0001>

<bundles_post_ra>
// kernel: tpu_custom_call.1
= control target key start
LH: loop header
LB: loop body
LE: loop exit
PB: predicated region body
PF: predicated region fallthrough
CT: control target
= control target key end

     0   :  { %s3099_s6 = smov 1   ;;  %s3100_s10 = smov 2   ;;  %s4127_s0 = inlined_call_operand.smem [shape: u32[38], index: -1, kind: input, shape index: {}] }
   0x1   :  { %s3157_s5 = sld [smem:[%s4127_s0]]   ;;  %s3101_s14 = smov 3  }
   0x2   :  { %s3162_s9 = sld [smem:[%s4127_s0 + %s3099_s6]]   ;;  %s3102_s18 = smov 4  }
   0x3   :  { %s3167_s13 = sld [smem:[%s4127_s0 + %s3100_s10]]   ;;  %s3103_s22 = smov 5  }
   0x4   :  { %s3172_s17 = sld [smem:[%s4127_s0 + %s3101_s14]]   ;;  %s3104_s26 = smov 6  }
   0x5   :  { %s3177_s21 = sld [smem:[%s4127_s0 + %s3102_s18]]   ;;  %s3105_s30 = smov 7  }
   0x6   :  { %s3182_s25 = sld [smem:[%s4127_s0 + %s3103_s22]]   ;;  %s3106_s4 = smov 8  }
   0x7   :  { %s3187_s29 = sld [smem:[%s4127_s0 + %s3104_s26]]   ;;  %s3107_s10 = smov 9  }
   0x8   :  { %4137 = sst [smem:[#allocation17_spill]] %s3162_s9  ;;  %s3108_s15 = smov 10  }
   0x9   :  { %s3192_s3 = sld [smem:[%s4127_s0 + %s3105_s30]]   ;;  %s3109_s20 = smov 11  }
   0xa   :  { %s3197_s8 = sld [smem:[%s4127_s0 + %s3106_s4]]   ;;  %s3110_s26 = smov 12  }
   0xb   :  { %s3202_s14 = sld [smem:[%s4127_s0 + %s3107_s10]]   ;;  %s3111_s1 = smov 13  }
   0xc   :  { %s3207_s19 = sld [smem:[%s4127_s0 + %s3108_s15]]   ;;  %s3112_s7 = smov 14  }
   0xd   :  { %s3212_s24 = sld [smem:[%s4127_s0 + %s3109_s20]]   ;;  %s3113_s15 = smov 15  }
   0xe   :  { %s3217_s30 = sld [smem:[%s4127_s0 + %s3110_s26]]   ;;  %s3114_s22 = smov 16  }
   0xf   :  { %s3222_s6 = sld [smem:[%s4127_s0 + %s3111_s1]]   ;;  %s3115_s28 = smov 17  }
  0x10   :  { %4138 = sst [smem:[#allocation18_spill]] %s3197_s8  ;;  %s3135_s1 = smov 37  }
  0x11   :  { %s3227_s12 = sld [smem:[%s4127_s0 + %s3112_s7]]   ;;  %s3116_s7 = smov 18  }
  0x12   :  { %s3232_s20 = sld [smem:[%s4127_s0 + %s3113_s15]]   ;;  %s3117_s15 = smov 19  }
  0x13   :  { %s3237_s27 = sld [smem:[%s4127_s0 + %s3114_s22]]   ;;  %s3118_s22 = smov 20  }
  0x14   :  { %s3242_s4 = sld [smem:[%s4127_s0 + %s3115_s28]]   ;;  %s3119_s28 = smov 21  }
  0x15   :  { %4139 = sst [smem:[#allocation19_spill]] %s3222_s6 }
  0x16   :  { %s3247_s9 = sld [smem:[%s4127_s0 + %s3116_s7]]   ;;  %s3120_s7 = smov 22  }
  0x17   :  { %4140 = sst [smem:[#allocation20_spill]] %s3227_s12 }
  0x18   :  { %4141 = sst [smem:[#allocation21_spill]] %s3232_s20 }
  0x19   :  { %4142 = sst [smem:[#allocation22_spill]] %s3237_s27 }
  0x1a   :  { %4143 = sst [smem:[#allocation23_spill]] %s3242_s4 }
  0x1b   :  { %s3252_s20 = sld [smem:[%s4127_s0 + %s3117_s15]]   ;;  %s3121_s15 = smov 23  }
  0x1c   :  { %4144 = sst [smem:[#allocation24_spill]] %s3247_s9 }
  0x1d   :  { %s3257_s27 = sld [smem:[%s4127_s0 + %s3118_s22]]   ;;  %s3122_s22 = smov 24  }
  0x1e   :  { %s3262_s4 = sld [smem:[%s4127_s0 + %s3119_s28]]   ;;  %s3123_s28 = smov 25  }
  0x1f   :  { %s3267_s9 = sld [smem:[%s4127_s0 + %s3120_s7]]   ;;  %s3124_s7 = smov 26  }
  0x21   :  { %4145 = sst [smem:[#allocation25_spill]] %s3252_s20 }
  0x22   :  { %s3272_s20 = sld [smem:[%s4127_s0 + %s3121_s15]]   ;;  %s3125_s15 = smov 27  }
  0x23   :  { %4146 = sst [smem:[#allocation26_spill]] %s3257_s27 }
  0x24   :  { %4147 = sst [smem:[#allocation27_spill]] %s3262_s4 }
  0x25   :  { %4148 = sst [smem:[#allocation28_spill]] %s3267_s9 }
  0x26   :  { %s3277_s27 = sld [smem:[%s4127_s0 + %s3122_s22]]   ;;  %s3126_s22 = smov 28  }
  0x27   :  { %s3282_s4 = sld [smem:[%s4127_s0 + %s3123_s28]]   ;;  %s3127_s28 = smov 29  }
  0x28   :  { %s3287_s9 = sld [smem:[%s4127_s0 + %s3124_s7]]   ;;  %s3128_s7 = smov 30  }
  0x29   :  { %s3292_s12 = sld [smem:[%s4127_s0 + %s3125_s15]]   ;;  %s3129_s15 = smov 31  }
  0x2a   :  { %s3312_s8 = sld [smem:[%s4127_s0 + %s3129_s15]]   ;;  %s3133_s15 = smov 35  }
  0x2b   :  { %s3332_s6 = sld [smem:[%s4127_s0 + %s3133_s15]]  }
  0x2c   :  { %4149 = sst [smem:[#allocation29_spill]] %s3277_s27 }
  0x2d   :  { %4150 = sst [smem:[#allocation30_spill]] %s3282_s4 }
  0x2e   :  { %4151 = sst [smem:[#allocation31_spill]] %s3287_s9 }
  0x2f   :  { %s3297_s27 = sld [smem:[%s4127_s0 + %s3126_s22]]   ;;  %s3130_s22 = smov 32  }
  0x30   :  { %s3302_s4 = sld [smem:[%s4127_s0 + %s3127_s28]]   ;;  %s3131_s28 = smov 33  }
  0x31   :  { %s3307_s9 = sld [smem:[%s4127_s0 + %s3128_s7]]   ;;  %s3132_s7 = smov 34  }
  0x35   :  { %4152 = sst [smem:[#allocation32_spill]] %s3297_s27 }
  0x36   :  { %4153 = sst [smem:[#allocation33_spill]] %s3302_s4 }
  0x37   :  { %4154 = sst [smem:[#allocation34_spill]] %s3307_s9 }
  0x38   :  { %s3317_s27 = sld [smem:[%s4127_s0 + %s3130_s22]]   ;;  %s3134_s22 = smov 36  }
  0x39   :  { %s3322_s4 = sld [smem:[%s4127_s0 + %s3131_s28]]  }
  0x3a   :  { %s3327_s9 = sld [smem:[%s4127_s0 + %s3132_s7]]  }
  0x3e   :  { %4155 = sst [smem:[#allocation35_spill]] %s3317_s27 }
  0x3f   :  { %4156 = sst [smem:[#allocation36_spill]] %s3322_s4 }
  0x40   :  { %s2608_s27 = sld [smem:[%s4127_s0 + %s3134_s22]]  }
  0x41   :  { %s3340_s4 = sld [smem:[%s4127_s0 + %s3135_s1]]  }
  0x46   :  { %v80_v0 = vstv %s2608_s27 }
  0x47   :  { %81 = vst [vmem:[#allocation2] sm:$0x1] %v80_v0 }
  0x48   :  { %82 = vsyncpa [#allocation4], 0 }
  0x49   :  { %83 = vsyncpa [#allocation7], 0 }
  0x4a   :  { %84 = vsyncpa [#allocation10], 0  ;;  %s107_s7 = sshll.u32 %s3177_s21, 4  ;;  %s108_s7 = int_to_ptr.hbm [resolvable:$true] %s107_s7 }
  0x4b   :  { %85 = vsyncpa [#allocation5], 0  ;;  %s3136_s10 = smov [#allocation6]   ;;  %s175_s15 = sshll.u32 %s3292_s12, 4  ;;  %s176_s15 = int_to_ptr.hbm [resolvable:$true] %s175_s15 }
  0x4c   :  { %s109_s11 = sshll.u32 %s3136_s10, 4  ;;  %s2947_s16 = sshra.s32 %s108_s7, 4  ;;  %s110_s11 = int_to_ptr.vmem [resolvable:$true] %s109_s11  ;;  %s2948_s16 = int_to_ptr.hbm [resolvable:$true] %s2947_s16 }
  0x4d   :  { %s2949_s0 = scalar_lea.hbm %s2948_s16, 32  ;;  %s2951_s27 = scalar_lea.hbm %s3177_s21, 32 }
  0x4e   :  { %p2950_p0 = scmp.ne.s32.totalorder %s2948_s16, %s2949_s0  ;;  %p2952_p1 = scmp.lt.s32.totalorder %s2948_s16, %s3177_s21 }
  0x4f   :  { %p2953_p2 = scmp.lt.s32.totalorder %s2951_s27, %s2949_s0 }
  0x51   :  { %p2954_p3 = por %p2953_p2, %p2952_p1 }
  0x53   :  { %p2955_p4 = pnand %p2954_p3, %p2950_p0 }
  0x55   :  { %2958 = shalt.err (!%p2955_p4)
}
  0x56   :  { %s3137_s18 = smov 128   ;;  %s3138_s22 = smov 8  }
  0x57   :  { %115 = dma.hbm_to_vmem [thread:$0]  %s108_s7, 512, %s110_s11, [#allocation7], %s3137_s18, %s3137_s18, %s3138_s22  }
  0x58   :  { %s3139_s23 = smov [#allocation9]   ;;  %s95_s1 = sshll.u32 %s3167_s13, 4  ;;  %s96_s1 = int_to_ptr.hbm [resolvable:$true] %s95_s1 }
  0x59   :  { %s177_s26 = sshll.u32 %s3139_s23, 4  ;;  %s2971_s21 = sshra.s32 %s176_s15, 4  ;;  %s178_s26 = int_to_ptr.vmem [resolvable:$true] %s177_s26  ;;  %s2972_s21 = int_to_ptr.hbm [resolvable:$true] %s2971_s21 }
  0x5a   :  { %s2973_s28 = scalar_lea.hbm %s2972_s21, 64  ;;  %s2975_s2 = scalar_lea.hbm %s3292_s12, 64 }
  0x5b   :  { %p2974_p5 = scmp.ne.s32.totalorder %s2972_s21, %s2973_s28  ;;  %p2976_p6 = scmp.lt.s32.totalorder %s2972_s21, %s3292_s12 }
  0x5c   :  { %p2977_p7 = scmp.lt.s32.totalorder %s2975_s2, %s2973_s28 }
  0x5e   :  { %p2978_p8 = por %p2977_p7, %p2976_p6 }
  0x60   :  { %p2979_p9 = pnand %p2978_p8, %p2974_p5 }
  0x62   :  { %2982 = shalt.err (!%p2979_p9)
}
  0x63   :  { %183 = dma.hbm_to_vmem [thread:$0]  %s176_s15, 1024, %s178_s26, [#allocation10], %s3137_s18, %s3137_s18, %s3138_s22  }
  0x64   :  { %s156_s7 = sshll.u32 %s3272_s20, 4  ;;  %s3140_s10 = smov [#allocation3]   ;;  %s3356_s7 = int_to_ptr.hbm [resolvable:$true] %s156_s7 }
  0x65   :  { %s97_s11 = sshll.u32 %s3140_s10, 4  ;;  %s2995_s16 = sshra.s32 %s96_s1, 4  ;;  %s98_s11 = int_to_ptr.vmem [resolvable:$true] %s97_s11  ;;  %s2996_s16 = int_to_ptr.hbm [resolvable:$true] %s2995_s16 }
  0x66   :  { %s2997_s12 = scalar_lea.hbm %s2996_s16, 1  ;;  %s2999_s0 = scalar_lea.hbm %s3167_s13, 1 }
  0x67   :  { %p2998_p10 = scmp.ne.s32.totalorder %s2996_s16, %s2997_s12  ;;  %p3000_p11 = scmp.lt.s32.totalorder %s2996_s16, %s3167_s13 }
  0x68   :  { %p3001_p12 = scmp.lt.s32.totalorder %s2999_s0, %s2997_s12 }
  0x6a   :  { %p3002_p13 = por %p3001_p12, %p3000_p11 }
  0x6c   :  { %p3003_p0 = pnand %p3002_p13, %p2998_p10 }
  0x6e   :  { %3006 = shalt.err (!%p3003_p0)
}
  0x6f   :  { %100 = dma.hbm_to_vmem [thread:$0]  %s96_s1, 16, %s98_s11, [#allocation4]  }
  0x70   :  { %s3141_s15 = smov [#allocation8]   ;;  %s194_s23 = sshll.u32 %s3312_s8, 4  ;;  %s195_s23 = int_to_ptr.hbm [resolvable:$true] %s194_s23 }
  0x71   :  { %s158_s27 = sshll.u32 %s3141_s15, 4  ;;  %s3019_s26 = sshra.s32 %s3356_s7, 4  ;;  %s159_s27 = int_to_ptr.vmem [resolvable:$true] %s158_s27  ;;  %s3020_s26 = int_to_ptr.hbm [resolvable:$true] %s3019_s26 }
  0x72   :  { %s3021_s21 = scalar_lea.hbm %s3020_s26, 32  ;;  %s3023_s28 = scalar_lea.hbm %s3272_s20, 32 }
  0x73   :  { %p3022_p1 = scmp.ne.s32.totalorder %s3020_s26, %s3021_s21  ;;  %p3024_p2 = scmp.lt.s32.totalorder %s3020_s26, %s3272_s20 }
  0x74   :  { %p3025_p3 = scmp.lt.s32.totalorder %s3023_s28, %s3021_s21 }
  0x76   :  { %p3026_p4 = por %p3025_p3, %p3024_p2 }
  0x78   :  { %p3027_p5 = pnand %p3026_p4, %p3022_p1 }
  0x7a   :  { %3030 = shalt.err (!%p3027_p5)
}
  0x7b   :  { %164 = dma.hbm_to_vmem [thread:$0]  %s3356_s7, 512, %s159_s27, [#allocation7], %s3137_s18, %s3137_s18, %s3138_s22  }
  0x7c   :  { %s3142_s13 = smov [#allocation11]   ;;  %s3043_s2 = sshra.s32 %s195_s23, 4  ;;  %s3044_s2 = int_to_ptr.hbm [resolvable:$true] %s3043_s2 }
  0x7d   :  { %s196_s1 = sshll.u32 %s3142_s13, 4  ;;  %s3045_s10 = scalar_lea.hbm %s3044_s2, 64  ;;  %s197_s1 = int_to_ptr.vmem [resolvable:$true] %s196_s1 }
  0x7e   :  { %p3046_p6 = scmp.ne.s32.totalorder %s3044_s2, %s3045_s10  ;;  %s3047_s20 = scalar_lea.hbm %s3312_s8, 64 }
  0x7f   :  { %p3048_p7 = scmp.lt.s32.totalorder %s3044_s2, %s3312_s8  ;;  %p3049_p8 = scmp.lt.s32.totalorder %s3047_s20, %s3045_s10 }
  0x81   :  { %p3050_p9 = por %p3049_p8, %p3048_p7 }
  0x83   :  { %p3051_p10 = pnand %p3050_p9, %p3046_p6 }
  0x85   :  { %3054 = shalt.err (!%p3051_p10)
}
  0x86   :  { %202 = dma.hbm_to_vmem [thread:$0]  %s195_s23, 1024, %s197_s1, [#allocation10], %s3137_s18, %s3137_s18, %s3138_s22  }
  0x87   :  { %3091 = dma.done.wait [#allocation4], 16  }
  0x88   :  { %3092 = vsyncadd [#allocation4], 4294967280 }
  0x89   :  { %3093 = dma.done.wait [#allocation7], 1024  }
  0x8a   :  { %3094 = vsyncadd [#allocation7], 4294966272 }
  0x8b   :  { %3095 = dma.done.wait [#allocation10], 2048  }
  0x8c   :  { %3096 = vsyncadd [#allocation10], 4294965248  ;;  %v3143_v1 = vmov 0   ;;  %v239_v2 = vld [vmem:[%s3157_s5] sm:$0xff]  ;;  %v3144_v3 = vmov 1   ;;  %vm257_vm0 = vcmask 1040384  }
  0x8d   :  { %2779 = vset.pattern.permute.xlu0 %v3143_v1  ;;  %2781 = vset.pattern.permute.xlu2 %v3143_v1  ;;  %v3376_v5 = vld [vmem:[%s3172_s17] sm:$0x3]  ;;  %vm261_vm1 = vcmask 261120   ;;  %vm265_vm2 = vcmask 253952   ;;  %v3145_v17 = vmov 32.0   ;;  %v3146_v34 = vmov 31.0  }
  0x8e   :  { %242 = vperm.xlu0 %2779, %v239_v2   ;;  %v245_v6 = vperm.slane %v3376_v5, 0  ;;  %v251_v7 = vperm.slane %v3376_v5, 1  ;;  %v238_v12 = vld [vmem:[#allocation3] sm:$0x1]  ;;  %2816 = vrcp.f32 %v3145_v17  ;;  %v3411_v40 = vld [vmem:[%s3192_s3 + $0x18] sm:$0xff]  ;;  %v3417_v42 = vld [vmem:[%s3192_s3 + $0x10] sm:$0xff] }
  0x8f   :  { %2818 = vrcp.f32 %v3146_v34  ;;  %v3414_v41 = vld [vmem:[%s3202_s14 + $0x18] sm:$0xff]  ;;  %389 = vmatpush.msra.mxu0 %v3411_v40  ;;  %v3422_v43 = vld [vmem:[%s3202_s14 + $0x10] sm:$0xff]  ;;  %v3427_v45 = vld [vmem:[%s3192_s3 + $0x8] sm:$0xff]  ;;  %s4157_s17 = sld [smem:[#allocation19_spill]]  ;;  %s2561_s26 = sshll.u32 %s3340_s4, 4  ;;  %s2562_s26 = int_to_ptr.hbm [resolvable:$true] %s2561_s26 }
  0x90   :  { %420 = vmatpush.msra.mxu2 %v3414_v41  ;;  %v3430_v46 = vld [vmem:[%s3202_s14 + $0x8] sm:$0xff]  ;;  %v3435_v48 = vld [vmem:[%s3192_s3] sm:$0xff]  ;;  %s4158_s8 = sld [smem:[#allocation18_spill]]  ;;  %s3079_s21 = sshra.s32 %s2562_s26, 4  ;;  %s3080_s21 = int_to_ptr.hbm [resolvable:$true] %s3079_s21 }
  0x91   :  { %390 = vmatpush.msra.mxu0 %v3417_v42  ;;  %v3438_v49 = vld [vmem:[%s3202_s14] sm:$0xff]  ;;  %s4159_s18 = sld [smem:[#allocation20_spill]]  ;;  %s3081_s28 = scalar_lea.hbm %s3080_s21, 1 }
  0x92   :  { %421 = vmatpush.msra.mxu2 %v3422_v43  ;;  %s4160_s22 = sld [smem:[#allocation23_spill]]  ;;  %p3082_p11 = scmp.ne.s32.totalorder %s3080_s21, %s3081_s28 }
  0x93   :  { %391 = vmatpush.msra.mxu0 %v3427_v45  ;;  %s4161_s7 = sld [smem:[#allocation25_spill]]  ;;  %s3083_s13 = scalar_lea.hbm %s3340_s4, 1 }
  0x94   :  { %v2817_v18 = vpop.eup %2816  ;;  %422 = vmatpush.msra.mxu2 %v3430_v46  ;;  %s4162_s11 = sld [smem:[#allocation21_spill]]  ;;  %p3084_p12 = scmp.lt.s32.totalorder %s3080_s21, %s3340_s4 }
  0x95   :  { %v270_v19 = vmul.f32 32.0, %v2817_v18  ;;  %vm274_vm3 = vweird.f32 %v2817_v18  ;;  %v2819_v35 = vpop.eup %2818  ;;  %392 = vmatpush.msra.mxu0 %v3435_v48  ;;  %s4163_s16 = sld [smem:[#allocation22_spill]]  ;;  %p3085_p13 = scmp.lt.s32.totalorder %s3083_s13, %s3081_s28 }
  0x96   :  { %2780 = vset.pattern.permute.xlu0 %v3144_v3  ;;  %v289_v36 = vmul.f32 31.0, %v2819_v35  ;;  %vm293_vm4 = vweird.f32 %v2819_v35  ;;  %423 = vmatpush.msra.mxu2 %v3438_v49  ;;  %s4164_s12 = sld [smem:[#allocation24_spill]] }
  0x97   :  { %248 = vperm.xlu0 %2780, %v239_v2   ;;  %v271_v20 = vsub.f32 1.0, %v270_v19  ;;  %s4165_s0 = sld [smem:[#allocation26_spill]]  ;;  %p3086_p0 = por %p3085_p13, %p3084_p12 }
  0x98   :  { %v290_v37 = vsub.f32 1.0, %v289_v36  ;;  %v2784_v36 = vld [vmem:[%s3187_s29] ss:$0 sm:$0xff]  ;;  %s4174_s15 = sld [smem:[#allocation35_spill]] }
  0x99   :  { %v272_v21 = vmul.f32 %v2817_v18, %v271_v20  ;;  %s4175_s27 = sld [smem:[#allocation36_spill]]  ;;  %p3087_p1 = pnand %p3086_p0, %p3082_p11 }
  0x9a   :  { %v291_v38 = vmul.f32 %v2819_v35, %v290_v37  ;;  %s4176_s23 = sld [smem:[#allocation17_spill]] }
  0x9b   :  { %v273_v22 = vadd.f32 %v2817_v18, %v272_v21 }
  0x9c   :  { %v292_v39 = vadd.f32 %v2819_v35, %v291_v38 }
  0x9d   :  { %v3394_v23 = vsel %vm274_vm3, %v2817_v18, %v273_v22 }
  0x9e   :  { %v3424_v44 = vsel %vm293_vm4, %v2819_v35, %v292_v39  ;;  %vm494_vm4 = vcmask 72704  }
 0x100   :  { %v243_v4 = vpop.permute.xlu0 %242 }
 0x101   :  { %v246_v9 = vmul.f32 %v245_v6, %v243_v4  ;;  %v434_v4 = vld [vmem:[%s3212_s24 + $0x18] sm:$0xff] }
 0x102   :  { %451 = vmatpush.msrb.mxu2 %v434_v4 }
 0x109   :  { %v249_v8 = vpop.permute.xlu0 %248 }
 0x10a   :  { %v252_v10 = vmul.f32 %v251_v7, %v249_v8  ;;  %v433_v8 = vld [vmem:[%s3212_s24 + $0x10] sm:$0xff] }
 0x10b   :  { %452 = vmatpush.msrb.mxu2 %v433_v8 }
 0x10c   :  { %v253_v11 = vadd.f32 %v252_v10, %v246_v9 }
 0x10e   :  { %v3384_v13 = vrot.slane %v253_v11, 7  ;;  %v432_v11 = vld [vmem:[%s3212_s24 + $0x8] sm:$0xff] }
 0x10f   :  { %453 = vmatpush.msrb.mxu2 %v432_v11 }
 0x110   :  { %v3388_v14 = vsel %vm257_vm0, %v238_v12, %v3384_v13  ;;  %v266_v16 = vsel %vm265_vm2, %v3384_v13, 0.0 }
 0x111   :  { %v262_v15 = vsel %vm261_vm1, %v3388_v14, 0.0 }
 0x112   :  { %263 = vadd.xlane.f32.xlu1 %v262_v15  ;;  %v431_v15 = vld [vmem:[%s3212_s24] sm:$0xff] }
 0x113   :  { %454 = vmatpush.msrb.mxu2 %v431_v15 }
 0x11a   :  { %267 = vadd.xlane.f32.xlu1 %v266_v16 }
 0x185   :  { %v264_v24 = vpop.xlane.xlu1 %263 }
 0x186   :  { %v276_v25 = vmul.f32 %v3394_v23, %v264_v24 }
 0x188   :  { %v3398_v26 = vsub.f32 %v3388_v14, %v276_v25 }
 0x18a   :  { %v280_v27 = vmul.f32 %v3398_v26, %v3398_v26 }
 0x18c   :  { %v282_v28 = vsel %vm261_vm1, %v280_v27, 0.0  ;;  %v2783_v27 = vld [vmem:[%s3182_s25] ss:$0 sm:$0xff] }
 0x18d   :  { %283 = vadd.xlane.f32.xlu2 %v282_v28  ;;  %v268_v29 = vpop.xlane.xlu1 %267  ;;  %v354_v34 = vmul.f32 %v2783_v27, %v3398_v26 }
 0x18e   :  { %v277_v30 = vmul.f32 %v3394_v23, %v268_v29 }
 0x190   :  { %v3405_v31 = vsub.f32 %v3384_v13, %v277_v30 }
 0x192   :  { %v281_v32 = vmul.f32 %v3405_v31, %v3405_v31 }
 0x194   :  { %v285_v33 = vsel %vm265_vm2, %v281_v32, 0.0 }
 0x195   :  { %286 = vadd.xlane.f32.xlu2 %v285_v33 }
 0x200   :  { %v284_v47 = vpop.xlane.xlu2 %283 }
 0x201   :  { %v295_v50 = vmul.f32 %v3424_v44, %v284_v47 }
 0x203   :  { %2820 = vrsqrt.f32 %v295_v50  ;;  %vm304_vm5 = vcmp.eq.f32.partialorder %v295_v50, inf  ;;  %v307_v63 = vand.u32 2147483648, %v295_v50  ;;  %vm306_vm6 = vcmp.eq.f32.partialorder %v295_v50, 0.0 }
 0x208   :  { %v287_v51 = vpop.xlane.xlu2 %286 }
 0x209   :  { %v2821_v52 = vpop.eup %2820  ;;  %v296_v53 = vmul.f32 %v3424_v44, %v287_v51 }
 0x20a   :  { %v298_v54 = vmul.f32 %v2821_v52, %v295_v50 }
 0x20b   :  { %2822 = vrsqrt.f32 %v296_v53  ;;  %vm316_vm7 = vcmp.eq.f32.partialorder %v296_v53, inf  ;;  %v319_v17 = vand.u32 2147483648, %v296_v53  ;;  %vm318_vm8 = vcmp.eq.f32.partialorder %v296_v53, 0.0 }
 0x20c   :  { %v299_v55 = vmul.f32 %v2821_v52, %v298_v54 }
 0x20e   :  { %v300_v56 = vmul.f32 0.5, %v299_v55  ;;  %v355_v55 = vmul.f32 %v2783_v27, %v3405_v31 }
 0x210   :  { %v301_v57 = vsub.f32 1.5, %v300_v56 }
 0x211   :  { %v2823_v58 = vpop.eup %2822 }
 0x212   :  { %v302_v59 = vmul.f32 %v2821_v52, %v301_v57  ;;  %v310_v60 = vmul.f32 %v2823_v58, %v296_v53 }
 0x214   :  { %v303_v61 = vmul.f32 %v302_v59, %v295_v50  ;;  %v311_v62 = vmul.f32 %v2823_v58, %v310_v60  ;;  %v2786_v60 = vld [vmem:[%s3207_s19] ss:$0 sm:$0xff] }
 0x216   :  { %v312_v0 = vmul.f32 0.5, %v311_v62  ;;  %v305_v1 = vsel %vm304_vm5, %v295_v50, %v303_v61 }
 0x217   :  { %v308_v2 = vsel %vm306_vm6, %v307_v63, %v305_v1  ;;  %v2787_v1 = vld [vmem:[%s3217_s30] ss:$0 sm:$0xff] }
 0x218   :  { %v313_v9 = vsub.f32 1.5, %v312_v0  ;;  %v321_v10 = vadd.f32 1e-06, %v308_v2 }
 0x21a   :  { %v314_v12 = vmul.f32 %v2823_v58, %v313_v9  ;;  %2824 = vrcp.f32 %v321_v10  ;;  %v334_v25 = vand.u32 2147483648, %v321_v10  ;;  %v332_v29 = vand.u32 2147483647, %v321_v10 }
 0x21b   :  { %vm328_vm10 = vweird.f32 %v321_v10 }
 0x21c   :  { %v315_v16 = vmul.f32 %v314_v12, %v296_v53  ;;  %v335_v33 = vor.u32 1.1754944e-38, %v334_v25  ;;  %vm333_vm12 = vcmp.eq.f32.partialorder %v332_v29, 8.507059e+37  ;;  %v3479_v29 = vld [vmem:[#allocation6] sm:$0xff] }
 0x21e   :  { %v317_v18 = vsel %vm316_vm7, %v296_v53, %v315_v16 }
 0x21f   :  { %v320_v19 = vsel %vm318_vm8, %v319_v17, %v317_v18  ;;  %v577_v17 = vld [vmem:[%s4157_s17 + $0x18] sm:$0xff]  ;;  %v576_v18 = vld [vmem:[%s4157_s17 + $0x10] sm:$0xff] }
 0x220   :  { %v2825_v20 = vpop.eup %2824  ;;  %v322_v21 = vadd.f32 1e-06, %v320_v19  ;;  %600 = vmatpush.msra.mxu1 %v577_v17  ;;  %v3470_v19 = vld [vmem:[#allocation6 + $0x18] sm:$0xff] }
 0x221   :  { %v324_v22 = vmul.f32 %v2825_v20, %v321_v10  ;;  %vm329_vm9 = vweird.f32 %v2825_v20 }
 0x222   :  { %2826 = vrcp.f32 %v322_v21  ;;  %vm330_vm11 = vmor %vm328_vm10, %vm329_vm9  ;;  %v348_v50 = vand.u32 2147483648, %v322_v21  ;;  %v346_v53 = vand.u32 2147483647, %v322_v21  ;;  %vm342_vm14 = vweird.f32 %v322_v21  ;;  %601 = vmatpush.msra.mxu1 %v576_v18 }
 0x223   :  { %v325_v24 = vsub.f32 1.0, %v324_v22 }
 0x224   :  { %v349_v26 = vor.u32 1.1754944e-38, %v348_v50  ;;  %vm347_vm3 = vcmp.eq.f32.partialorder %v346_v53, 8.507059e+37 }
 0x225   :  { %v326_v28 = vmul.f32 %v2825_v20, %v325_v24  ;;  %v3475_v24 = vld [vmem:[#allocation6 + $0x8] sm:$0xff] }
 0x227   :  { %v327_v30 = vadd.f32 %v2825_v20, %v326_v28  ;;  %v2785_v28 = vld [vmem:[%s4158_s8] ss:$0 sm:$0xff] }
 0x228   :  { %v2827_v32 = vpop.eup %2826 }
 0x229   :  { %v331_v35 = vsel %vm330_vm11, %v2825_v20, %v327_v30  ;;  %v338_v37 = vmul.f32 %v2827_v32, %v322_v21  ;;  %vm343_vm13 = vweird.f32 %v2827_v32  ;;  %v3472_v20 = vld [vmem:[#allocation6 + $0x10] sm:$0xff] }
 0x22a   :  { %v336_v38 = vsel %vm333_vm12, %v335_v33, %v331_v35  ;;  %vm344_vm15 = vmor %vm342_vm14, %vm343_vm13 }
 0x22b   :  { %v356_v39 = vmul.f32 %v354_v34, %v336_v38  ;;  %v339_v47 = vsub.f32 1.0, %v338_v37  ;;  %v574_v37 = vld [vmem:[%s4157_s17] sm:$0xff] }
 0x22d   :  { %v361_v51 = vadd.f32 %v2784_v36, %v356_v39  ;;  %v340_v52 = vmul.f32 %v2827_v32, %v339_v47 }
 0x22f   :  { %2610 = vmatmul.msk.f32.vlgmr.msra.gmra.mxu0 %vm261_vm1, %v361_v51  ;;  %2612 = vmatmul.msk.f32.vlgmr.msra.gmra.mxu2 %vm261_vm1, %v361_v51  ;;  %v341_v54 = vadd.f32 %v2827_v32, %v340_v52 }
 0x231   :  { %v345_v56 = vsel %vm344_vm15, %v2827_v32, %v341_v54 }
 0x232   :  { %v350_v57 = vsel %vm347_vm3, %v349_v26, %v345_v56 }
 0x233   :  { %v357_v58 = vmul.f32 %v355_v55, %v350_v57 }
 0x235   :  { %v362_v59 = vadd.f32 %v2784_v36, %v357_v58  ;;  %v575_v36 = vld [vmem:[%s4157_s17 + $0x8] sm:$0xff] }
 0x236   :  { %602 = vmatpush.msra.mxu1 %v575_v36  ;;  %v755_v36 = vld [vmem:[%s4161_s7 + $0x78] sm:$0xff] }
 0x237   :  { %2611 = vmatmul.msk.f32.gmra.mxu0 %vm261_vm1, %v362_v59  ;;  %2613 = vmatmul.msk.f32.gmra.mxu2 %vm261_vm1, %v362_v59 }
 0x238   :  { %603 = vmatpush.msra.mxu1 %v574_v37  ;;  %v754_v37 = vld [vmem:[%s4161_s7 + $0x70] sm:$0xff] }
 0x23f   :  { %2614 = vmatmul.msk.f32.vlgmr.msrb.gmra.mxu2 %vm261_vm1, %v361_v51  ;;  %v2788_v51 = vld [vmem:[%s4159_s18] ss:$0 sm:$0xff] }
 0x247   :  { %2615 = vmatmul.msk.f32.gmra.mxu2 %vm261_vm1, %v362_v59 }
 0x2ac   :  { %v394_v25 = vpop.f32.mrf.mxu0 }
 0x2ad   :  { %v395_v33 = vadd.f32 %v2785_v28, %v394_v25 }
 0x2b2   :  { %v425_v61 = vpop.f32.mrf.mxu2 }
 0x2b3   :  { %v426_v62 = vadd.f32 %v2786_v60, %v425_v61 }
 0x2b4   :  { %v397_v34 = vpop.f32.mrf.mxu0 }
 0x2b5   :  { %462 = vxpose.xlu1.b32.start [1/2] (short) (narrow) %v426_v62, 32  ;;  %v398_v35 = vadd.f32 %v2785_v28, %v397_v34 }
 0x2ba   :  { %v428_v63 = vpop.f32.mrf.mxu2 }
 0x2bb   :  { %v429_v31 = vadd.f32 %v2786_v60, %v428_v63 }
 0x2bd   :  { %463 = vxpose.xlu1.b32.end [2/2] (short) (narrow) %v429_v31, 32 }
 0x2c2   :  { %v456_v0 = vpop.f32.mrf.mxu2 }
 0x2c3   :  { %v457_v8 = vadd.f32 %v2787_v1, %v456_v0 }
 0x2ca   :  { %v459_v2 = vpop.f32.mrf.mxu2 }
 0x2cb   :  { %v460_v4 = vadd.f32 %v2787_v1, %v459_v2  ;;  %v704_v2 = vld [vmem:[%s4160_s22 + $0x18] sm:$0xff] }
 0x2cc   :  { %727 = vmatpush.msra.mxu2 %v704_v2 }
 0x2cd   :  { %2616 = vmatpush.msk.msra.mxu3 %vm257_vm0, %v460_v4  ;;  %v703_v4 = vld [vmem:[%s4160_s22 + $0x10] sm:$0xff] }
 0x2ce   :  { %728 = vmatpush.msra.mxu2 %v703_v4 }
 0x2cf   :  { %525 = vmatpush.msra.mxu3 %v457_v8  ;;  %v702_v8 = vld [vmem:[%s4160_s22 + $0x8] sm:$0xff] }
 0x2d0   :  { %729 = vmatpush.msra.mxu2 %v702_v8  ;;  %v747_v8 = vld [vmem:[%s4161_s7 + $0x38] sm:$0xff] }
 0x2d1   :  { %756 = vmatpush.msrb.mxu3 %v755_v36 }
 0x2d3   :  { %757 = vmatpush.msrb.mxu3 %v754_v37 }
 0x310   :  { %2782 = vset.pattern.permute.xlu1 %v3144_v3 }
 0x359   :  { %v478_v9 = vpop.trf.xlu1 }
 0x35a   :  { %2617 = vmatmul.msk.f32.vlgmr.msra.gmra.mxu3 %vm494_vm4, %v478_v9 }
 0x361   :  { %v479_v10 = vpop.trf.xlu1 }
 0x362   :  { %2618 = vmatmul.msk.f32.gmra.mxu3 %vm494_vm4, %v479_v10  ;;  %v701_v10 = vld [vmem:[%s4160_s22] sm:$0xff] }
 0x363   :  { %730 = vmatpush.msra.mxu2 %v701_v10  ;;  %v746_v10 = vld [vmem:[%s4161_s7 + $0x30] sm:$0xff] }
 0x369   :  { %v480_v11 = vpop.trf.xlu1 }
 0x36a   :  { %2619 = vmatmul.msk.f32.gmra.mxu3 %vm494_vm4, %v480_v11 }
 0x371   :  { %v481_v12 = vpop.trf.xlu1 }
 0x372   :  { %2620 = vmatmul.msk.f32.gmra.mxu3 %vm494_vm4, %v481_v12 }
 0x3dd   :  { %v527_v15 = vpop.f32.mrf.mxu3 }
 0x3de   :  { %v539_v32 = vmul.f32 %v527_v15, %v3479_v29 }
 0x3e5   :  { %v530_v16 = vpop.f32.mrf.mxu3 }
 0x3e6   :  { %v540_v30 = vmul.f32 %v530_v16, %v3475_v24 }
 0x3ed   :  { %v533_v3 = vpop.f32.mrf.mxu3 }
 0x3ee   :  { %v541_v27 = vmul.f32 %v533_v3, %v3472_v20 }
 0x3f5   :  { %v536_v21 = vpop.f32.mrf.mxu3 }
 0x3f6   :  { %v542_v22 = vmul.f32 %v536_v21, %v3470_v19 }
 0x3f8   :  { %561 = vmatpush.msrb.mxu0 %v542_v22 }
 0x3fa   :  { %562 = vmatpush.msrb.mxu0 %v541_v27 }
 0x3fc   :  { %563 = vmatpush.msrb.mxu0 %v540_v30 }
 0x3fe   :  { %564 = vmatpush.msrb.mxu0 %v539_v32 }
 0x3ff   :  { %2621 = vmatmul.msk.f32.vlgmr.msrb.gmra.mxu0 %vm261_vm1, %v395_v33 }
 0x407   :  { %2622 = vmatmul.msk.f32.gmra.mxu0 %vm261_vm1, %v398_v35 }
 0x47c   :  { %v566_v38 = vpop.f32.mrf.mxu0 }
 0x47d   :  { %v572_v39 = vmul.f32 0.35355338, %v566_v38 }
 0x47f   :  { %2623 = vmatmul.msk.f32.vlgmr.msra.gmra.mxu1 %vm261_vm1, %v572_v39 }
 0x484   :  { %v569_v47 = vpop.f32.mrf.mxu0 }
 0x485   :  { %v573_v50 = vmul.f32 0.35355338, %v569_v47  ;;  %v753_v47 = vld [vmem:[%s4161_s7 + $0x68] sm:$0xff] }
 0x486   :  { %758 = vmatpush.msrb.mxu3 %v753_v47 }
 0x487   :  { %2624 = vmatmul.msk.f32.gmra.mxu1 %vm261_vm1, %v573_v50 }
 0x4fc   :  { %v605_v52 = vpop.f32.mrf.mxu1 }
 0x4fd   :  { %v606_v53 = vadd.f32 %v2788_v51, %v605_v52 }
 0x4ff   :  { %v3491_v54 = vadd.f32 %v606_v53, %v3388_v14 }
 0x501   :  { %v615_v26 = vsel %vm261_vm1, %v3491_v54, 0.0 }
 0x502   :  { %616 = vadd.xlane.f32.xlu2 %v615_v26  ;;  %v751_v26 = vld [vmem:[%s4161_s7 + $0x58] sm:$0xff] }
 0x504   :  { %v608_v55 = vpop.f32.mrf.mxu1 }
 0x505   :  { %v609_v56 = vadd.f32 %v2788_v51, %v608_v55  ;;  %v752_v51 = vld [vmem:[%s4161_s7 + $0x60] sm:$0xff] }
 0x506   :  { %759 = vmatpush.msrb.mxu3 %v752_v51  ;;  %v3550_v51 = vld [vmem:[%s4161_s7 + $0x8] sm:$0xff] }
 0x507   :  { %v3496_v57 = vadd.f32 %v609_v56, %v3384_v13 }
 0x508   :  { %760 = vmatpush.msrb.mxu3 %v751_v26 }
 0x509   :  { %v618_v58 = vsel %vm265_vm2, %v3496_v57, 0.0 }
 0x50a   :  { %619 = vadd.xlane.f32.xlu0 %v618_v58  ;;  %v750_v58 = vld [vmem:[%s4161_s7 + $0x50] sm:$0xff] }
 0x50b   :  { %761 = vmatpush.msrb.mxu3 %v750_v58 }
 0x575   :  { %v617_v59 = vpop.xlane.xlu2 %616 }
 0x576   :  { %v621_v14 = vmul.f32 %v617_v59, %v3394_v23 }
 0x578   :  { %v3502_v60 = vsub.f32 %v3491_v54, %v621_v14 }
 0x57a   :  { %v625_v61 = vmul.f32 %v3502_v60, %v3502_v60 }
 0x57c   :  { %v627_v62 = vsel %vm261_vm1, %v625_v61, 0.0 }
 0x57d   :  { %628 = vadd.xlane.f32.xlu2 %v627_v62  ;;  %v620_v13 = vpop.xlane.xlu0 %619  ;;  %v749_v62 = vld [vmem:[%s4161_s7 + $0x48] sm:$0xff] }
 0x57e   :  { %v622_v63 = vmul.f32 %v620_v13, %v3394_v23  ;;  %762 = vmatpush.msrb.mxu3 %v749_v62 }
 0x580   :  { %v3509_v31 = vsub.f32 %v3496_v57, %v622_v63  ;;  %v748_v63 = vld [vmem:[%s4161_s7 + $0x40] sm:$0xff] }
 0x581   :  { %763 = vmatpush.msrb.mxu3 %v748_v63 }
 0x582   :  { %v626_v0 = vmul.f32 %v3509_v31, %v3509_v31 }
 0x583   :  { %764 = vmatpush.msrb.mxu3 %v747_v8 }
 0x584   :  { %v630_v1 = vsel %vm265_vm2, %v626_v0, 0.0 }
 0x585   :  { %631 = vadd.xlane.f32.xlu2 %v630_v1  ;;  %v2789_v1 = vld [vmem:[%s4162_s11] ss:$0 sm:$0xff]  ;;  %765 = vmatpush.msrb.mxu3 %v746_v10 }
 0x586   :  { %v693_v36 = vmul.f32 %v2789_v1, %v3509_v31  ;;  %v2791_v31 = vld [vmem:[%s4164_s12] ss:$0 sm:$0xff] }
 0x5f0   :  { %v629_v9 = vpop.xlane.xlu2 %628 }
 0x5f1   :  { %v633_v11 = vmul.f32 %v629_v9, %v3424_v44 }
 0x5f3   :  { %2828 = vrsqrt.f32 %v633_v11  ;;  %vm642_vm5 = vcmp.eq.f32.partialorder %v633_v11, inf  ;;  %v645_v32 = vand.u32 2147483648, %v633_v11  ;;  %vm644_vm6 = vcmp.eq.f32.partialorder %v633_v11, 0.0 }
 0x5f8   :  { %v632_v12 = vpop.xlane.xlu2 %631 }
 0x5f9   :  { %v2829_v15 = vpop.eup %2828  ;;  %v634_v16 = vmul.f32 %v632_v12, %v3424_v44 }
 0x5fa   :  { %v636_v17 = vmul.f32 %v2829_v15, %v633_v11 }
 0x5fb   :  { %2830 = vrsqrt.f32 %v634_v16  ;;  %vm654_vm7 = vcmp.eq.f32.partialorder %v634_v16, inf  ;;  %v657_v53 = vand.u32 2147483648, %v634_v16  ;;  %vm656_vm8 = vcmp.eq.f32.partialorder %v634_v16, 0.0 }
 0x5fc   :  { %v637_v18 = vmul.f32 %v2829_v15, %v636_v17  ;;  %v2790_v17 = vld [vmem:[%s4163_s16] ss:$0 sm:$0xff] }
 0x5fe   :  { %v638_v3 = vmul.f32 0.5, %v637_v18 }
 0x600   :  { %v639_v21 = vsub.f32 1.5, %v638_v3  ;;  %v745_v3 = vld [vmem:[%s4161_s7 + $0x28] sm:$0xff] }
 0x601   :  { %v2831_v22 = vpop.eup %2830  ;;  %766 = vmatpush.msrb.mxu3 %v745_v3  ;;  %v3587_v3 = vld [vmem:[%s3202_s14 + $0x38] sm:$0xff] }
 0x602   :  { %v640_v25 = vmul.f32 %v2829_v15, %v639_v21  ;;  %v648_v27 = vmul.f32 %v2831_v22, %v634_v16  ;;  %v692_v15 = vmul.f32 %v2789_v1, %v3502_v60  ;;  %v3538_v60 = vld [vmem:[%s4161_s7 + $0x18] sm:$0xff]  ;;  %938 = vmatpush.msrb.mxu1 %v3587_v3 }
 0x604   :  { %v641_v28 = vmul.f32 %v640_v25, %v633_v11  ;;  %v649_v30 = vmul.f32 %v2831_v22, %v648_v27  ;;  %v3535_v27 = vld [vmem:[%s4161_s7 + $0x20] sm:$0xff] }
 0x605   :  { %767 = vmatpush.msrb.mxu3 %v3535_v27 }
 0x606   :  { %v643_v33 = vsel %vm642_vm5, %v633_v11, %v641_v28  ;;  %v650_v34 = vmul.f32 0.5, %v649_v30 }
 0x607   :  { %v646_v35 = vsel %vm644_vm6, %v645_v32, %v643_v33  ;;  %768 = vmatpush.msrb.mxu3 %v3538_v60 }
 0x608   :  { %v659_v38 = vadd.f32 1e-06, %v646_v35  ;;  %v651_v39 = vsub.f32 1.5, %v650_v34 }
 0x60a   :  { %2832 = vrcp.f32 %v659_v38  ;;  %v652_v50 = vmul.f32 %v2831_v22, %v651_v39  ;;  %v672_v0 = vand.u32 2147483648, %v659_v38  ;;  %v670_v4 = vand.u32 2147483647, %v659_v38 }
 0x60b   :  { %vm666_vm10 = vweird.f32 %v659_v38 }
 0x60c   :  { %v653_v52 = vmul.f32 %v652_v50, %v634_v16  ;;  %v673_v12 = vor.u32 1.1754944e-38, %v672_v0  ;;  %vm671_vm12 = vcmp.eq.f32.partialorder %v670_v4, 8.507059e+37  ;;  %v3546_v50 = vld [vmem:[%s4161_s7 + $0x10] sm:$0xff] }
 0x60d   :  { %769 = vmatpush.msrb.mxu3 %v3546_v50 }
 0x60e   :  { %v655_v55 = vsel %vm654_vm7, %v634_v16, %v653_v52  ;;  %v3554_v52 = vld [vmem:[%s4161_s7] sm:$0xff] }
 0x60f   :  { %v658_v56 = vsel %vm656_vm8, %v657_v53, %v655_v55  ;;  %770 = vmatpush.msrb.mxu3 %v3550_v51 }
 0x610   :  { %v2833_v59 = vpop.eup %2832  ;;  %v660_v14 = vadd.f32 1e-06, %v658_v56 }
 0x611   :  { %v662_v61 = vmul.f32 %v2833_v59, %v659_v38  ;;  %vm667_vm9 = vweird.f32 %v2833_v59  ;;  %771 = vmatpush.msrb.mxu3 %v3554_v52 }
 0x612   :  { %2834 = vrcp.f32 %v660_v14  ;;  %vm668_vm11 = vmor %vm666_vm10, %vm667_vm9  ;;  %v686_v28 = vand.u32 2147483648, %v660_v14  ;;  %v684_v33 = vand.u32 2147483647, %v660_v14  ;;  %vm680_vm14 = vweird.f32 %v660_v14 }
 0x613   :  { %v663_v13 = vsub.f32 1.0, %v662_v61 }
 0x614   :  { %v687_v35 = vor.u32 1.1754944e-38, %v686_v28  ;;  %vm685_vm3 = vcmp.eq.f32.partialorder %v684_v33, 8.507059e+37  ;;  %v3601_v28 = vld [vmem:[%s3212_s24 + $0x30] sm:$0xff]  ;;  %v3613_v33 = vld [vmem:[%s3212_s24 + $0x28] sm:$0xff] }
 0x615   :  { %v664_v2 = vmul.f32 %v2833_v59, %v663_v13 }
 0x617   :  { %v665_v9 = vadd.f32 %v2833_v59, %v664_v2 }
 0x618   :  { %v2835_v11 = vpop.eup %2834 }
 0x619   :  { %v669_v16 = vsel %vm668_vm11, %v2833_v59, %v665_v9  ;;  %v676_v18 = vmul.f32 %v2835_v11, %v660_v14  ;;  %vm681_vm13 = vweird.f32 %v2835_v11  ;;  %v2792_v14 = vld [vmem:[%s4165_s0] ss:$0 sm:$0xff] }
 0x61a   :  { %v674_v21 = vsel %vm671_vm12, %v673_v12, %v669_v16  ;;  %vm682_vm15 = vmor %vm680_vm14, %vm681_vm13 }
 0x61b   :  { %v694_v22 = vmul.f32 %v692_v15, %v674_v21  ;;  %v677_v25 = vsub.f32 1.0, %v676_v18  ;;  %v3584_v18 = vld [vmem:[%s3192_s3 + $0x38] sm:$0xff] }
 0x61c   :  { %v3590_v21 = vld [vmem:[%s3212_s24 + $0x38] sm:$0xff]  ;;  %905 = vmatpush.msra.mxu0 %v3584_v18 }
 0x61d   :  { %v699_v30 = vadd.f32 %v2790_v17, %v694_v22  ;;  %v678_v32 = vmul.f32 %v2835_v11, %v677_v25  ;;  %v3595_v22 = vld [vmem:[%s3192_s3 + $0x30] sm:$0xff]  ;;  %971 = vmatpush.msrb.mxu2 %v3590_v21 }
 0x61e   :  { %v3598_v25 = vld [vmem:[%s3202_s14 + $0x30] sm:$0xff]  ;;  %906 = vmatpush.msra.mxu0 %v3595_v22 }
 0x61f   :  { %2625 = vmatmul.msk.f32.vlgmr.msra.gmra.mxu2 %vm261_vm1, %v699_v30  ;;  %v679_v34 = vadd.f32 %v2835_v11, %v678_v32  ;;  %v3605_v30 = vld [vmem:[%s3192_s3 + $0x28] sm:$0xff]  ;;  %939 = vmatpush.msrb.mxu1 %v3598_v25 }
 0x620   :  { %v3608_v32 = vld [vmem:[%s3202_s14 + $0x28] sm:$0xff]  ;;  %972 = vmatpush.msrb.mxu2 %v3601_v28  ;;  %907 = vmatpush.msra.mxu0 %v3605_v30 }
 0x621   :  { %v683_v37 = vsel %vm682_vm15, %v2835_v11, %v679_v34  ;;  %940 = vmatpush.msrb.mxu1 %v3608_v32 }
 0x622   :  { %v688_v38 = vsel %vm685_vm3, %v687_v35, %v683_v37  ;;  %v3617_v35 = vld [vmem:[%s3192_s3 + $0x20] sm:$0xff]  ;;  %973 = vmatpush.msrb.mxu2 %v3613_v33  ;;  %s4169_s3 = sld [smem:[#allocation30_spill]] }
 0x623   :  { %v695_v39 = vmul.f32 %v693_v36, %v688_v38  ;;  %v3620_v36 = vld [vmem:[%s3202_s14 + $0x20] sm:$0xff]  ;;  %908 = vmatpush.msra.mxu0 %v3617_v35  ;;  %s4170_s14 = sld [smem:[#allocation31_spill]] }
 0x624   :  { %v3626_v38 = vld [vmem:[%s3212_s24 + $0x20] sm:$0xff]  ;;  %941 = vmatpush.msrb.mxu1 %v3620_v36 }
 0x625   :  { %v700_v47 = vadd.f32 %v2790_v17, %v695_v39  ;;  %974 = vmatpush.msrb.mxu2 %v3626_v38 }
 0x627   :  { %2626 = vmatmul.msk.f32.gmra.mxu2 %vm261_vm1, %v700_v47 }
 0x6a2   :  { %v732_v53 = vpop.f32.mrf.mxu2 }
 0x6a3   :  { %v733_v26 = vadd.f32 %v2791_v31, %v732_v53 }
 0x6a5   :  { %v738_v55 = vmax.f32 %v733_v26, 0.0 }
 0x6a7   :  { %772 = vmatmul.f32.vlgmr.msrb.gmra.mxu3 %v738_v55 }
 0x6aa   :  { %v735_v56 = vpop.f32.mrf.mxu2 }
 0x6ab   :  { %v736_v58 = vadd.f32 %v2791_v31, %v735_v56 }
 0x6ad   :  { %v739_v59 = vmax.f32 %v736_v58, 0.0 }
 0x6af   :  { %775 = vmatmul.f32.gmra.mxu3 %v739_v59 }
 0x72a   :  { %v773_v61 = vpop.f32.mrf.mxu3 }
 0x72b   :  { %v779_v62 = vadd.f32 %v773_v61, %v3491_v54 }
 0x72d   :  { %v3560_v13 = vadd.f32 %v2792_v14, %v779_v62 }
 0x72f   :  { %v791_v63 = vsel %vm261_vm1, %v3560_v13, 0.0 }
 0x730   :  { %792 = vadd.xlane.f32.xlu2 %v791_v63 }
 0x732   :  { %v776_v0 = vpop.f32.mrf.mxu3 }
 0x733   :  { %v780_v1 = vadd.f32 %v776_v0, %v3496_v57 }
 0x735   :  { %v3565_v2 = vadd.f32 %v2792_v14, %v780_v1 }
 0x737   :  { %v794_v4 = vsel %vm265_vm2, %v3565_v2, 0.0 }
 0x738   :  { %795 = vadd.xlane.f32.xlu2 %v794_v4 }
 0x7a3   :  { %v793_v8 = vpop.xlane.xlu2 %792 }
 0x7a4   :  { %v797_v54 = vmul.f32 %v793_v8, %v3394_v23 }
 0x7a6   :  { %v3571_v9 = vsub.f32 %v3560_v13, %v797_v54 }
 0x7a8   :  { %v801_v57 = vmul.f32 %v3571_v9, %v3571_v9 }
 0x7aa   :  { %v803_v10 = vsel %vm261_vm1, %v801_v57, 0.0 }
 0x7ab   :  { %804 = vadd.xlane.f32.xlu2 %v803_v10  ;;  %v796_v11 = vpop.xlane.xlu2 %795 }
 0x7ac   :  { %v798_v12 = vmul.f32 %v796_v11, %v3394_v23 }
 0x7ae   :  { %v3578_v15 = vsub.f32 %v3565_v2, %v798_v12 }
 0x7b0   :  { %v802_v16 = vmul.f32 %v3578_v15, %v3578_v15 }
 0x7b2   :  { %v806_v17 = vsel %vm265_vm2, %v802_v16, 0.0 }
 0x7b3   :  { %807 = vadd.xlane.f32.xlu2 %v806_v17 }
 0x81e   :  { %v805_v34 = vpop.xlane.xlu2 %804 }
 0x81f   :  { %v809_v37 = vmul.f32 %v805_v34, %v3424_v44 }
 0x821   :  { %2836 = vrsqrt.f32 %v809_v37  ;;  %vm818_vm5 = vcmp.eq.f32.partialorder %v809_v37, inf  ;;  %v821_v63 = vand.u32 2147483648, %v809_v37  ;;  %vm820_vm6 = vcmp.eq.f32.partialorder %v809_v37, 0.0 }
 0x826   :  { %v808_v39 = vpop.xlane.xlu2 %807 }
 0x827   :  { %v2837_v47 = vpop.eup %2836  ;;  %v810_v31 = vmul.f32 %v808_v39, %v3424_v44 }
 0x828   :  { %v812_v53 = vmul.f32 %v2837_v47, %v809_v37 }
 0x829   :  { %2838 = vrsqrt.f32 %v810_v31  ;;  %vm830_vm7 = vcmp.eq.f32.partialorder %v810_v31, inf  ;;  %v833_v11 = vand.u32 2147483648, %v810_v31  ;;  %vm832_vm8 = vcmp.eq.f32.partialorder %v810_v31, 0.0 }
 0x82a   :  { %v813_v26 = vmul.f32 %v2837_v47, %v812_v53  ;;  %v2793_v53 = vld [vmem:[%s3182_s25 + $0x1] ss:$0 sm:$0xff] }
 0x82c   :  { %v814_v55 = vmul.f32 0.5, %v813_v26 }
 0x82e   :  { %v815_v56 = vsub.f32 1.5, %v814_v55 }
 0x82f   :  { %v2839_v58 = vpop.eup %2838 }
 0x830   :  { %v816_v59 = vmul.f32 %v2837_v47, %v815_v56  ;;  %v824_v14 = vmul.f32 %v2839_v58, %v810_v31 }
 0x832   :  { %v817_v61 = vmul.f32 %v816_v59, %v809_v37  ;;  %v825_v62 = vmul.f32 %v2839_v58, %v824_v14  ;;  %v868_v14 = vmul.f32 %v2793_v53, %v3571_v9 }
 0x834   :  { %v819_v0 = vsel %vm818_vm5, %v809_v37, %v817_v61  ;;  %v826_v1 = vmul.f32 0.5, %v825_v62  ;;  %v2794_v61 = vld [vmem:[%s3187_s29 + $0x1] ss:$0 sm:$0xff] }
 0x835   :  { %v822_v4 = vsel %vm820_vm6, %v821_v63, %v819_v0 }
 0x836   :  { %v835_v8 = vadd.f32 1e-06, %v822_v4  ;;  %v827_v54 = vsub.f32 1.5, %v826_v1 }
 0x838   :  { %2840 = vrcp.f32 %v835_v8  ;;  %v828_v57 = vmul.f32 %v2839_v58, %v827_v54  ;;  %v848_v37 = vand.u32 2147483648, %v835_v8  ;;  %v846_v55 = vand.u32 2147483647, %v835_v8 }
 0x839   :  { %vm842_vm10 = vweird.f32 %v835_v8 }
 0x83a   :  { %v829_v10 = vmul.f32 %v828_v57, %v810_v31  ;;  %v849_v59 = vor.u32 1.1754944e-38, %v848_v37  ;;  %vm847_vm12 = vcmp.eq.f32.partialorder %v846_v55, 8.507059e+37 }
 0x83c   :  { %v831_v12 = vsel %vm830_vm7, %v810_v31, %v829_v10 }
 0x83d   :  { %v834_v16 = vsel %vm832_vm8, %v833_v11, %v831_v12  ;;  %v869_v11 = vmul.f32 %v2793_v53, %v3578_v15  ;;  %v2797_v15 = vld [vmem:[%s3217_s30 + $0x1] ss:$0 sm:$0xff] }
 0x83e   :  { %v2841_v17 = vpop.eup %2840  ;;  %v836_v34 = vadd.f32 1e-06, %v834_v16 }
 0x83f   :  { %v838_v39 = vmul.f32 %v2841_v17, %v835_v8  ;;  %vm843_vm9 = vweird.f32 %v2841_v17 }
 0x840   :  { %2842 = vrcp.f32 %v836_v34  ;;  %vm844_vm11 = vmor %vm842_vm10, %vm843_vm9  ;;  %v862_v4 = vand.u32 2147483648, %v836_v34  ;;  %v860_v10 = vand.u32 2147483647, %v836_v34  ;;  %vm856_vm14 = vweird.f32 %v836_v34 }
 0x841   :  { %v839_v47 = vsub.f32 1.0, %v838_v39 }
 0x842   :  { %v863_v9 = vor.u32 1.1754944e-38, %v862_v4  ;;  %vm861_vm3 = vcmp.eq.f32.partialorder %v860_v10, 8.507059e+37  ;;  %v3654_v4 = vld [vmem:[%s4157_s17 + $0x30] sm:$0xff] }
 0x843   :  { %v840_v26 = vmul.f32 %v2841_v17, %v839_v47  ;;  %v2796_v47 = vld [vmem:[%s3207_s19 + $0x1] ss:$0 sm:$0xff] }
 0x845   :  { %v841_v56 = vadd.f32 %v2841_v17, %v840_v26 }
 0x846   :  { %v2843_v58 = vpop.eup %2842 }
 0x847   :  { %v845_v31 = vsel %vm844_vm11, %v2841_v17, %v841_v56  ;;  %v852_v62 = vmul.f32 %v2843_v58, %v836_v34  ;;  %vm857_vm13 = vweird.f32 %v2843_v58 }
 0x848   :  { %v850_v63 = vsel %vm847_vm12, %v849_v59, %v845_v31  ;;  %vm858_vm15 = vmor %vm856_vm14, %vm857_vm13 }
 0x849   :  { %v870_v0 = vmul.f32 %v868_v14, %v850_v63  ;;  %v853_v1 = vsub.f32 1.0, %v852_v62 }
 0x84b   :  { %v875_v54 = vadd.f32 %v2794_v61, %v870_v0  ;;  %v854_v57 = vmul.f32 %v2843_v58, %v853_v1  ;;  %v3651_v1 = vld [vmem:[%s4157_s17 + $0x38] sm:$0xff] }
 0x84c   :  { %1121 = vmatpush.msra.mxu1 %v3651_v1 }
 0x84d   :  { %2634 = vmatmul.msk.f32.vlgmr.msra.gmra.mxu0 %vm261_vm1, %v875_v54  ;;  %2641 = vmatmul.msk.f32.vlgmr.msrb.gmra.mxu1 %vm261_vm1, %v875_v54  ;;  %v855_v8 = vadd.f32 %v2843_v58, %v854_v57 }
 0x84e   :  { %2648 = vmatmul.msk.f32.vlgmr.msrb.gmra.mxu2 %vm261_vm1, %v875_v54  ;;  %1122 = vmatpush.msra.mxu1 %v3654_v4 }
 0x84f   :  { %v859_v12 = vsel %vm858_vm15, %v2843_v58, %v855_v8 }
 0x850   :  { %v864_v16 = vsel %vm861_vm3, %v863_v9, %v859_v12 }
 0x851   :  { %v871_v17 = vmul.f32 %v869_v11, %v864_v16  ;;  %v2795_v11 = vld [vmem:[%s4158_s8 + $0x1] ss:$0 sm:$0xff] }
 0x853   :  { %v876_v39 = vadd.f32 %v2794_v61, %v871_v17 }
 0x855   :  { %2635 = vmatmul.msk.f32.gmra.mxu0 %vm261_vm1, %v876_v39  ;;  %2642 = vmatmul.msk.f32.gmra.mxu1 %vm261_vm1, %v876_v39 }
 0x856   :  { %2649 = vmatmul.msk.f32.gmra.mxu2 %vm261_vm1, %v876_v39 }
 0x8ca   :  { %v943_v34 = vpop.f32.mrf.mxu1  ;;  %v910_v8 = vpop.f32.mrf.mxu0 }
 0x8cb   :  { %v944_v37 = vadd.f32 %v2796_v47, %v943_v34  ;;  %v911_v17 = vadd.f32 %v2795_v11, %v910_v8 }
 0x8cd   :  { %982 = vxpose.xlu0.b32.start [1/2] (short) (narrow) %v944_v37, 32 }
 0x8d1   :  { %v976_v26 = vpop.f32.mrf.mxu2 }
 0x8d2   :  { %v946_v55 = vpop.f32.mrf.mxu1  ;;  %v977_v59 = vadd.f32 %v2797_v15, %v976_v26 }
 0x8d3   :  { %v947_v56 = vadd.f32 %v2796_v47, %v946_v55 }
 0x8d5   :  { %983 = vxpose.xlu0.b32.end [2/2] (short) (narrow) %v947_v56, 32 }
 0x8d9   :  { %v979_v53 = vpop.f32.mrf.mxu2 }
 0x8da   :  { %v980_v58 = vadd.f32 %v2797_v15, %v979_v53 }
 0x8dc   :  { %2650 = vmatpush.msk.msra.mxu3 %vm257_vm0, %v980_v58  ;;  %v2900_v58 = vld [vmem:[#allocation3] sm:$0x1] }
 0x8de   :  { %1044 = vmatpush.msra.mxu3 %v977_v59 }
 0x971   :  { %v998_v14 = vpop.trf.xlu0 }
 0x972   :  { %2651 = vmatmul.msk.f32.vlgmr.msra.gmra.mxu3 %vm494_vm4, %v998_v14 }
 0x979   :  { %v999_v31 = vpop.trf.xlu0 }
 0x97a   :  { %2652 = vmatmul.msk.f32.gmra.mxu3 %vm494_vm4, %v999_v31 }
 0x981   :  { %v1000_v61 = vpop.trf.xlu0 }
 0x982   :  { %2653 = vmatmul.msk.f32.gmra.mxu3 %vm494_vm4, %v1000_v61 }
 0x989   :  { %v1001_v62 = vpop.trf.xlu0 }
 0x98a   :  { %2654 = vmatmul.msk.f32.gmra.mxu3 %vm494_vm4, %v1001_v62 }
 0x9f5   :  { %v1046_v63 = vpop.f32.mrf.mxu3 }
 0x9f6   :  { %v1058_v16 = vmul.f32 %v1046_v63, %v3479_v29  ;;  %v3674_v29 = vld [vmem:[%s4157_s17 + $0x20] sm:$0xff] }
 0x9fd   :  { %v1049_v0 = vpop.f32.mrf.mxu3 }
 0x9fe   :  { %v1059_v12 = vmul.f32 %v1049_v0, %v3475_v24  ;;  %v3670_v24 = vld [vmem:[%s4157_s17 + $0x28] sm:$0xff] }
 0x9ff   :  { %1123 = vmatpush.msra.mxu1 %v3670_v24 }
 0xa01   :  { %1124 = vmatpush.msra.mxu1 %v3674_v29 }
 0xa03   :  { %1498 = vmatpush.msrb.mxu1 %v3414_v41 }
 0xa05   :  { %v1052_v54 = vpop.f32.mrf.mxu3  ;;  %1499 = vmatpush.msrb.mxu1 %v3422_v43 }
 0xa06   :  { %v1060_v9 = vmul.f32 %v1052_v54, %v3472_v20 }
 0xa07   :  { %1500 = vmatpush.msrb.mxu1 %v3430_v46 }
 0xa09   :  { %1501 = vmatpush.msrb.mxu1 %v3438_v49  ;;  %v2798_v49 = vld [vmem:[%s4159_s18 + $0x1] ss:$0 sm:$0xff] }
 0xa0d   :  { %v1055_v57 = vpop.f32.mrf.mxu3 }
 0xa0e   :  { %v1061_v10 = vmul.f32 %v1055_v57, %v3470_v19  ;;  %v913_v19 = vpop.f32.mrf.mxu0 }
 0xa0f   :  { %v914_v20 = vadd.f32 %v2795_v11, %v913_v19 }
 0xa10   :  { %1080 = vmatpush.msrb.mxu0 %v1061_v10 }
 0xa12   :  { %1081 = vmatpush.msrb.mxu0 %v1060_v9 }
 0xa14   :  { %1082 = vmatpush.msrb.mxu0 %v1059_v12 }
 0xa16   :  { %1083 = vmatpush.msrb.mxu0 %v1058_v16 }
 0xa17   :  { %2655 = vmatmul.msk.f32.vlgmr.msrb.gmra.mxu0 %vm261_vm1, %v911_v17 }
 0xa18   :  { %1475 = vmatpush.msra.mxu0 %v3411_v40  ;;  %v2690_v40 = vld [vmem:[%s3157_s5 + $0x8] sm:$0xff]  ;;  %s4166_s5 = sld [smem:[#allocation27_spill]] }
 0xa19   :  { %1368 = vperm.xlu1 %2782, %v2690_v40   ;;  %1363 = vperm.xlu2 %2781, %v2690_v40  }
 0xa1a   :  { %1476 = vmatpush.msra.mxu0 %v3417_v42 }
 0xa1c   :  { %1477 = vmatpush.msra.mxu0 %v3427_v45 }
 0xa1e   :  { %1478 = vmatpush.msra.mxu0 %v3435_v48 }
 0xa1f   :  { %2656 = vmatmul.msk.f32.gmra.mxu0 %vm261_vm1, %v914_v20 }
 0xa73   :  { %v1364_v41 = vpop.permute.xlu2 %1363 }
 0xa74   :  { %v1366_v46 = vmul.f32 %v1364_v41, %v245_v6  ;;  %v3735_v41 = vld [vmem:[%s4160_s22 + $0x38] sm:$0xff] }
 0xa75   :  { %1252 = vmatpush.msra.mxu2 %v3735_v41 }
 0xa8b   :  { %v1369_v47 = vpop.permute.xlu1 %1368 }
 0xa8c   :  { %v1371_v43 = vmul.f32 %v1369_v47, %v251_v7 }
 0xa8e   :  { %v1372_v37 = vadd.f32 %v1371_v43, %v1366_v46 }
 0xa90   :  { %v3692_v56 = vrot.slane %v1372_v37, 7 }
 0xa92   :  { %v3698_v7 = vsel %vm257_vm0, %v2900_v58, %v3692_v56  ;;  %v1380_v14 = vsel %vm265_vm2, %v3692_v56, 0.0 }
 0xa93   :  { %v1377_v59 = vsel %vm261_vm1, %v3698_v7, 0.0 }
 0xa94   :  { %v1085_v42 = vpop.f32.mrf.mxu0 }
 0xa95   :  { %v1091_v45 = vmul.f32 0.35355338, %v1085_v42 }
 0xa97   :  { %2662 = vmatmul.msk.f32.vlgmr.msra.gmra.mxu1 %vm261_vm1, %v1091_v45 }
 0xa9c   :  { %v1088_v48 = vpop.f32.mrf.mxu0 }
 0xa9d   :  { %v1092_v39 = vmul.f32 0.35355338, %v1088_v48 }
 0xa9f   :  { %2663 = vmatmul.msk.f32.gmra.mxu1 %vm261_vm1, %v1092_v39 }
 0xb14   :  { %v1126_v34 = vpop.f32.mrf.mxu1 }
 0xb15   :  { %v1127_v26 = vadd.f32 %v2798_v49, %v1126_v34  ;;  %v3740_v34 = vld [vmem:[%s4160_s22 + $0x30] sm:$0xff] }
 0xb16   :  { %1253 = vmatpush.msra.mxu2 %v3740_v34 }
 0xb17   :  { %v3690_v55 = vadd.f32 %v1127_v26, %v3560_v13  ;;  %v3744_v26 = vld [vmem:[%s4160_s22 + $0x28] sm:$0xff] }
 0xb18   :  { %1254 = vmatpush.msra.mxu2 %v3744_v26 }
 0xb19   :  { %v1138_v15 = vsel %vm261_vm1, %v3690_v55, 0.0 }
 0xb1a   :  { %1139 = vadd.xlane.f32.xlu2 %v1138_v15  ;;  %v3747_v15 = vld [vmem:[%s4160_s22 + $0x20] sm:$0xff] }
 0xb1b   :  { %1255 = vmatpush.msra.mxu2 %v3747_v15 }
 0xb1c   :  { %v1129_v53 = vpop.f32.mrf.mxu1 }
 0xb1d   :  { %v1130_v5 = vadd.f32 %v2798_v49, %v1129_v53 }
 0xb1f   :  { %v1133_v6 = vadd.f32 %v1130_v5, %v3565_v2 }
 0xb21   :  { %v1141_v13 = vsel %vm265_vm2, %v1133_v6, 0.0 }
 0xb22   :  { %1142 = vadd.xlane.f32.xlu0 %v1141_v13  ;;  %1378 = vadd.xlane.f32.xlu2 %v1377_v59 }
 0xb2a   :  { %1381 = vadd.xlane.f32.xlu2 %v1380_v14 }
 0xb8d   :  { %v1140_v31 = vpop.xlane.xlu2 %1139 }
 0xb8e   :  { %v1144_v61 = vmul.f32 %v1140_v31, %v3394_v23 }
 0xb90   :  { %v3708_v62 = vsub.f32 %v3690_v55, %v1144_v61  ;;  %v2902_v61 = vld [vmem:[%s3212_s24 + $0x10] sm:$0xff] }
 0xb92   :  { %v1148_v2 = vmul.f32 %v3708_v62, %v3708_v62 }
 0xb94   :  { %v1150_v63 = vsel %vm261_vm1, %v1148_v2, 0.0 }
 0xb95   :  { %v1143_v0 = vpop.xlane.xlu0 %1142  ;;  %1151 = vadd.xlane.f32.xlu2 %v1150_v63  ;;  %v1379_v54 = vpop.xlane.xlu2 %1378 }
 0xb96   :  { %v1145_v57 = vmul.f32 %v1143_v0, %v3394_v23  ;;  %v1383_v8 = vmul.f32 %v1379_v54, %v3394_v23  ;;  %v2903_v0 = vld [vmem:[%s3212_s24 + $0x8] sm:$0xff] }
 0xb98   :  { %v3714_v10 = vsub.f32 %v1133_v6, %v1145_v57  ;;  %v3720_v11 = vsub.f32 %v3698_v7, %v1383_v8  ;;  %v2901_v6 = vld [vmem:[%s3212_s24 + $0x18] sm:$0xff] }
 0xb99   :  { %1521 = vmatpush.msrb.mxu2 %v2901_v6 }
 0xb9a   :  { %v1149_v9 = vmul.f32 %v3714_v10, %v3714_v10  ;;  %v1387_v19 = vmul.f32 %v3720_v11, %v3720_v11 }
 0xb9b   :  { %1522 = vmatpush.msrb.mxu2 %v2902_v61 }
 0xb9c   :  { %v1153_v12 = vsel %vm265_vm2, %v1149_v9, 0.0  ;;  %v1389_v40 = vsel %vm261_vm1, %v1387_v19, 0.0  ;;  %v2904_v9 = vld [vmem:[%s3212_s24] sm:$0xff]  ;;  %s4172_s24 = sld [smem:[#allocation33_spill]] }
 0xb9d   :  { %1154 = vadd.xlane.f32.xlu2 %v1153_v12  ;;  %v1382_v16 = vpop.xlane.xlu2 %1381  ;;  %1523 = vmatpush.msrb.mxu2 %v2903_v0 }
 0xb9e   :  { %v1384_v17 = vmul.f32 %v1382_v16, %v3394_v23 }
 0xb9f   :  { %1524 = vmatpush.msrb.mxu2 %v2904_v9 }
 0xba0   :  { %v3727_v20 = vsub.f32 %v3692_v56, %v1384_v17 }
 0xba2   :  { %v1388_v42 = vmul.f32 %v3727_v20, %v3727_v20 }
 0xba4   :  { %v1392_v45 = vsel %vm265_vm2, %v1388_v42, 0.0 }
 0xba5   :  { %1390 = vadd.xlane.f32.xlu2 %v1389_v40 }
 0xbad   :  { %1393 = vadd.xlane.f32.xlu2 %v1392_v45 }
 0xc08   :  { %v1152_v48 = vpop.xlane.xlu2 %1151 }
 0xc09   :  { %v1156_v39 = vmul.f32 %v1152_v48, %v3424_v44 }
 0xc0b   :  { %2844 = vrsqrt.f32 %v1156_v39  ;;  %vm1165_vm5 = vcmp.eq.f32.partialorder %v1156_v39, inf  ;;  %v1168_v54 = vand.u32 2147483648, %v1156_v39  ;;  %vm1167_vm6 = vcmp.eq.f32.partialorder %v1156_v39, 0.0 }
 0xc10   :  { %v1155_v47 = vpop.xlane.xlu2 %1154 }
 0xc11   :  { %v2845_v43 = vpop.eup %2844  ;;  %v1157_v46 = vmul.f32 %v1155_v47, %v3424_v44 }
 0xc12   :  { %v1159_v49 = vmul.f32 %v2845_v43, %v1156_v39 }
 0xc13   :  { %2846 = vrsqrt.f32 %v1157_v46  ;;  %vm1177_vm7 = vcmp.eq.f32.partialorder %v1157_v46, inf  ;;  %vm1179_vm8 = vcmp.eq.f32.partialorder %v1157_v46, 0.0 }
 0xc14   :  { %v1160_v37 = vmul.f32 %v2845_v43, %v1159_v49 }
 0xc16   :  { %v1161_v53 = vmul.f32 0.5, %v1160_v37 }
 0xc18   :  { %v1162_v58 = vsub.f32 1.5, %v1161_v53  ;;  %v1391_v5 = vpop.xlane.xlu2 %1390 }
 0xc19   :  { %v2847_v59 = vpop.eup %2846  ;;  %v1395_v13 = vmul.f32 %v1391_v5, %v3424_v44 }
 0xc1a   :  { %v1163_v14 = vmul.f32 %v2845_v43, %v1162_v58  ;;  %v1171_v31 = vmul.f32 %v2847_v59, %v1157_v46 }
 0xc1b   :  { %2848 = vrsqrt.f32 %v1395_v13  ;;  %vm1404_vm9 = vcmp.eq.f32.partialorder %v1395_v13, inf  ;;  %vm1406_vm11 = vcmp.eq.f32.partialorder %v1395_v13, 0.0 }
 0xc1c   :  { %v1164_v2 = vmul.f32 %v1163_v14, %v1156_v39  ;;  %v1172_v63 = vmul.f32 %v2847_v59, %v1171_v31 }
 0xc1e   :  { %v1166_v57 = vsel %vm1165_vm5, %v1156_v39, %v1164_v2  ;;  %v1173_v8 = vmul.f32 0.5, %v1172_v63  ;;  %v1180_v39 = vand.u32 2147483648, %v1157_v46 }
 0xc1f   :  { %v1169_v12 = vsel %vm1167_vm6, %v1168_v54, %v1166_v57  ;;  %v2799_v57 = vld [vmem:[%s4162_s11 + $0x1] ss:$0 sm:$0xff] }
 0xc20   :  { %v1182_v16 = vadd.f32 1e-06, %v1169_v12  ;;  %v1174_v17 = vsub.f32 1.5, %v1173_v8  ;;  %v1394_v19 = vpop.xlane.xlu2 %1393 }
 0xc21   :  { %v2849_v40 = vpop.eup %2848  ;;  %v3757_v42 = vmul.f32 %v1394_v19, %v3424_v44 }
 0xc22   :  { %2850 = vrcp.f32 %v1182_v16  ;;  %v1175_v45 = vmul.f32 %v2847_v59, %v1174_v17  ;;  %v1398_v48 = vmul.f32 %v2849_v40, %v1395_v13  ;;  %v1195_v54 = vand.u32 2147483648, %v1182_v16 }
 0xc23   :  { %2852 = vrsqrt.f32 %v3757_v42  ;;  %v1193_v9 = vand.u32 2147483647, %v1182_v16  ;;  %vm1189_vm12 = vweird.f32 %v1182_v16  ;;  %vm1416_vm15 = vcmp.eq.f32.partialorder %v3757_v42, inf }
 0xc24   :  { %v1176_v47 = vmul.f32 %v1175_v45, %v1157_v46  ;;  %v1399_v43 = vmul.f32 %v2849_v40, %v1398_v48  ;;  %vm1418_vm5 = vcmp.eq.f32.partialorder %v3757_v42, 0.0 }
 0xc25   :  { %vm1194_vm14 = vcmp.eq.f32.partialorder %v1193_v9, 8.507059e+37  ;;  %v3797_v9 = vld [vmem:[%s4161_s7 + $0xd8] sm:$0xff] }
 0xc26   :  { %v1400_v49 = vmul.f32 0.5, %v1399_v43  ;;  %v1178_v37 = vsel %vm1177_vm7, %v1157_v46, %v1176_v47  ;;  %v1407_v46 = vand.u32 2147483648, %v1395_v13  ;;  %v1196_v43 = vor.u32 1.1754944e-38, %v1195_v54 }
 0xc27   :  { %v1181_v53 = vsel %vm1179_vm8, %v1180_v39, %v1178_v37  ;;  %v3768_v39 = vld [vmem:[%s4161_s7 + $0xf8] sm:$0xff]  ;;  %v1215_v37 = vmul.f32 %v2799_v57, %v3708_v62 }
 0xc28   :  { %v2851_v58 = vpop.eup %2850  ;;  %v1401_v5 = vsub.f32 1.5, %v1400_v49  ;;  %v3760_v6 = vadd.f32 1e-06, %v1181_v53  ;;  %v3771_v49 = vld [vmem:[%s4161_s7 + $0xf0] sm:$0xff]  ;;  %1282 = vmatpush.msrb.mxu3 %v3768_v39 }
 0xc29   :  { %v2853_v14 = vpop.eup %2852  ;;  %v1185_v31 = vmul.f32 %v2851_v58, %v1182_v16  ;;  %vm1190_vm10 = vweird.f32 %v2851_v58 }
 0xc2a   :  { %v1402_v61 = vmul.f32 %v2849_v40, %v1401_v5  ;;  %v1410_v59 = vmul.f32 %v2853_v14, %v3757_v42  ;;  %2854 = vrcp.f32 %v3760_v6  ;;  %vm1191_vm13 = vmor %vm1189_vm12, %vm1190_vm10  ;;  %1283 = vmatpush.msrb.mxu3 %v3771_v49  ;;  %vm1203_vm6 = vweird.f32 %v3760_v6 }
 0xc2b   :  { %v1186_v2 = vsub.f32 1.0, %v1185_v31 }
 0xc2c   :  { %v1403_v63 = vmul.f32 %v1402_v61, %v1395_v13  ;;  %v1411_v0 = vmul.f32 %v2853_v14, %v1410_v59  ;;  %v3781_v61 = vld [vmem:[%s4161_s7 + $0xe8] sm:$0xff] }
 0xc2d   :  { %v1187_v8 = vmul.f32 %v2851_v58, %v1186_v2  ;;  %1284 = vmatpush.msrb.mxu3 %v3781_v61 }
 0xc2e   :  { %v1405_v12 = vsel %vm1404_vm9, %v1395_v13, %v1403_v63  ;;  %v1412_v17 = vmul.f32 0.5, %v1411_v0  ;;  %v3775_v13 = vld [vmem:[%s4163_s16 + $0x1] ss:$0 sm:$0xff]  ;;  %v1209_v63 = vand.u32 2147483648, %v3760_v6 }
 0xc2f   :  { %v1408_v19 = vsel %vm1406_vm11, %v1407_v46, %v1405_v12  ;;  %v1188_v40 = vadd.f32 %v2851_v58, %v1187_v8  ;;  %v3789_v0 = vld [vmem:[%s4161_s7 + $0xe0] sm:$0xff]  ;;  %v1207_v46 = vand.u32 2147483647, %v3760_v6 }
 0xc30   :  { %v2855_v45 = vpop.eup %2854  ;;  %v3765_v48 = vadd.f32 1e-06, %v1408_v19  ;;  %v1413_v47 = vsub.f32 1.5, %v1412_v17  ;;  %1285 = vmatpush.msrb.mxu3 %v3789_v0 }
 0xc31   :  { %v1192_v53 = vsel %vm1191_vm13, %v2851_v58, %v1188_v40  ;;  %v1199_v16 = vmul.f32 %v2855_v45, %v3760_v6  ;;  %v1419_v58 = vand.u32 2147483648, %v3757_v42  ;;  %vm1204_vm3 = vweird.f32 %v2855_v45 }
 0xc32   :  { %2856 = vrcp.f32 %v3765_v48  ;;  %v1414_v5 = vmul.f32 %v2853_v14, %v1413_v47  ;;  %v1197_v31 = vsel %vm1194_vm14, %v1196_v43, %v1192_v53  ;;  %vm1205_vm7 = vmor %vm1203_vm6, %vm1204_vm3  ;;  %v1210_v40 = vor.u32 1.1754944e-38, %v1209_v63  ;;  %v3805_v43 = vld [vmem:[%s4161_s7 + $0xd0] sm:$0xff]  ;;  %1286 = vmatpush.msrb.mxu3 %v3797_v9 }
 0xc33   :  { %v1217_v59 = vmul.f32 %v1215_v37, %v1197_v31  ;;  %v1200_v2 = vsub.f32 1.0, %v1199_v16  ;;  %v1216_v37 = vmul.f32 %v2799_v57, %v3714_v10  ;;  %vm1208_vm8 = vcmp.eq.f32.partialorder %v1207_v46, 8.507059e+37  ;;  %v2906_v31 = vld [vmem:[%s4157_s17 + $0x10] sm:$0xff]  ;;  %v3819_v57 = vld [vmem:[%s4161_s7 + $0xc0] sm:$0xff] }
 0xc34   :  { %v1415_v62 = vmul.f32 %v1414_v5, %v3757_v42  ;;  %v3813_v5 = vld [vmem:[%s4161_s7 + $0xc8] sm:$0xff]  ;;  %1287 = vmatpush.msrb.mxu3 %v3805_v43  ;;  %v1434_v10 = vand.u32 2147483648, %v3765_v48  ;;  %v1432_v63 = vand.u32 2147483647, %v3765_v48  ;;  %vm1428_vm10 = vweird.f32 %v3765_v48 }
 0xc35   :  { %v1222_v14 = vadd.f32 %v3775_v13, %v1217_v59  ;;  %v1201_v54 = vmul.f32 %v2855_v45, %v1200_v2 }
 0xc36   :  { %v1417_v8 = vsel %vm1416_vm15, %v3757_v42, %v1415_v62  ;;  %v2905_v42 = vld [vmem:[%s4157_s17 + $0x18] sm:$0xff]  ;;  %1288 = vmatpush.msrb.mxu3 %v3813_v5  ;;  %vm1433_vm12 = vcmp.eq.f32.partialorder %v1432_v63, 8.507059e+37 }
 0xc37   :  { %2671 = vmatmul.msk.f32.vlgmr.msra.gmra.mxu2 %vm261_vm1, %v1222_v14  ;;  %v1202_v12 = vadd.f32 %v2855_v45, %v1201_v54  ;;  %v1420_v17 = vsel %vm1418_vm5, %v1419_v58, %v1417_v8  ;;  %v3826_v14 = vld [vmem:[%s4161_s7 + $0xb8] sm:$0xff]  ;;  %v2908_v54 = vld [vmem:[%s4157_s17] sm:$0xff] }
 0xc38   :  { %v2857_v19 = vpop.eup %2856  ;;  %v3802_v47 = vadd.f32 1e-06, %v1420_v17  ;;  %1661 = vmatpush.msra.mxu2 %v2905_v42  ;;  %1289 = vmatpush.msrb.mxu3 %v3819_v57  ;;  %v3833_v17 = vld [vmem:[%s4161_s7 + $0xb0] sm:$0xff] }
 0xc39   :  { %v1206_v53 = vsel %vm1205_vm7, %v2855_v45, %v1202_v12  ;;  %v1424_v6 = vmul.f32 %v2857_v19, %v3765_v48  ;;  %v2907_v45 = vld [vmem:[%s4157_s17 + $0x8] sm:$0xff]  ;;  %vm1429_vm9 = vweird.f32 %v2857_v19  ;;  %v1435_v12 = vor.u32 1.1754944e-38, %v1434_v10 }
 0xc3a   :  { %v1211_v16 = vsel %vm1208_vm8, %v1210_v40, %v1206_v53  ;;  %2858 = vrcp.f32 %v3802_v47  ;;  %1662 = vmatpush.msra.mxu2 %v2906_v31  ;;  %vm1430_vm11 = vmor %vm1428_vm10, %vm1429_vm9  ;;  %v2909_v40 = vld [vmem:[%s3182_s25] ss:$0 sm:$0xff]  ;;  %1290 = vmatpush.msrb.mxu3 %v3826_v14  ;;  %v3840_v48 = vld [vmem:[%s4161_s7 + $0xa8] sm:$0xff]  ;;  %vm1442_vm14 = vweird.f32 %v3802_v47 }
 0xc3b   :  { %v1218_v59 = vmul.f32 %v1216_v37, %v1211_v16  ;;  %v1425_v2 = vsub.f32 1.0, %v1424_v6  ;;  %v1451_v42 = vmul.f32 %v2909_v40, %v3720_v11 }
 0xc3c   :  { %1663 = vmatpush.msra.mxu2 %v2907_v45  ;;  %1291 = vmatpush.msrb.mxu3 %v3833_v17  ;;  %v3848_v45 = vld [vmem:[%s4161_s7 + $0xa0] sm:$0xff] }
 0xc3d   :  { %v1223_v62 = vadd.f32 %v3775_v13, %v1218_v59  ;;  %v1426_v58 = vmul.f32 %v2857_v19, %v1425_v2  ;;  %v1448_v59 = vand.u32 2147483648, %v3802_v47  ;;  %v2910_v2 = vld [vmem:[%s3187_s29] ss:$0 sm:$0xff] }
 0xc3e   :  { %1664 = vmatpush.msra.mxu2 %v2908_v54  ;;  %1292 = vmatpush.msrb.mxu3 %v3840_v48  ;;  %v1452_v54 = vmul.f32 %v2909_v40, %v3727_v20  ;;  %v3872_v20 = vld [vmem:[%s4161_s7 + $0x88] sm:$0xff] }
 0xc3f   :  { %2672 = vmatmul.msk.f32.gmra.mxu2 %vm261_vm1, %v1223_v62  ;;  %v1427_v46 = vadd.f32 %v2857_v19, %v1426_v58  ;;  %v3854_v58 = vld [vmem:[%s4161_s7 + $0x98] sm:$0xff]  ;;  %v1449_v63 = vor.u32 1.1754944e-38, %v1448_v59  ;;  %v2913_v40 = vld [vmem:[%s4160_s22 + $0x8] sm:$0xff] }
 0xc40   :  { %v2859_v8 = vpop.eup %2858  ;;  %1293 = vmatpush.msrb.mxu3 %v3848_v45 }
 0xc41   :  { %v1431_v37 = vsel %vm1430_vm11, %v2857_v19, %v1427_v46  ;;  %v1438_v53 = vmul.f32 %v2859_v8, %v3802_v47  ;;  %vm1443_vm13 = vweird.f32 %v2859_v8  ;;  %v1446_v19 = vand.u32 2147483647, %v3802_v47 }
 0xc42   :  { %v1436_v6 = vsel %vm1433_vm12, %v1435_v12, %v1431_v37  ;;  %vm1444_vm15 = vmor %vm1442_vm14, %vm1443_vm13  ;;  %1294 = vmatpush.msrb.mxu3 %v3854_v58  ;;  %v3884_v37 = vld [vmem:[%s4164_s12 + $0x1] ss:$0 sm:$0xff] }
 0xc43   :  { %v1453_v16 = vmul.f32 %v1451_v42, %v1436_v6  ;;  %v1439_v31 = vsub.f32 1.0, %v1438_v53  ;;  %vm1447_vm3 = vcmp.eq.f32.partialorder %v1446_v19, 8.507059e+37 }
 0xc45   :  { %v1455_v10 = vadd.f32 %v2910_v2, %v1453_v16  ;;  %v1440_v11 = vmul.f32 %v2859_v8, %v1439_v31 }
 0xc47   :  { %2691 = vmatmul.msk.f32.vlgmr.msra.gmra.mxu0 %vm261_vm1, %v1455_v10  ;;  %2693 = vmatmul.msk.f32.vlgmr.msrb.gmra.mxu1 %vm261_vm1, %v1455_v10  ;;  %v1441_v62 = vadd.f32 %v2859_v8, %v1440_v11  ;;  %v2915_v11 = vld [vmem:[%s3207_s19] ss:$0 sm:$0xff] }
 0xc48   :  { %2695 = vmatmul.msk.f32.vlgmr.msrb.gmra.mxu2 %vm261_vm1, %v1455_v10 }
 0xc49   :  { %v1445_v46 = vsel %vm1444_vm15, %v2859_v8, %v1441_v62  ;;  %1933 = vmatpush.msrb.mxu2 %v3587_v3  ;;  %v3868_v3 = vld [vmem:[%s4161_s7 + $0x90] sm:$0xff] }
 0xc4a   :  { %v1450_v12 = vsel %vm1447_vm3, %v1449_v63, %v1445_v46  ;;  %1295 = vmatpush.msrb.mxu3 %v3868_v3  ;;  %v2912_v8 = vld [vmem:[%s4160_s22 + $0x10] sm:$0xff] }
 0xc4b   :  { %v1454_v47 = vmul.f32 %v1452_v54, %v1450_v12  ;;  %1934 = vmatpush.msrb.mxu2 %v3598_v25  ;;  %v3875_v25 = vld [vmem:[%s4161_s7 + $0x80] sm:$0xff]  ;;  %v2918_v12 = vld [vmem:[%s4161_s7 + $0x70] sm:$0xff] }
 0xc4c   :  { %1296 = vmatpush.msrb.mxu3 %v3872_v20  ;;  %v2916_v54 = vld [vmem:[%s3217_s30] ss:$0 sm:$0xff] }
 0xc4d   :  { %v1456_v42 = vadd.f32 %v2910_v2, %v1454_v47  ;;  %1935 = vmatpush.msrb.mxu2 %v3608_v32  ;;  %v2911_v32 = vld [vmem:[%s4160_s22 + $0x18] sm:$0xff]  ;;  %v2919_v47 = vld [vmem:[%s4161_s7 + $0x68] sm:$0xff] }
 0xc4e   :  { %1297 = vmatpush.msrb.mxu3 %v3875_v25 }
 0xc4f   :  { %2692 = vmatmul.msk.f32.gmra.mxu0 %vm261_vm1, %v1456_v42  ;;  %2694 = vmatmul.msk.f32.gmra.mxu1 %vm261_vm1, %v1456_v42 }
 0xc50   :  { %2696 = vmatmul.msk.f32.gmra.mxu2 %vm261_vm1, %v1456_v42  ;;  %1772 = vmatpush.msra.mxu3 %v2911_v32  ;;  %v2920_v42 = vld [vmem:[%s4161_s7 + $0x60] sm:$0xff]  ;;  %v2921_v32 = vld [vmem:[%s4161_s7 + $0x58] sm:$0xff] }
 0xc51   :  { %1936 = vmatpush.msrb.mxu2 %v3620_v36  ;;  %v2914_v36 = vld [vmem:[%s4160_s22] sm:$0xff] }
 0xc52   :  { %1773 = vmatpush.msra.mxu3 %v2912_v8  ;;  %v2922_v8 = vld [vmem:[%s4161_s7 + $0x50] sm:$0xff] }
 0xc54   :  { %1774 = vmatpush.msra.mxu3 %v2913_v40  ;;  %v2923_v40 = vld [vmem:[%s4161_s7 + $0x48] sm:$0xff] }
 0xc56   :  { %1775 = vmatpush.msra.mxu3 %v2914_v36  ;;  %v2924_v36 = vld [vmem:[%s4161_s7 + $0x40] sm:$0xff] }
 0xcba   :  { %v1257_v53 = vpop.f32.mrf.mxu2 }
 0xcbb   :  { %v1258_v6 = vadd.f32 %v3884_v37, %v1257_v53  ;;  %v2925_v53 = vld [vmem:[%s4161_s7 + $0x38] sm:$0xff] }
 0xcbd   :  { %v1263_v16 = vmax.f32 %v1258_v6, 0.0  ;;  %v2926_v6 = vld [vmem:[%s4161_s7 + $0x30] sm:$0xff] }
 0xcbf   :  { %1298 = vmatmul.f32.vlgmr.msrb.gmra.mxu3 %v1263_v16  ;;  %v2927_v16 = vld [vmem:[%s4161_s7 + $0x28] sm:$0xff] }
 0xcc0   :  { %1956 = vmatpush.msrb.mxu3 %v3590_v21 }
 0xcc2   :  { %v1260_v31 = vpop.f32.mrf.mxu2  ;;  %1957 = vmatpush.msrb.mxu3 %v3601_v28 }
 0xcc3   :  { %v1261_v59 = vadd.f32 %v3884_v37, %v1260_v31 }
 0xcc4   :  { %v1503_v2 = vpop.f32.mrf.mxu1  ;;  %1958 = vmatpush.msrb.mxu3 %v3613_v33 }
 0xcc5   :  { %v1264_v10 = vmax.f32 %v1261_v59, 0.0  ;;  %v1504_v19 = vadd.f32 %v2915_v11, %v1503_v2 }
 0xcc6   :  { %1959 = vmatpush.msrb.mxu3 %v3626_v38  ;;  %v2917_v38 = vld [vmem:[%s4161_s7 + $0x78] sm:$0xff] }
 0xcc7   :  { %1301 = vmatmul.f32.gmra.mxu3 %v1264_v10  ;;  %1532 = vxpose.xlu2.b32.start [1/2] (short) (narrow) %v1504_v19, 32  ;;  %v3921_v19 = vld [vmem:[#allocation6 + $0x18] sm:$0xff] }
 0xccb   :  { %v1526_v21 = vpop.f32.mrf.mxu2 }
 0xccc   :  { %v1506_v62 = vpop.f32.mrf.mxu1  ;;  %v1527_v46 = vadd.f32 %v2916_v54, %v1526_v21 }
 0xccd   :  { %v1507_v63 = vadd.f32 %v2915_v11, %v1506_v62  ;;  %v3927_v62 = vld [vmem:[#allocation6 + $0x8] sm:$0xff] }
 0xccf   :  { %1533 = vxpose.xlu2.b32.end [2/2] (short) (narrow) %v1507_v63, 32 }
 0xcd3   :  { %v1529_v28 = vpop.f32.mrf.mxu2 }
 0xcd4   :  { %v1530_v33 = vadd.f32 %v2916_v54, %v1529_v28  ;;  %v3930_v28 = vld [vmem:[#allocation6] sm:$0xff] }
 0xcd6   :  { %2697 = vmatpush.msk.msrb.mxu0 %vm257_vm0, %v1530_v33  ;;  %v2932_v33 = vld [vmem:[%s4158_s8] ss:$0 sm:$0xff] }
 0xcd8   :  { %1594 = vmatpush.msrb.mxu0 %v1527_v46 }
 0xcda   :  { %1785 = vmatpush.msra.mxu0 %v2917_v38 }
 0xcdc   :  { %1786 = vmatpush.msra.mxu0 %v2918_v12 }
 0xcde   :  { %1787 = vmatpush.msra.mxu0 %v2919_v47 }
 0xce0   :  { %1788 = vmatpush.msra.mxu0 %v2920_v42 }
 0xce2   :  { %1789 = vmatpush.msra.mxu0 %v2921_v32 }
 0xce4   :  { %1790 = vmatpush.msra.mxu0 %v2922_v8 }
 0xce6   :  { %1791 = vmatpush.msra.mxu0 %v2923_v40  ;;  %v2933_v40 = vld [vmem:[%s4159_s18] ss:$0 sm:$0xff] }
 0xce8   :  { %1792 = vmatpush.msra.mxu0 %v2924_v36 }
 0xcea   :  { %1793 = vmatpush.msra.mxu0 %v2925_v53 }
 0xcec   :  { %1794 = vmatpush.msra.mxu0 %v2926_v6 }
 0xcee   :  { %1795 = vmatpush.msra.mxu0 %v2927_v16 }
 0xcf0   :  { %1796 = vmatpush.msra.mxu0 %v3535_v27 }
 0xcf2   :  { %1797 = vmatpush.msra.mxu0 %v3538_v60 }
 0xcf4   :  { %1798 = vmatpush.msra.mxu0 %v3546_v50 }
 0xcf6   :  { %1799 = vmatpush.msra.mxu0 %v3550_v51  ;;  %v1480_v51 = vpop.f32.mrf.mxu0 }
 0xcf7   :  { %v1481_v46 = vadd.f32 %v2932_v33, %v1480_v51 }
 0xcf8   :  { %1800 = vmatpush.msra.mxu0 %v3554_v52 }
 0xcfe   :  { %v1483_v52 = vpop.f32.mrf.mxu0 }
 0xcff   :  { %v1484_v38 = vadd.f32 %v2932_v33, %v1483_v52 }
 0xd42   :  { %v3911_v31 = vpop.f32.mrf.mxu3 }
 0xd4a   :  { %v1302_v59 = vpop.f32.mrf.mxu3 }
 0xd60   :  { %v1548_v2 = vpop.trf.xlu2 }
 0xd61   :  { %2698 = vmatmul.msk.f32.vlgmr.msrb.gmra.mxu0 %vm494_vm4, %v1548_v2 }
 0xd62   :  { %2207 = vmatpush.msrb.mxu0 %v3735_v41 }
 0xd64   :  { %2208 = vmatpush.msrb.mxu0 %v3740_v34 }
 0xd66   :  { %2209 = vmatpush.msrb.mxu0 %v3744_v26 }
 0xd68   :  { %v1549_v27 = vpop.trf.xlu2  ;;  %2210 = vmatpush.msrb.mxu0 %v3747_v15  ;;  %v3924_v15 = vld [vmem:[#allocation6 + $0x10] sm:$0xff] }
 0xd69   :  { %2699 = vmatmul.msk.f32.gmra.mxu0 %vm494_vm4, %v1549_v27 }
 0xd70   :  { %v1550_v60 = vpop.trf.xlu2 }
 0xd71   :  { %2700 = vmatmul.msk.f32.gmra.mxu0 %vm494_vm4, %v1550_v60 }
 0xd78   :  { %v1551_v50 = vpop.trf.xlu2 }
 0xd79   :  { %2701 = vmatmul.msk.f32.gmra.mxu0 %vm494_vm4, %v1551_v50 }
 0xdde   :  { %v1596_v10 = vpop.f32.mrf.mxu0 }
 0xddf   :  { %v1608_v54 = vmul.f32 %v3930_v28, %v1596_v10 }
 0xde6   :  { %v1599_v41 = vpop.f32.mrf.mxu0 }
 0xde7   :  { %v1609_v63 = vmul.f32 %v3927_v62, %v1599_v41 }
 0xdee   :  { %v1602_v11 = vpop.f32.mrf.mxu0 }
 0xdef   :  { %v1610_v21 = vmul.f32 %v3924_v15, %v1602_v11 }
 0xdf6   :  { %v1605_v34 = vpop.f32.mrf.mxu0 }
 0xdf7   :  { %v1611_v26 = vmul.f32 %v3921_v19, %v1605_v34 }
 0xdf9   :  { %1630 = vmatpush.msra.mxu1 %v1611_v26 }
 0xdfb   :  { %1631 = vmatpush.msra.mxu1 %v1610_v21 }
 0xdfd   :  { %1632 = vmatpush.msra.mxu1 %v1609_v63 }
 0xdff   :  { %1633 = vmatpush.msra.mxu1 %v1608_v54 }
 0xe00   :  { %2702 = vmatmul.msk.f32.vlgmr.msra.gmra.mxu1 %vm261_vm1, %v1481_v46 }
 0xe01   :  { %1910 = vmatpush.msrb.mxu1 %v3584_v18 }
 0xe03   :  { %1911 = vmatpush.msrb.mxu1 %v3595_v22 }
 0xe05   :  { %1912 = vmatpush.msrb.mxu1 %v3605_v30 }
 0xe07   :  { %1913 = vmatpush.msrb.mxu1 %v3617_v35 }
 0xe08   :  { %2703 = vmatmul.msk.f32.gmra.mxu1 %vm261_vm1, %v1484_v38 }
 0xe7d   :  { %v1635_v12 = vpop.f32.mrf.mxu1 }
 0xe7e   :  { %v1641_v47 = vmul.f32 0.35355338, %v1635_v12 }
 0xe80   :  { %2704 = vmatmul.msk.f32.vlgmr.msra.gmra.mxu2 %vm261_vm1, %v1641_v47 }
 0xe85   :  { %v1638_v42 = vpop.f32.mrf.mxu1 }
 0xe86   :  { %v1642_v32 = vmul.f32 0.35355338, %v1638_v42 }
 0xe88   :  { %2705 = vmatmul.msk.f32.gmra.mxu2 %vm261_vm1, %v1642_v32 }
 0xf03   :  { %v1666_v8 = vpop.f32.mrf.mxu2 }
 0xf04   :  { %v1667_v18 = vadd.f32 %v2933_v40, %v1666_v8 }
 0xf06   :  { %v3944_v22 = vadd.f32 %v1667_v18, %v3698_v7 }
 0xf08   :  { %v1674_v30 = vsel %vm261_vm1, %v3944_v22, 0.0 }
 0xf09   :  { %1675 = vadd.xlane.f32.xlu1 %v1674_v30 }
 0xf0b   :  { %v1669_v35 = vpop.f32.mrf.mxu2 }
 0xf0c   :  { %v1670_v36 = vadd.f32 %v2933_v40, %v1669_v35 }
 0xf0e   :  { %v3949_v53 = vadd.f32 %v1670_v36, %v3692_v56 }
 0xf10   :  { %v1677_v6 = vsel %vm265_vm2, %v3949_v53, 0.0 }
 0xf11   :  { %1678 = vadd.xlane.f32.xlu1 %v1677_v6 }
 0xf7c   :  { %v1676_v16 = vpop.xlane.xlu1 %1675 }
 0xf7d   :  { %v1680_v59 = vmul.f32 %v1676_v16, %v3394_v23 }
 0xf7f   :  { %v1682_v2 = vsub.f32 %v3944_v22, %v1680_v59 }
 0xf81   :  { %v1684_v7 = vmul.f32 %v1682_v2, %v1682_v2 }
 0xf83   :  { %v1686_v27 = vsel %vm261_vm1, %v1684_v7, 0.0 }
 0xf84   :  { %1687 = vadd.xlane.f32.xlu2 %v1686_v27  ;;  %v1679_v60 = vpop.xlane.xlu1 %1678 }
 0xf85   :  { %v1681_v50 = vmul.f32 %v1679_v60, %v3394_v23 }
 0xf87   :  { %v3958_v51 = vsub.f32 %v3949_v53, %v1681_v50 }
 0xf89   :  { %v1685_v56 = vmul.f32 %v3958_v51, %v3958_v51 }
 0xf8b   :  { %v1689_v52 = vsel %vm265_vm2, %v1685_v56, 0.0 }
 0xf8c   :  { %1690 = vadd.xlane.f32.xlu1 %v1689_v52 }
 0xff7   :  { %v1688_v10 = vpop.xlane.xlu2 %1687 }
 0xff8   :  { %v1692_v41 = vmul.f32 %v1688_v10, %v3424_v44 }
 0xffa   :  { %2860 = vrsqrt.f32 %v1692_v41  ;;  %vm1701_vm5 = vcmp.eq.f32.partialorder %v1692_v41, inf  ;;  %v1704_v32 = vand.u32 2147483648, %v1692_v41  ;;  %vm1703_vm6 = vcmp.eq.f32.partialorder %v1692_v41, 0.0 }
 0xfff   :  { %v1691_v11 = vpop.xlane.xlu1 %1690 }
0x1000   :  { %v2861_v34 = vpop.eup %2860  ;;  %v1693_v26 = vmul.f32 %v1691_v11, %v3424_v44 }
0x1001   :  { %v1695_v21 = vmul.f32 %v2861_v34, %v1692_v41 }
0x1002   :  { %2862 = vrsqrt.f32 %v1693_v26  ;;  %vm1713_vm7 = vcmp.eq.f32.partialorder %v1693_v26, inf  ;;  %v1716_v16 = vand.u32 2147483648, %v1693_v26  ;;  %vm1715_vm8 = vcmp.eq.f32.partialorder %v1693_v26, 0.0 }
0x1003   :  { %v1696_v63 = vmul.f32 %v2861_v34, %v1695_v21 }
0x1005   :  { %v1697_v54 = vmul.f32 0.5, %v1696_v63  ;;  %v2934_v63 = vld [vmem:[%s4162_s11] ss:$0 sm:$0xff] }
0x1007   :  { %v1698_v33 = vsub.f32 1.5, %v1697_v54  ;;  %v1748_v54 = vmul.f32 %v2934_v63, %v1682_v2  ;;  %v1749_v2 = vmul.f32 %v2934_v63, %v3958_v51 }
0x1008   :  { %v2863_v46 = vpop.eup %2862 }
0x1009   :  { %v1699_v38 = vmul.f32 %v2861_v34, %v1698_v33  ;;  %v1707_v12 = vmul.f32 %v2863_v46, %v1693_v26 }
0x100b   :  { %v1700_v47 = vmul.f32 %v1699_v38, %v1692_v41  ;;  %v1708_v42 = vmul.f32 %v2863_v46, %v1707_v12 }
0x100d   :  { %v1702_v8 = vsel %vm1701_vm5, %v1692_v41, %v1700_v47  ;;  %v1709_v40 = vmul.f32 0.5, %v1708_v42  ;;  %v2935_v42 = vld [vmem:[%s4163_s16] ss:$0 sm:$0xff] }
0x100e   :  { %v1705_v18 = vsel %vm1703_vm6, %v1704_v32, %v1702_v8 }
0x100f   :  { %v1718_v30 = vadd.f32 1e-06, %v1705_v18  ;;  %v1710_v35 = vsub.f32 1.5, %v1709_v40 }
0x1011   :  { %2864 = vrcp.f32 %v1718_v30  ;;  %v1711_v36 = vmul.f32 %v2863_v46, %v1710_v35  ;;  %v1731_v52 = vand.u32 2147483648, %v1718_v30  ;;  %v1729_v41 = vand.u32 2147483647, %v1718_v30 }
0x1012   :  { %vm1725_vm10 = vweird.f32 %v1718_v30 }
0x1013   :  { %v1712_v6 = vmul.f32 %v1711_v36, %v1693_v26  ;;  %v1732_v21 = vor.u32 1.1754944e-38, %v1731_v52  ;;  %vm1730_vm12 = vcmp.eq.f32.partialorder %v1729_v41, 8.507059e+37  ;;  %v2937_v52 = vld [vmem:[%s4165_s0] ss:$0 sm:$0xff] }
0x1015   :  { %v1714_v59 = vsel %vm1713_vm7, %v1693_v26, %v1712_v6 }
0x1016   :  { %v1717_v7 = vsel %vm1715_vm8, %v1716_v16, %v1714_v59 }
0x1017   :  { %v2865_v27 = vpop.eup %2864  ;;  %v1719_v60 = vadd.f32 1e-06, %v1717_v7  ;;  %v2936_v7 = vld [vmem:[%s4164_s12] ss:$0 sm:$0xff] }
0x1018   :  { %v1721_v50 = vmul.f32 %v2865_v27, %v1718_v30  ;;  %vm1726_vm9 = vweird.f32 %v2865_v27 }
0x1019   :  { %2866 = vrcp.f32 %v1719_v60  ;;  %vm1727_vm11 = vmor %vm1725_vm10, %vm1726_vm9  ;;  %v1745_v47 = vand.u32 2147483648, %v1719_v60  ;;  %v1743_v40 = vand.u32 2147483647, %v1719_v60  ;;  %vm1739_vm14 = vweird.f32 %v1719_v60 }
0x101a   :  { %v1722_v56 = vsub.f32 1.0, %v1721_v50 }
0x101b   :  { %v1746_v30 = vor.u32 1.1754944e-38, %v1745_v47  ;;  %vm1744_vm3 = vcmp.eq.f32.partialorder %v1743_v40, 8.507059e+37 }
0x101c   :  { %v1723_v10 = vmul.f32 %v2865_v27, %v1722_v56 }
0x101e   :  { %v1724_v11 = vadd.f32 %v2865_v27, %v1723_v10 }
0x101f   :  { %v2867_v34 = vpop.eup %2866 }
0x1020   :  { %v1728_v26 = vsel %vm1727_vm11, %v2865_v27, %v1724_v11  ;;  %v1735_v33 = vmul.f32 %v2867_v34, %v1719_v60  ;;  %vm1740_vm13 = vweird.f32 %v2867_v34 }
0x1021   :  { %v1733_v46 = vsel %vm1730_vm12, %v1732_v21, %v1728_v26  ;;  %vm1741_vm15 = vmor %vm1739_vm14, %vm1740_vm13 }
0x1022   :  { %v1750_v38 = vmul.f32 %v1748_v54, %v1733_v46  ;;  %v1736_v12 = vsub.f32 1.0, %v1735_v33 }
0x1024   :  { %v1752_v32 = vadd.f32 %v2935_v42, %v1750_v38  ;;  %v1737_v8 = vmul.f32 %v2867_v34, %v1736_v12 }
0x1026   :  { %2706 = vmatmul.msk.f32.vlgmr.msra.gmra.mxu3 %vm261_vm1, %v1752_v32  ;;  %v1738_v18 = vadd.f32 %v2867_v34, %v1737_v8 }
0x1027   :  { %2096 = vmatpush.msra.mxu3 %v3651_v1 }
0x1028   :  { %v1742_v35 = vsel %vm1741_vm15, %v2867_v34, %v1738_v18 }
0x1029   :  { %v1747_v36 = vsel %vm1744_vm3, %v1746_v30, %v1742_v35  ;;  %2097 = vmatpush.msra.mxu3 %v3654_v4 }
0x102a   :  { %v1751_v6 = vmul.f32 %v1749_v2, %v1747_v36 }
0x102b   :  { %2098 = vmatpush.msra.mxu3 %v3670_v24 }
0x102c   :  { %v1753_v16 = vadd.f32 %v2935_v42, %v1751_v6 }
0x102d   :  { %2099 = vmatpush.msra.mxu3 %v3674_v29 }
0x102e   :  { %2707 = vmatmul.msk.f32.gmra.mxu3 %vm261_vm1, %v1753_v16 }
0x10a9   :  { %v1777_v59 = vpop.f32.mrf.mxu3 }
0x10aa   :  { %v1778_v27 = vadd.f32 %v2936_v7, %v1777_v59 }
0x10ac   :  { %v1783_v1 = vmax.f32 %v1778_v27, 0.0 }
0x10ae   :  { %1801 = vmatmul.f32.vlgmr.msra.gmra.mxu0 %v1783_v1 }
0x10b1   :  { %v1780_v51 = vpop.f32.mrf.mxu3 }
0x10b2   :  { %v1781_v60 = vadd.f32 %v2936_v7, %v1780_v51 }
0x10b4   :  { %v1784_v50 = vmax.f32 %v1781_v60, 0.0 }
0x10b6   :  { %1804 = vmatmul.f32.gmra.mxu0 %v1784_v50 }
0x112b   :  { %v1802_v56 = vpop.f32.mrf.mxu0 }
0x112c   :  { %v1808_v4 = vadd.f32 %v1802_v56, %v3944_v22 }
0x112e   :  { %v3977_v10 = vadd.f32 %v2937_v52, %v1808_v4 }
0x1130   :  { %v1812_v24 = vsel %vm261_vm1, %v3977_v10, 0.0 }
0x1131   :  { %1813 = vadd.xlane.f32.xlu0 %v1812_v24 }
0x1133   :  { %v1805_v29 = vpop.f32.mrf.mxu0 }
0x1134   :  { %v1809_v41 = vadd.f32 %v1805_v29, %v3949_v53 }
0x1136   :  { %v3982_v11 = vadd.f32 %v2937_v52, %v1809_v41 }
0x1138   :  { %v1815_v34 = vsel %vm265_vm2, %v3982_v11, 0.0 }
0x1139   :  { %1816 = vadd.xlane.f32.xlu1 %v1815_v34 }
0x11a4   :  { %v1814_v21 = vpop.xlane.xlu0 %1813 }
0x11a5   :  { %v1818_v63 = vmul.f32 %v1814_v21, %v3394_v23 }
0x11a7   :  { %v1820_v22 = vsub.f32 %v3977_v10, %v1818_v63 }
0x11a9   :  { %v1822_v54 = vmul.f32 %v1820_v22, %v1820_v22 }
0x11ab   :  { %v1824_v26 = vsel %vm261_vm1, %v1822_v54, 0.0 }
0x11ac   :  { %1825 = vadd.xlane.f32.xlu0 %v1824_v26  ;;  %v1817_v33 = vpop.xlane.xlu1 %1816 }
0x11ad   :  { %v1819_v46 = vmul.f32 %v1817_v33, %v3394_v23 }
0x11af   :  { %v3991_v53 = vsub.f32 %v3982_v11, %v1819_v46 }
0x11b1   :  { %v1823_v38 = vmul.f32 %v3991_v53, %v3991_v53 }
0x11b3   :  { %v1827_v12 = vsel %vm265_vm2, %v1823_v38, 0.0 }
0x11b4   :  { %1828 = vadd.xlane.f32.xlu1 %v1827_v12 }
0x121f   :  { %v1826_v47 = vpop.xlane.xlu0 %1825 }
0x1220   :  { %v1830_v42 = vmul.f32 %v1826_v47, %v3424_v44 }
0x1222   :  { %2868 = vrsqrt.f32 %v1830_v42  ;;  %vm1839_vm5 = vcmp.eq.f32.partialorder %v1830_v42, inf  ;;  %v1842_v27 = vand.u32 2147483648, %v1830_v42  ;;  %vm1841_vm6 = vcmp.eq.f32.partialorder %v1830_v42, 0.0 }
0x1227   :  { %v1829_v32 = vpop.xlane.xlu1 %1828 }
0x1228   :  { %v2869_v8 = vpop.eup %2868  ;;  %v1831_v40 = vmul.f32 %v1829_v32, %v3424_v44 }
0x1229   :  { %v1833_v18 = vmul.f32 %v2869_v8, %v1830_v42 }
0x122a   :  { %2870 = vrsqrt.f32 %v1831_v40  ;;  %vm1851_vm7 = vcmp.eq.f32.partialorder %v1831_v40, inf  ;;  %v1854_v24 = vand.u32 2147483648, %v1831_v40  ;;  %vm1853_vm8 = vcmp.eq.f32.partialorder %v1831_v40, 0.0 }
0x122b   :  { %v1834_v30 = vmul.f32 %v2869_v8, %v1833_v18 }
0x122d   :  { %v1835_v2 = vmul.f32 0.5, %v1834_v30 }
0x122f   :  { %v1836_v35 = vsub.f32 1.5, %v1835_v2 }
0x1230   :  { %v2871_v36 = vpop.eup %2870 }
0x1231   :  { %v1837_v6 = vmul.f32 %v2869_v8, %v1836_v35  ;;  %v1845_v16 = vmul.f32 %v2871_v36, %v1831_v40 }
0x1233   :  { %v1838_v59 = vmul.f32 %v1837_v6, %v1830_v42  ;;  %v1846_v7 = vmul.f32 %v2871_v36, %v1845_v16 }
0x1235   :  { %v1840_v1 = vsel %vm1839_vm5, %v1830_v42, %v1838_v59  ;;  %v1847_v51 = vmul.f32 0.5, %v1846_v7  ;;  %v2938_v42 = vld [vmem:[%s3182_s25 + $0x1] ss:$0 sm:$0xff]  ;;  %s4167_s25 = sld [smem:[#allocation28_spill]] }
0x1236   :  { %v1843_v60 = vsel %vm1841_vm6, %v1842_v27, %v1840_v1  ;;  %v1886_v32 = vmul.f32 %v2938_v42, %v1820_v22  ;;  %v1887_v27 = vmul.f32 %v2938_v42, %v3991_v53 }
0x1237   :  { %v1856_v50 = vadd.f32 1e-06, %v1843_v60  ;;  %v1848_v56 = vsub.f32 1.5, %v1847_v51 }
0x1239   :  { %2872 = vrcp.f32 %v1856_v50  ;;  %v1849_v4 = vmul.f32 %v2871_v36, %v1848_v56  ;;  %v1869_v26 = vand.u32 2147483648, %v1856_v50  ;;  %v1867_v46 = vand.u32 2147483647, %v1856_v50  ;;  %v2939_v36 = vld [vmem:[%s3187_s29 + $0x1] ss:$0 sm:$0xff]  ;;  %s4168_s29 = sld [smem:[#allocation29_spill]] }
0x123a   :  { %vm1863_vm10 = vweird.f32 %v1856_v50 }
0x123b   :  { %v1850_v52 = vmul.f32 %v1849_v4, %v1831_v40  ;;  %v1870_v47 = vor.u32 1.1754944e-38, %v1869_v26  ;;  %vm1868_vm12 = vcmp.eq.f32.partialorder %v1867_v46, 8.507059e+37  ;;  %v2940_v4 = vld [vmem:[%s3207_s19 + $0x1] ss:$0 sm:$0xff]  ;;  %s4171_s19 = sld [smem:[#allocation32_spill]] }
0x123c   :  { %v2943_v46 = vld [vmem:[%s4159_s18 + $0x1] ss:$0 sm:$0xff] }
0x123d   :  { %v1852_v29 = vsel %vm1851_vm7, %v1831_v40, %v1850_v52 }
0x123e   :  { %v1855_v41 = vsel %vm1853_vm8, %v1854_v24, %v1852_v29 }
0x123f   :  { %v2873_v34 = vpop.eup %2872  ;;  %v1857_v21 = vadd.f32 1e-06, %v1855_v41 }
0x1240   :  { %v1859_v63 = vmul.f32 %v2873_v34, %v1856_v50  ;;  %vm1864_vm9 = vweird.f32 %v2873_v34 }
0x1241   :  { %2874 = vrcp.f32 %v1857_v21  ;;  %vm1865_vm11 = vmor %vm1863_vm10, %vm1864_vm9  ;;  %v1883_v35 = vand.u32 2147483648, %v1857_v21  ;;  %v1881_v59 = vand.u32 2147483647, %v1857_v21  ;;  %vm1877_vm14 = vweird.f32 %v1857_v21 }
0x1242   :  { %v1860_v54 = vsub.f32 1.0, %v1859_v63 }
0x1243   :  { %v1884_v22 = vor.u32 1.1754944e-38, %v1883_v35  ;;  %vm1882_vm3 = vcmp.eq.f32.partialorder %v1881_v59, 8.507059e+37 }
0x1244   :  { %v1861_v33 = vmul.f32 %v2873_v34, %v1860_v54 }
0x1246   :  { %v1862_v38 = vadd.f32 %v2873_v34, %v1861_v33 }
0x1247   :  { %v2875_v12 = vpop.eup %2874 }
0x1248   :  { %v1866_v8 = vsel %vm1865_vm11, %v2873_v34, %v1862_v38  ;;  %v1873_v40 = vmul.f32 %v2875_v12, %v1857_v21  ;;  %vm1878_vm13 = vweird.f32 %v2875_v12  ;;  %v2941_v34 = vld [vmem:[%s3217_s30 + $0x1] ss:$0 sm:$0xff]  ;;  %s4173_s30 = sld [smem:[#allocation34_spill]] }
0x1249   :  { %v1871_v18 = vsel %vm1868_vm12, %v1870_v47, %v1866_v8  ;;  %vm1879_vm15 = vmor %vm1877_vm14, %vm1878_vm13 }
0x124a   :  { %v1888_v30 = vmul.f32 %v1886_v32, %v1871_v18  ;;  %v1874_v2 = vsub.f32 1.0, %v1873_v40 }
0x124c   :  { %v1890_v6 = vadd.f32 %v2939_v36, %v1888_v30  ;;  %v1875_v16 = vmul.f32 %v2875_v12, %v1874_v2 }
0x124e   :  { %2708 = vmatmul.msk.f32.vlgmr.msrb.gmra.mxu1 %vm261_vm1, %v1890_v6  ;;  %2710 = vmatmul.msk.f32.vlgmr.msrb.gmra.mxu2 %vm261_vm1, %v1890_v6  ;;  %v1876_v7 = vadd.f32 %v2875_v12, %v1875_v16 }
0x124f   :  { %2712 = vmatmul.msk.f32.vlgmr.msrb.gmra.mxu3 %vm261_vm1, %v1890_v6 }
0x1250   :  { %v1880_v1 = vsel %vm1879_vm15, %v2875_v12, %v1876_v7 }
0x1251   :  { %v1885_v51 = vsel %vm1882_vm3, %v1884_v22, %v1880_v1 }
0x1252   :  { %v1889_v60 = vmul.f32 %v1887_v27, %v1885_v51 }
0x1254   :  { %v1891_v50 = vadd.f32 %v2939_v36, %v1889_v60 }
0x1256   :  { %2709 = vmatmul.msk.f32.gmra.mxu1 %vm261_vm1, %v1891_v50  ;;  %2711 = vmatmul.msk.f32.gmra.mxu2 %vm261_vm1, %v1891_v50 }
0x1257   :  { %2713 = vmatmul.msk.f32.gmra.mxu3 %vm261_vm1, %v1891_v50 }
0x12d1   :  { %v1938_v56 = vpop.f32.mrf.mxu2 }
0x12d2   :  { %v1939_v52 = vadd.f32 %v2940_v4, %v1938_v56  ;;  %v1961_v24 = vpop.f32.mrf.mxu3 }
0x12d3   :  { %v1962_v63 = vadd.f32 %v2941_v34, %v1961_v24 }
0x12d4   :  { %1967 = vxpose.xlu0.b32.start [1/2] (short) (narrow) %v1939_v52, 32 }
0x12d9   :  { %v1941_v29 = vpop.f32.mrf.mxu2 }
0x12da   :  { %v1942_v41 = vadd.f32 %v2940_v4, %v1941_v29  ;;  %v1964_v53 = vpop.f32.mrf.mxu3 }
0x12db   :  { %v1965_v21 = vadd.f32 %v2941_v34, %v1964_v53 }
0x12dc   :  { %1968 = vxpose.xlu0.b32.end [2/2] (short) (narrow) %v1942_v41, 32 }
0x12dd   :  { %2714 = vmatpush.msk.msra.mxu1 %vm257_vm0, %v1965_v21  ;;  %v4051_v21 = vld [vmem:[%s4162_s11 + $0x1] ss:$0 sm:$0xff] }
0x12df   :  { %2029 = vmatpush.msra.mxu1 %v1962_v63 }
0x12e1   :  { %2220 = vmatpush.msrb.mxu1 %v3768_v39 }
0x12e3   :  { %2221 = vmatpush.msrb.mxu1 %v3771_v49 }
0x12e5   :  { %2222 = vmatpush.msrb.mxu1 %v3781_v61 }
0x12e7   :  { %2223 = vmatpush.msrb.mxu1 %v3789_v0 }
0x12e9   :  { %2224 = vmatpush.msrb.mxu1 %v3797_v9  ;;  %v1915_v9 = vpop.f32.mrf.mxu1 }
0x12eb   :  { %2225 = vmatpush.msrb.mxu1 %v3805_v43 }
0x12ed   :  { %2226 = vmatpush.msrb.mxu1 %v3813_v5 }
0x12ef   :  { %2227 = vmatpush.msrb.mxu1 %v3819_v57 }
0x12f1   :  { %2228 = vmatpush.msrb.mxu1 %v3826_v14  ;;  %v1918_v43 = vpop.f32.mrf.mxu1 }
0x12f3   :  { %2229 = vmatpush.msrb.mxu1 %v3833_v17 }
0x12f5   :  { %2230 = vmatpush.msrb.mxu1 %v3840_v48 }
0x12f7   :  { %2231 = vmatpush.msrb.mxu1 %v3848_v45 }
0x12f9   :  { %2232 = vmatpush.msrb.mxu1 %v3854_v58 }
0x12fb   :  { %2233 = vmatpush.msrb.mxu1 %v3868_v3 }
0x12fd   :  { %2234 = vmatpush.msrb.mxu1 %v3872_v20  ;;  %v2942_v20 = vld [vmem:[%s4158_s8 + $0x1] ss:$0 sm:$0xff] }
0x12fe   :  { %v1919_v54 = vadd.f32 %v2942_v20, %v1918_v43 }
0x12ff   :  { %2235 = vmatpush.msrb.mxu1 %v3875_v25  ;;  %v1916_v25 = vadd.f32 %v2942_v20, %v1915_v9 }
0x1378   :  { %v1983_v39 = vpop.trf.xlu0 }
0x1379   :  { %2715 = vmatmul.msk.f32.vlgmr.msra.gmra.mxu1 %vm494_vm4, %v1983_v39 }
0x1380   :  { %v1984_v49 = vpop.trf.xlu0 }
0x1381   :  { %2716 = vmatmul.msk.f32.gmra.mxu1 %vm494_vm4, %v1984_v49 }
0x1388   :  { %v1985_v61 = vpop.trf.xlu0 }
0x1389   :  { %2717 = vmatmul.msk.f32.gmra.mxu1 %vm494_vm4, %v1985_v61 }
0x1390   :  { %v1986_v0 = vpop.trf.xlu0 }
0x1391   :  { %2718 = vmatmul.msk.f32.gmra.mxu1 %vm494_vm4, %v1986_v0 }
0x13f6   :  { %v2031_v5 = vpop.f32.mrf.mxu1 }
0x13f7   :  { %v2043_v3 = vmul.f32 %v3930_v28, %v2031_v5 }
0x13fe   :  { %v2034_v57 = vpop.f32.mrf.mxu1 }
0x13ff   :  { %v2044_v58 = vmul.f32 %v3927_v62, %v2034_v57 }
0x1406   :  { %v2037_v14 = vpop.f32.mrf.mxu1 }
0x1407   :  { %v2045_v45 = vmul.f32 %v3924_v15, %v2037_v14 }
0x140e   :  { %v2040_v17 = vpop.f32.mrf.mxu1 }
0x140f   :  { %v2046_v48 = vmul.f32 %v3921_v19, %v2040_v17  ;;  %v2802_v17 = vld [vmem:[%s4165_s0 + $0x1] ss:$0 sm:$0xff] }
0x1411   :  { %2065 = vmatpush.msra.mxu2 %v2046_v48 }
0x1413   :  { %2066 = vmatpush.msra.mxu2 %v2045_v45  ;;  %v1304_v45 = vadd.f32 %v3911_v31, %v3690_v55 }
0x1415   :  { %2067 = vmatpush.msra.mxu2 %v2044_v58 }
0x1417   :  { %2068 = vmatpush.msra.mxu2 %v2043_v3  ;;  %v1310_v3 = vadd.f32 %v2802_v17, %v1304_v45 }
0x1418   :  { %2719 = vmatmul.msk.f32.vlgmr.msra.gmra.mxu2 %vm261_vm1, %v1916_v25 }
0x1420   :  { %2720 = vmatmul.msk.f32.gmra.mxu2 %vm261_vm1, %v1919_v54 }
0x149b   :  { %v2070_v26 = vpop.f32.mrf.mxu2 }
0x149c   :  { %v2076_v19 = vmul.f32 0.35355338, %v2070_v26 }
0x149e   :  { %2721 = vmatmul.msk.f32.vlgmr.msra.gmra.mxu3 %vm261_vm1, %v2076_v19 }
0x14a3   :  { %v2073_v15 = vpop.f32.mrf.mxu2 }
0x14a4   :  { %v2077_v33 = vmul.f32 0.35355338, %v2073_v15 }
0x14a6   :  { %2722 = vmatmul.msk.f32.gmra.mxu3 %vm261_vm1, %v2077_v33 }
0x1521   :  { %v2101_v62 = vpop.f32.mrf.mxu3 }
0x1522   :  { %v2102_v28 = vadd.f32 %v2943_v46, %v2101_v62 }
0x1524   :  { %v2107_v38 = vadd.f32 %v2102_v28, %v3977_v10 }
0x1526   :  { %v2109_v12 = vsel %vm261_vm1, %v2107_v38, 0.0 }
0x1527   :  { %2110 = vadd.xlane.f32.xlu1 %v2109_v12 }
0x1529   :  { %v2104_v47 = vpop.f32.mrf.mxu3 }
0x152a   :  { %v2105_v42 = vadd.f32 %v2943_v46, %v2104_v47 }
0x152c   :  { %v4043_v32 = vadd.f32 %v2105_v42, %v3982_v11  ;;  %v2291_v42 = vld [vmem:[#allocation8 + $0x18] sm:$0xff] }
0x152d   :  { %2311 = vmatpush.msrb.mxu2 %v2291_v42 }
0x152e   :  { %v2112_v8 = vsel %vm265_vm2, %v4043_v32, 0.0 }
0x152f   :  { %2113 = vadd.xlane.f32.xlu0 %v2112_v8  ;;  %v2290_v8 = vld [vmem:[#allocation8 + $0x10] sm:$0xff] }
0x1530   :  { %2312 = vmatpush.msrb.mxu2 %v2290_v8 }
0x159a   :  { %v2111_v40 = vpop.xlane.xlu1 %2110 }
0x159b   :  { %v2115_v18 = vmul.f32 %v2111_v40, %v3394_v23  ;;  %v2289_v40 = vld [vmem:[#allocation8 + $0x8] sm:$0xff] }
0x159c   :  { %2313 = vmatpush.msrb.mxu2 %v2289_v40 }
0x159d   :  { %v2117_v30 = vsub.f32 %v2107_v38, %v2115_v18  ;;  %v2288_v18 = vld [vmem:[#allocation8] sm:$0xff] }
0x159e   :  { %2314 = vmatpush.msrb.mxu2 %v2288_v18 }
0x159f   :  { %v2119_v2 = vmul.f32 %v2117_v30, %v2117_v30  ;;  %v2183_v63 = vmul.f32 %v4051_v21, %v2117_v30 }
0x15a1   :  { %v2121_v35 = vsel %vm261_vm1, %v2119_v2, 0.0 }
0x15a2   :  { %2122 = vadd.xlane.f32.xlu1 %v2121_v35  ;;  %v2114_v19 = vpop.xlane.xlu0 %2113 }
0x15a3   :  { %v2116_v15 = vmul.f32 %v2114_v19, %v3394_v23 }
0x15a5   :  { %v4075_v46 = vsub.f32 %v4043_v32, %v2116_v15 }
0x1615   :  { %v2123_v10 = vpop.xlane.xlu1 %2122 }
0x1616   :  { %v2127_v36 = vmul.f32 %v2123_v10, %v3424_v44 }
0x1618   :  { %2876 = vrsqrt.f32 %v2127_v36  ;;  %vm2136_vm4 = vcmp.eq.f32.partialorder %v2127_v36, inf  ;;  %v2139_v1 = vand.u32 2147483648, %v2127_v36  ;;  %vm2138_vm5 = vcmp.eq.f32.partialorder %v2127_v36, 0.0 }
0x161e   :  { %v2877_v6 = vpop.eup %2876 }
0x161f   :  { %v2130_v16 = vmul.f32 %v2877_v6, %v2127_v36 }
0x1621   :  { %v2131_v11 = vmul.f32 %v2877_v6, %v2130_v16 }
0x1623   :  { %v2132_v59 = vmul.f32 0.5, %v2131_v11 }
0x1625   :  { %v2133_v7 = vsub.f32 1.5, %v2132_v59 }
0x1627   :  { %v2134_v22 = vmul.f32 %v2877_v6, %v2133_v7 }
0x1629   :  { %v2135_v27 = vmul.f32 %v2134_v22, %v2127_v36 }
0x162b   :  { %v2137_v51 = vsel %vm2136_vm4, %v2127_v36, %v2135_v27 }
0x162c   :  { %v2140_v60 = vsel %vm2138_vm5, %v2139_v1, %v2137_v51 }
0x162d   :  { %v2153_v50 = vadd.f32 1e-06, %v2140_v60 }
0x162f   :  { %2878 = vrcp.f32 %v2153_v50  ;;  %v2166_v24 = vand.u32 2147483648, %v2153_v50  ;;  %v2164_v41 = vand.u32 2147483647, %v2153_v50  ;;  %vm2160_vm7 = vweird.f32 %v2153_v50 }
0x1631   :  { %v2167_v34 = vor.u32 1.1754944e-38, %v2166_v24  ;;  %vm2165_vm9 = vcmp.eq.f32.partialorder %v2164_v41, 8.507059e+37 }
0x1635   :  { %v2879_v56 = vpop.eup %2878 }
0x1636   :  { %v2156_v4 = vmul.f32 %v2879_v56, %v2153_v50  ;;  %vm2161_vm6 = vweird.f32 %v2879_v56 }
0x1637   :  { %vm2162_vm8 = vmor %vm2160_vm7, %vm2161_vm6 }
0x1638   :  { %v2157_v52 = vsub.f32 1.0, %v2156_v4 }
0x163a   :  { %v2158_v29 = vmul.f32 %v2879_v56, %v2157_v52 }
0x163c   :  { %v2159_v53 = vadd.f32 %v2879_v56, %v2158_v29 }
0x163e   :  { %v2163_v39 = vsel %vm2162_vm8, %v2879_v56, %v2159_v53 }
0x163f   :  { %v2168_v49 = vsel %vm2165_vm9, %v2167_v34, %v2163_v39 }
0x1640   :  { %v2185_v61 = vmul.f32 %v2183_v63, %v2168_v49 }
0x1642   :  { %v2187_v0 = vadd.f32 %v3775_v13, %v2185_v61  ;;  %v1313_v13 = vsel %vm261_vm1, %v1310_v3, 0.0 }
0x1644   :  { %2723 = vmatmul.msk.f32.vlgmr.msrb.gmra.mxu0 %vm261_vm1, %v2187_v0 }
0x16c1   :  { %v2212_v9 = vpop.f32.mrf.mxu0 }
0x16c2   :  { %v2213_v43 = vadd.f32 %v3884_v37, %v2212_v9 }
0x16c4   :  { %v2218_v5 = vmax.f32 %v2213_v43, 0.0 }
0x16c6   :  { %2236 = vmatmul.f32.vlgmr.msrb.gmra.mxu1 %v2218_v5 }
0x1743   :  { %v2237_v57 = vpop.f32.mrf.mxu1 }
0x1744   :  { %v2242_v14 = vadd.f32 %v2237_v57, %v2107_v38  ;;  %v2120_v38 = vmul.f32 %v4075_v46, %v4075_v46 }
0x1746   :  { %v2243_v48 = vadd.f32 %v2802_v17, %v2242_v14  ;;  %v2124_v12 = vsel %vm265_vm2, %v2120_v38, 0.0 }
0x1748   :  { %v2244_v58 = vsel %vm261_vm1, %v2243_v48, 0.0 }
0x1749   :  { %2245 = vadd.xlane.f32.xlu1 %v2244_v58 }
0x1751   :  { %1314 = vadd.xlane.f32.xlu1 %v1313_v13  ;;  %v2803_v13 = vld [vmem:[%s4166_s5] ss:$0 sm:$0xff] }
0x17bc   :  { %v2246_v20 = vpop.xlane.xlu1 %2245 }
0x17bd   :  { %v2247_v25 = vmul.f32 %v2246_v20, %v3394_v23 }
0x17bf   :  { %v4063_v37 = vsub.f32 %v2243_v48, %v2247_v25 }
0x17c1   :  { %v2249_v54 = vmul.f32 %v4063_v37, %v4063_v37 }
0x17c3   :  { %v2250_v26 = vsel %vm261_vm1, %v2249_v54, 0.0 }
0x17c4   :  { %2251 = vadd.xlane.f32.xlu1 %v2250_v26  ;;  %v1315_v55 = vpop.xlane.xlu1 %1314 }
0x17c5   :  { %v1316_v31 = vmul.f32 %v1315_v55, %v3394_v23 }
0x17c7   :  { %v4070_v33 = vsub.f32 %v1310_v3, %v1316_v31 }
0x17c9   :  { %v1318_v62 = vmul.f32 %v4070_v33, %v4070_v33 }
0x17cb   :  { %v1319_v28 = vsel %vm261_vm1, %v1318_v62, 0.0  ;;  %v2281_v62 = vmul.f32 %v2803_v13, %v4063_v37 }
0x17cc   :  { %1320 = vadd.xlane.f32.xlu1 %v1319_v28 }
0x17d4   :  { %2125 = vadd.xlane.f32.xlu1 %v2124_v12 }
0x1837   :  { %v2252_v47 = vpop.xlane.xlu1 %2251 }
0x1838   :  { %v2253_v23 = vmul.f32 %v2252_v47, %v3424_v44 }
0x183a   :  { %2880 = vrsqrt.f32 %v2253_v23  ;;  %vm2261_vm2 = vcmp.eq.f32.partialorder %v2253_v23, inf  ;;  %v2264_v51 = vand.u32 2147483648, %v2253_v23  ;;  %vm2263_vm10 = vcmp.eq.f32.partialorder %v2253_v23, 0.0 }
0x183f   :  { %v1321_v32 = vpop.xlane.xlu1 %1320 }
0x1840   :  { %v2881_v30 = vpop.eup %2880  ;;  %v1322_v2 = vmul.f32 %v1321_v32, %v3424_v44  ;;  %v1353_v32 = vmul.f32 %v2803_v13, %v4070_v33 }
0x1841   :  { %v2255_v35 = vmul.f32 %v2881_v30, %v2253_v23 }
0x1842   :  { %2882 = vrsqrt.f32 %v1322_v2  ;;  %vm1330_vm11 = vcmp.eq.f32.partialorder %v1322_v2, inf  ;;  %vm1332_vm12 = vcmp.eq.f32.partialorder %v1322_v2, 0.0 }
0x1843   :  { %v2256_v10 = vmul.f32 %v2881_v30, %v2255_v35 }
0x1845   :  { %v2257_v36 = vmul.f32 0.5, %v2256_v10 }
0x1847   :  { %v2258_v6 = vsub.f32 1.5, %v2257_v36  ;;  %v2126_v16 = vpop.xlane.xlu1 %2125 }
0x1848   :  { %v2883_v11 = vpop.eup %2882  ;;  %v2128_v59 = vmul.f32 %v2126_v16, %v3424_v44  ;;  %v1333_v44 = vand.u32 2147483648, %v1322_v2 }
0x1849   :  { %v2259_v7 = vmul.f32 %v2881_v30, %v2258_v6  ;;  %v1324_v22 = vmul.f32 %v2883_v11, %v1322_v2 }
0x184a   :  { %2884 = vrsqrt.f32 %v2128_v59  ;;  %vm2148_vm13 = vcmp.eq.f32.partialorder %v2128_v59, inf  ;;  %v2151_v48 = vand.u32 2147483648, %v2128_v59  ;;  %vm2150_vm15 = vcmp.eq.f32.partialorder %v2128_v59, 0.0 }
0x184b   :  { %v2260_v27 = vmul.f32 %v2259_v7, %v2253_v23  ;;  %v1325_v1 = vmul.f32 %v2883_v11, %v1324_v22 }
0x184d   :  { %v2262_v60 = vsel %vm2261_vm2, %v2253_v23, %v2260_v27  ;;  %v1326_v50 = vmul.f32 0.5, %v1325_v1  ;;  %v2804_v23 = vld [vmem:[%s4167_s25] ss:$0 sm:$0xff]  ;;  %v2184_v1 = vmul.f32 %v4051_v21, %v4075_v46  ;;  %v2946_v21 = vld [vmem:[%s4164_s12 + $0x1] ss:$0 sm:$0xff] }
0x184e   :  { %v2265_v56 = vsel %vm2263_vm10, %v2264_v51, %v2262_v60 }
0x184f   :  { %v2266_v4 = vadd.f32 1e-06, %v2265_v56  ;;  %v1327_v52 = vsub.f32 1.5, %v1326_v50  ;;  %v2945_v56 = vld [vmem:[%s4163_s16 + $0x1] ss:$0 sm:$0xff] }
0x1850   :  { %v2885_v24 = vpop.eup %2884 }
0x1851   :  { %2886 = vrcp.f32 %v2266_v4  ;;  %v1328_v29 = vmul.f32 %v2883_v11, %v1327_v52  ;;  %v2142_v41 = vmul.f32 %v2885_v24, %v2128_v59  ;;  %v2278_v17 = vand.u32 2147483648, %v2266_v4 }
0x1852   :  { %v2276_v58 = vand.u32 2147483647, %v2266_v4  ;;  %vm2272_vm3 = vweird.f32 %v2266_v4  ;;  %v3147_v52 = vmov 2.0  }
0x1853   :  { %v1329_v53 = vmul.f32 %v1328_v29, %v1322_v2  ;;  %v2143_v34 = vmul.f32 %v2885_v24, %v2142_v41  ;;  %v2279_v26 = vor.u32 1.1754944e-38, %v2278_v17  ;;  %v2805_v29 = vld [vmem:[%s4168_s29] ss:$0 sm:$0xff] }
0x1854   :  { %vm2277_vm5 = vcmp.eq.f32.partialorder %v2276_v58, 8.507059e+37 }
0x1855   :  { %v1331_v63 = vsel %vm1330_vm11, %v1322_v2, %v1329_v53  ;;  %v2144_v39 = vmul.f32 0.5, %v2143_v34 }
0x1856   :  { %v1334_v49 = vsel %vm1332_vm12, %v1333_v44, %v1331_v63 }
0x1857   :  { %v2887_v61 = vpop.eup %2886  ;;  %v1335_v0 = vadd.f32 1e-06, %v1334_v49  ;;  %v2145_v9 = vsub.f32 1.5, %v2144_v39 }
0x1858   :  { %v2268_v43 = vmul.f32 %v2887_v61, %v2266_v4  ;;  %vm2273_vm14 = vweird.f32 %v2887_v61 }
0x1859   :  { %2888 = vrcp.f32 %v1335_v0  ;;  %v2146_v5 = vmul.f32 %v2885_v24, %v2145_v9  ;;  %vm2274_vm4 = vmor %vm2272_vm3, %vm2273_vm14  ;;  %v1347_v38 = vand.u32 2147483648, %v1335_v0  ;;  %v1345_v47 = vand.u32 2147483647, %v1335_v0 }
0x185a   :  { %v2269_v57 = vsub.f32 1.0, %v2268_v43  ;;  %vm1341_vm7 = vweird.f32 %v1335_v0 }
0x185b   :  { %v2147_v14 = vmul.f32 %v2146_v5, %v2128_v59  ;;  %v1348_v18 = vor.u32 1.1754944e-38, %v1347_v38  ;;  %vm1346_vm9 = vcmp.eq.f32.partialorder %v1345_v47, 8.507059e+37 }
0x185c   :  { %v2270_v45 = vmul.f32 %v2887_v61, %v2269_v57 }
0x185d   :  { %v2149_v3 = vsel %vm2148_vm13, %v2128_v59, %v2147_v14 }
0x185e   :  { %v2271_v20 = vadd.f32 %v2887_v61, %v2270_v45  ;;  %v2152_v25 = vsel %vm2150_vm15, %v2151_v48, %v2149_v3  ;;  %v2377_v3 = vld [vmem:[#allocation9 + $0x38] sm:$0xff] }
0x185f   :  { %v2889_v54 = vpop.eup %2888  ;;  %v2154_v19 = vadd.f32 1e-06, %v2152_v25  ;;  %2394 = vmatpush.msrb.mxu3 %v2377_v3 }
0x1860   :  { %v1337_v55 = vmul.f32 %v2889_v54, %v1335_v0  ;;  %v2275_v31 = vsel %vm2274_vm4, %v2887_v61, %v2271_v20  ;;  %vm1342_vm6 = vweird.f32 %v2889_v54  ;;  %v2376_v20 = vld [vmem:[#allocation9 + $0x30] sm:$0xff]  ;;  %vm2382_vm4 = vcmask 523264  }
0x1861   :  { %v2280_v15 = vsel %vm2277_vm5, %v2279_v26, %v2275_v31  ;;  %2890 = vrcp.f32 %v2154_v19  ;;  %vm1343_vm8 = vmor %vm1341_vm7, %vm1342_vm6  ;;  %v2178_v6 = vand.u32 2147483647, %v2154_v19  ;;  %v2180_v16 = vand.u32 2147483648, %v2154_v19  ;;  %2395 = vmatpush.msrb.mxu3 %v2376_v20  ;;  %v2373_v31 = vld [vmem:[#allocation9 + $0x18] sm:$0xff] }
0x1862   :  { %v1338_v28 = vsub.f32 1.0, %v1337_v55  ;;  %v2282_v42 = vmul.f32 %v2281_v62, %v2280_v15  ;;  %vm2174_vm10 = vweird.f32 %v2154_v19  ;;  %2892 = vrcp.f32 %v3147_v52  ;;  %v2372_v62 = vld [vmem:[#allocation9 + $0x10] sm:$0xff] }
0x1863   :  { %v2181_v33 = vor.u32 1.1754944e-38, %v2180_v16  ;;  %vm2179_vm12 = vcmp.eq.f32.partialorder %v2178_v6, 8.507059e+37 }
0x1864   :  { %v1339_v12 = vmul.f32 %v2889_v54, %v1338_v28  ;;  %v2283_v2 = vadd.f32 %v2804_v23, %v2282_v42  ;;  %v2371_v28 = vld [vmem:[#allocation9 + $0x8] sm:$0xff] }
0x1866   :  { %v1340_v8 = vadd.f32 %v2889_v54, %v1339_v12  ;;  %v2285_v59 = vrot.slane %v2283_v2, 7  ;;  %v2370_v12 = vld [vmem:[#allocation9] sm:$0xff]  ;;  %v2806_v2 = vld [vmem:[%s4169_s3] ss:$0 sm:$0xff] }
0x1867   :  { %v2891_v40 = vpop.eup %2890 }
0x1868   :  { %v1344_v30 = vsel %vm1343_vm8, %v2889_v54, %v1340_v8  ;;  %v2170_v35 = vmul.f32 %v2891_v40, %v2154_v19  ;;  %vm2175_vm2 = vweird.f32 %v2891_v40  ;;  %v2893_v24 = vpop.eup %2892  ;;  %v2375_v54 = vld [vmem:[#allocation9 + $0x28] sm:$0xff]  ;;  %v2374_v19 = vld [vmem:[#allocation9 + $0x20] sm:$0xff] }
0x1869   :  { %v1349_v10 = vsel %vm1346_vm9, %v1348_v18, %v1344_v30  ;;  %vm2176_vm11 = vmor %vm2174_vm10, %vm2175_vm2  ;;  %v2330_v41 = vmul.f32 2.0, %v2893_v24  ;;  %2396 = vmatpush.msrb.mxu3 %v2375_v54  ;;  %v2809_v54 = vld [vmem:[%s4172_s24] ss:$0 sm:$0xff] }
0x186a   :  { %v1354_v37 = vmul.f32 %v1353_v32, %v1349_v10  ;;  %v2171_v36 = vsub.f32 1.0, %v2170_v35 }
0x186b   :  { %v2331_v44 = vsub.f32 1.0, %v2330_v41  ;;  %2397 = vmatpush.msrb.mxu3 %v2374_v19 }
0x186c   :  { %v1358_v11 = vadd.f32 %v2804_v23, %v1354_v37  ;;  %v2172_v7 = vmul.f32 %v2891_v40, %v2171_v36  ;;  %v2807_v36 = vld [vmem:[%s4170_s14] ss:$0 sm:$0xff] }
0x186d   :  { %v2332_v0 = vmul.f32 %v2893_v24, %v2331_v44  ;;  %2398 = vmatpush.msrb.mxu3 %v2373_v31  ;;  %v2455_v44 = vld [vmem:[#allocation11 + $0x30] sm:$0xff]  ;;  %v2810_v31 = vld [vmem:[%s4173_s30] ss:$0 sm:$0xff] }
0x186e   :  { %v2287_v22 = vsel %vm257_vm0, %v1358_v11, %v2285_v59  ;;  %v2173_v27 = vadd.f32 %v2891_v40, %v2172_v7  ;;  %vm2321_vm0 = vcmask 517120  }
0x186f   :  { %2725 = vmatmul.msk.f32.vlgmr.msrb.gmra.mxu2 %vm261_vm1, %v2287_v22  ;;  %v2333_v5 = vadd.f32 %v2893_v24, %v2332_v0  ;;  %2399 = vmatpush.msrb.mxu3 %v2372_v62 }
0x1870   :  { %v2177_v51 = vsel %vm2176_vm11, %v2891_v40, %v2173_v27  ;;  %v2808_v27 = vld [vmem:[%s4171_s19] ss:$0 sm:$0xff] }
0x1871   :  { %v2182_v60 = vsel %vm2179_vm12, %v2181_v33, %v2177_v51  ;;  %2400 = vmatpush.msrb.mxu3 %v2371_v28  ;;  %vm2543_vm12 = vcmask 1024  }
0x1872   :  { %v2186_v50 = vmul.f32 %v2184_v1, %v2182_v60 }
0x1873   :  { %2401 = vmatpush.msrb.mxu3 %v2370_v12 }
0x1874   :  { %v2188_v4 = vadd.f32 %v2945_v56, %v2186_v50 }
0x1876   :  { %2724 = vmatmul.msk.f32.gmra.mxu0 %vm261_vm1, %v2188_v4  ;;  %vm2334_vm1 = vweird.f32 %v2893_v24 }
0x1877   :  { %v4097_v17 = vsel %vm2334_vm1, %v2893_v24, %v2333_v5 }
0x18f2   :  { %v2316_v53 = vpop.f32.mrf.mxu2 }
0x18f3   :  { %v2317_v34 = vadd.f32 %v2805_v29, %v2316_v53  ;;  %v2215_v63 = vpop.f32.mrf.mxu0  ;;  %v2456_v53 = vld [vmem:[#allocation11 + $0x38] sm:$0xff] }
0x18f4   :  { %v2216_v46 = vadd.f32 %v2946_v21, %v2215_v63  ;;  %2472 = vmatpush.msra.mxu0 %v2456_v53  ;;  %v2454_v21 = vld [vmem:[#allocation11 + $0x28] sm:$0xff] }
0x18f5   :  { %v2322_v39 = vsel %vm2321_vm0, %v2317_v34, 0.0 }
0x18f6   :  { %v2323_v49 = vrot.slane %v2322_v39, 4  ;;  %v2219_v61 = vmax.f32 %v2216_v46, 0.0  ;;  %2473 = vmatpush.msra.mxu0 %v2455_v44 }
0x18f8   :  { %v2324_v9 = vadd.f32 %v2323_v49, %v2322_v39  ;;  %2239 = vmatmul.f32.gmra.mxu1 %v2219_v61  ;;  %2474 = vmatpush.msra.mxu0 %v2454_v21  ;;  %v2453_v39 = vld [vmem:[#allocation11 + $0x20] sm:$0xff]  ;;  %v2452_v61 = vld [vmem:[#allocation11 + $0x18] sm:$0xff] }
0x18fa   :  { %v2325_v43 = vrot.slane %v2324_v9, 2  ;;  %2475 = vmatpush.msra.mxu0 %v2453_v39 }
0x18fc   :  { %v2326_v57 = vadd.f32 %v2325_v43, %v2324_v9  ;;  %2476 = vmatpush.msra.mxu0 %v2452_v61  ;;  %v2451_v9 = vld [vmem:[#allocation11 + $0x10] sm:$0xff]  ;;  %v2450_v43 = vld [vmem:[#allocation11 + $0x8] sm:$0xff]  ;;  %v2815_v61 = vld [vmem:[#allocation2] ss:$0 sm:$0xff] }
0x18fe   :  { %v2327_v14 = vrot.slane %v2326_v57, 1  ;;  %2477 = vmatpush.msra.mxu0 %v2451_v9 }
0x1900   :  { %v2328_v48 = vadd.f32 %v2327_v14, %v2326_v57  ;;  %v2449_v57 = vld [vmem:[#allocation11] sm:$0xff]  ;;  %2478 = vmatpush.msra.mxu0 %v2450_v43 }
0x1902   :  { %v2336_v45 = vmul.f32 %v4097_v17, %v2328_v48  ;;  %2479 = vmatpush.msra.mxu0 %v2449_v57 }
0x1904   :  { %v2337_v58 = vsub.f32 %v2317_v34, %v2336_v45 }
0x1906   :  { %v2338_v13 = vmul.f32 %v2337_v58, %v2337_v58  ;;  %v2350_v37 = vmul.f32 %v2806_v2, %v2337_v58 }
0x1908   :  { %v2339_v25 = vsel %vm2321_vm0, %v2338_v13, 0.0 }
0x1909   :  { %v2340_v26 = vrot.slane %v2339_v25, 4 }
0x190b   :  { %v2341_v55 = vadd.f32 %v2340_v26, %v2339_v25 }
0x190d   :  { %v2342_v15 = vrot.slane %v2341_v55, 2 }
0x190f   :  { %v2343_v38 = vadd.f32 %v2342_v15, %v2341_v55 }
0x1911   :  { %v2344_v47 = vrot.slane %v2343_v38, 1 }
0x1913   :  { %v2345_v23 = vadd.f32 %v2344_v47, %v2343_v38  ;;  %v2811_v47 = vld [vmem:[%s4174_s15] ss:$0 sm:$0xff] }
0x1915   :  { %v2346_v42 = vmul.f32 %v2345_v23, %v4097_v17 }
0x1917   :  { %v2351_v8 = vadd.f32 1e-05, %v2346_v42 }
0x1919   :  { %2894 = vrsqrt.f32 %v2351_v8  ;;  %vm2358_vm14 = vweird.f32 %v2351_v8 }
0x191f   :  { %v2895_v40 = vpop.eup %2894 }
0x1920   :  { %v2353_v32 = vmul.f32 %v2895_v40, %v2351_v8  ;;  %vm2359_vm13 = vweird.f32 %v2895_v40 }
0x1921   :  { %vm2360_vm15 = vmor %vm2358_vm14, %vm2359_vm13 }
0x1922   :  { %v2354_v18 = vmul.f32 %v2895_v40, %v2353_v32 }
0x1924   :  { %v2355_v30 = vmul.f32 0.5, %v2354_v18 }
0x1926   :  { %v2356_v35 = vsub.f32 1.5, %v2355_v30 }
0x1928   :  { %v2357_v10 = vmul.f32 %v2895_v40, %v2356_v35 }
0x192a   :  { %v2361_v6 = vsel %vm2360_vm15, %v2895_v40, %v2357_v10 }
0x192b   :  { %v2362_v16 = vmul.f32 %v2361_v6, %v2350_v37 }
0x192d   :  { %v2366_v11 = vadd.f32 %v2807_v36, %v2362_v16 }
0x192f   :  { %vm2367_vm3 = vcmp.ge.f32.partialorder %v2366_v11, 0.0  ;;  %v2368_v59 = vmul.f32 0.01, %v2366_v11 }
0x1931   :  { %v2369_v7 = vsel %vm2367_vm3, %v2366_v11, %v2368_v59 }
0x1932   :  { %2726 = vmatmul.msk.f32.vlgmr.msrb.gmra.mxu3 %vm2382_vm4, %v2369_v7 }
0x1975   :  { %v2240_v22 = vpop.f32.mrf.mxu1 }
0x19b5   :  { %v2403_v33 = vpop.f32.mrf.mxu3 }
0x19b6   :  { %v2404_v1 = vadd.f32 %v2808_v27, %v2403_v33 }
0x19b8   :  { %v2408_v51 = vsel %vm2321_vm0, %v2404_v1, 0.0 }
0x19b9   :  { %v2409_v60 = vrot.slane %v2408_v51, 4 }
0x19bb   :  { %v2410_v50 = vadd.f32 %v2409_v60, %v2408_v51 }
0x19bd   :  { %v2411_v56 = vrot.slane %v2410_v50, 2 }
0x19bf   :  { %v2412_v4 = vadd.f32 %v2411_v56, %v2410_v50 }
0x19c1   :  { %v2413_v52 = vrot.slane %v2412_v4, 1 }
0x19c3   :  { %v2414_v24 = vadd.f32 %v2413_v52, %v2412_v4  ;;  %v2812_v4 = vld [vmem:[%s4175_s27] ss:$0 sm:$0xff] }
0x19c5   :  { %v2415_v29 = vmul.f32 %v2414_v24, %v4097_v17 }
0x19c7   :  { %v2416_v41 = vsub.f32 %v2404_v1, %v2415_v29 }
0x19c9   :  { %v2417_v34 = vmul.f32 %v2416_v41, %v2416_v41  ;;  %v2429_v55 = vmul.f32 %v2809_v54, %v2416_v41  ;;  %v2813_v41 = vld [vmem:[%s3327_s9] ss:$0 sm:$0xff]  ;;  %s3148_s9 = smov [#allocation12]  }
0x19cb   :  { %v2418_v63 = vsel %vm2321_vm0, %v2417_v34, 0.0 }
0x19cc   :  { %v2419_v46 = vrot.slane %v2418_v63, 4 }
0x19ce   :  { %v2420_v49 = vadd.f32 %v2419_v46, %v2418_v63  ;;  %v2814_v63 = vld [vmem:[%s3332_s6] ss:$0 sm:$0xff]  ;;  %s2559_s6 = sshll.u32 %s3148_s9, 4  ;;  %s2560_s6 = int_to_ptr.vmem [resolvable:$true] %s2559_s6 }
0x19d0   :  { %v2421_v0 = vrot.slane %v2420_v49, 2 }
0x19d2   :  { %v2422_v5 = vadd.f32 %v2421_v0, %v2420_v49  ;;  %v2540_v0 = vld [vmem:[%s4176_s23] sm:$0x3] }
0x19d4   :  { %v2423_v14 = vrot.slane %v2422_v5, 1 }
0x19d6   :  { %v2424_v48 = vadd.f32 %v2423_v14, %v2422_v5 }
0x19d8   :  { %v2425_v45 = vmul.f32 %v2424_v48, %v4097_v17 }
0x19da   :  { %v2430_v58 = vadd.f32 1e-05, %v2425_v45 }
0x19dc   :  { %2896 = vrsqrt.f32 %v2430_v58  ;;  %vm2437_vm6 = vweird.f32 %v2430_v58 }
0x19e2   :  { %v2897_v3 = vpop.eup %2896 }
0x19e3   :  { %v2432_v13 = vmul.f32 %v2897_v3, %v2430_v58  ;;  %vm2438_vm5 = vweird.f32 %v2897_v3 }
0x19e4   :  { %vm2439_vm7 = vmor %vm2437_vm6, %vm2438_vm5 }
0x19e5   :  { %v2433_v20 = vmul.f32 %v2897_v3, %v2432_v13 }
0x19e7   :  { %v2434_v25 = vmul.f32 0.5, %v2433_v20 }
0x19e9   :  { %v2435_v26 = vsub.f32 1.5, %v2434_v25 }
0x19eb   :  { %v2436_v19 = vmul.f32 %v2897_v3, %v2435_v26 }
0x19ed   :  { %v2440_v15 = vsel %vm2439_vm7, %v2897_v3, %v2436_v19 }
0x19ee   :  { %v2441_v62 = vmul.f32 %v2440_v15, %v2429_v55 }
0x19f0   :  { %v2445_v28 = vadd.f32 %v2810_v31, %v2441_v62 }
0x19f2   :  { %vm2446_vm8 = vcmp.ge.f32.partialorder %v2445_v28, 0.0  ;;  %v2447_v38 = vmul.f32 0.01, %v2445_v28 }
0x19f4   :  { %v2448_v12 = vsel %vm2446_vm8, %v2445_v28, %v2447_v38 }
0x19f5   :  { %2727 = vmatmul.msk.f32.vlgmr.msra.gmra.mxu0 %vm2382_vm4, %v2448_v12 }
0x1a72   :  { %v2481_v23 = vpop.f32.mrf.mxu0 }
0x1a73   :  { %v2482_v42 = vadd.f32 %v2811_v47, %v2481_v23 }
0x1a75   :  { %v2486_v8 = vsel %vm2321_vm0, %v2482_v42, 0.0 }
0x1a76   :  { %v2487_v40 = vrot.slane %v2486_v8, 4 }
0x1a78   :  { %v2488_v32 = vadd.f32 %v2487_v40, %v2486_v8 }
0x1a7a   :  { %v2489_v18 = vrot.slane %v2488_v32, 2 }
0x1a7c   :  { %v2490_v30 = vadd.f32 %v2489_v18, %v2488_v32 }
0x1a7e   :  { %v2491_v2 = vrot.slane %v2490_v30, 1 }
0x1a80   :  { %v2492_v35 = vadd.f32 %v2491_v2, %v2490_v30 }
0x1a82   :  { %v2493_v10 = vmul.f32 %v2492_v35, %v4097_v17 }
0x1a84   :  { %v2494_v37 = vsub.f32 %v2482_v42, %v2493_v10 }
0x1a86   :  { %v2495_v36 = vmul.f32 %v2494_v37, %v2494_v37  ;;  %v2507_v29 = vmul.f32 %v2812_v4, %v2494_v37 }
0x1a88   :  { %v2496_v6 = vsel %vm2321_vm0, %v2495_v36, 0.0 }
0x1a89   :  { %v2497_v16 = vrot.slane %v2496_v6, 4 }
0x1a8b   :  { %v2498_v11 = vadd.f32 %v2497_v16, %v2496_v6 }
0x1a8d   :  { %v2499_v59 = vrot.slane %v2498_v11, 2 }
0x1a8f   :  { %v2500_v7 = vadd.f32 %v2499_v59, %v2498_v11 }
0x1a91   :  { %v2501_v22 = vrot.slane %v2500_v7, 1 }
0x1a93   :  { %v2502_v27 = vadd.f32 %v2501_v22, %v2500_v7 }
0x1a95   :  { %v2503_v33 = vmul.f32 %v2502_v27, %v4097_v17 }
0x1a97   :  { %v2508_v1 = vadd.f32 1e-05, %v2503_v33 }
0x1a99   :  { %2898 = vrsqrt.f32 %v2508_v1  ;;  %vm2515_vm2 = vweird.f32 %v2508_v1 }
0x1a9f   :  { %v2899_v51 = vpop.eup %2898 }
0x1aa0   :  { %v2510_v60 = vmul.f32 %v2899_v51, %v2508_v1  ;;  %vm2516_vm9 = vweird.f32 %v2899_v51 }
0x1aa1   :  { %vm2517_vm10 = vmor %vm2515_vm2, %vm2516_vm9 }
0x1aa2   :  { %v2511_v50 = vmul.f32 %v2899_v51, %v2510_v60 }
0x1aa4   :  { %v2512_v56 = vmul.f32 0.5, %v2511_v50 }
0x1aa6   :  { %v2513_v52 = vsub.f32 1.5, %v2512_v56 }
0x1aa8   :  { %v2514_v24 = vmul.f32 %v2899_v51, %v2513_v52 }
0x1aaa   :  { %v2518_v53 = vsel %vm2517_vm10, %v2899_v51, %v2514_v24 }
0x1aab   :  { %v2519_v34 = vmul.f32 %v2518_v53, %v2507_v29 }
0x1aad   :  { %v2523_v44 = vadd.f32 %v2813_v41, %v2519_v34 }
0x1aaf   :  { %vm2524_vm11 = vcmp.ge.f32.partialorder %v2523_v44, 0.0  ;;  %v2525_v21 = vmul.f32 0.01, %v2523_v44 }
0x1ab1   :  { %v2526_v46 = vsel %vm2524_vm11, %v2523_v44, %v2525_v21 }
0x1ab2   :  { %v2531_v39 = vmul.f32 %v2814_v63, %v2526_v46 }
0x1ab4   :  { %v2532_v49 = vsel %vm2321_vm0, %v2531_v39, 0.0  ;;  %vm2552_vm0 = vcmask 0  }
0x1ab5   :  { %2533 = vadd.xlane.f32.xlu1 %v2532_v49 }
0x1b28   :  { %v2534_v9 = vpop.xlane.xlu1 %2533 }
0x1b29   :  { %v2539_v43 = vadd.f32 %v2815_v61, %v2534_v9 }
0x1b2b   :  { %v2541_v5 = vsub.f32 %v2539_v43, %v2540_v0 }
0x1b2d   :  { %v2542_v57 = vand.u32 2147483647, %v2541_v5 }
0x1b2f   :  { %v2544_v14 = vsel %vm2543_vm12, %v2542_v57, 0.0 }
0x1b30   :  { %v2545_v48 = vrot.slane %v2544_v14, 4 }
0x1b32   :  { %v2546_v45 = vadd.f32 %v2545_v48, %v2544_v14 }
0x1b34   :  { %v2547_v58 = vrot.slane %v2546_v45, 2 }
0x1b36   :  { %v2548_v3 = vadd.f32 %v2547_v58, %v2546_v45 }
0x1b38   :  { %v2549_v13 = vrot.slane %v2548_v3, 1 }
0x1b3a   :  { %v2550_v20 = vadd.f32 %v2549_v13, %v2548_v3 }
0x1b3c   :  { %v2551_v25 = vmul.f32 %v2550_v20, %v4097_v17 }
0x1b3e   :  { %2553 = vst.msk [vmem:[#allocation12] sm:$0x1] %vm2552_vm0, %v2551_v25 }
0x1b3f   :  { %3090 = shalt.err (!%p3087_p1)
}
0x1b40   :  { %2564 = dma.vmem_to_hbm [thread:$0]  %s2560_s6, 16, %s2562_s26, [#allocation5]  }
0x1b41   :  { %3097 = dma.done.wait [#allocation5], 16  }
0x1b42   :  { %3098 = vsyncadd [#allocation5], 4294967280 }
0x1b43   :  { %2569 = vsyncpa [#allocation4], 1 }
0x1b44   :  { %2570 = vsyncpa [#allocation7], 1 }
0x1b45   :  { %2571 = vsyncpa [#allocation10], 1 }
0x1b46   :  { %2572 = vsyncpa [#allocation5], 1 }

</bundles_post_ra>
